<compile_context>
chip_gen: v6e
topology: v6e:2x2x1
jax: 0.10.0
libtpu: 0.0.40
codegen_flags: <defaults>
</compile_context>

<pallas_src>
import jax
import jax.numpy as jnp
from jax.experimental import pallas as pl
from jax.experimental.pallas import tpu as pltpu


def _align16(v):
    return ((v + 15) // 16) * 16


def _make_kernel(C, C8A, N, N_pad, TJ, PCHUNK):
    NCHUNK = N_pad // PCHUNK
    H_OFF = 2 * C8A          # row offset of the h section in the proj scratch

    def kernel(gamma_ref, x_ref, w_ref, out_ref, proj_s, acc_s):
        # gamma_ref: (1,) f32 in SMEM
        # x_ref:     (1, C, N_pad) f32 or bf16 -- resident across the j axis
        # w_ref:     (R, C) bf16 -- zero-padded stacked [Wf; Wg; Wh]
        # proj_s:    (R, N_pad) bf16 scratch holding the [f; g; h] projections
        # acc_s:     (C, N_pad) f32 output accumulator
        j = pl.program_id(1)
        nj = pl.num_programs(1)

        # ---- once per batch element: fused projection + accumulator init ----
        @pl.when(j == 0)
        def _init():
            w = w_ref[...]                                       # (R, C) bf16

            def _chunk(c, carry):
                off = pl.multiple_of(c * PCHUNK, PCHUNK)
                xb = x_ref[0, :, pl.ds(off, PCHUNK)].astype(jnp.bfloat16)
                proj_s[:, pl.ds(off, PCHUNK)] = jnp.dot(
                    w, xb, preferred_element_type=jnp.float32
                ).astype(jnp.bfloat16)                           # single store
                return carry

            jax.lax.fori_loop(0, NCHUNK, _chunk, 0)
            acc_s[...] = jnp.zeros_like(acc_s)

        # ---- per p-tile: logits -> row softmax -> accumulate ----------------
        joff = pl.multiple_of(j * TJ, TJ)
        f_blk = proj_s[pl.ds(0, C8A), pl.ds(joff, TJ)]           # (C8A, TJ)
        g_blk = proj_s[pl.ds(C8A, C8A), :]                       # (C8A, N_pad)
        h_blk = proj_s[pl.ds(H_OFF, C), pl.ds(joff, TJ)]         # (C, TJ)

        # logits[jj, i] = sum_k f[k, joff+jj] * g[k, i]  (no materialized f^T;
        # the zero-padded rows of f/g contribute exactly 0).
        logits = jax.lax.dot_general(
            f_blk, g_blk,
            dimension_numbers=(((0,), (0,)), ((), ())),
            preferred_element_type=jnp.float32)                  # (TJ, N_pad)

        m = jnp.max(logits, axis=-1, keepdims=True)              # (TJ, 1)
        # Keep only a bf16 copy of e for the PV matmul (exp in f32, immediate
        # cast); the row sum accumulates in f32.
        e = jnp.exp(logits - m).astype(jnp.bfloat16)             # (TJ, N_pad)
        l = jnp.sum(e, axis=-1, keepdims=True, dtype=jnp.float32)
        if N_pad != N:
            # Padded x columns are exactly zero -> their logits are exactly 0
            # -> each padded key contributes bf16(exp(-m)) to the row sum.
            # Correct the denominator with a scalar per row instead of masking.
            pad_e = jnp.exp(-m).astype(jnp.bfloat16).astype(jnp.float32)
            l = jnp.maximum(l - (N_pad - N) * pad_e, 1e-30)

        inv_l = pl.reciprocal(l, approx=False)                   # exact; (TJ,1)

        # Fold 1/l into h's columns: O(C*TJ) instead of an O(TJ*N) rescale of e.
        h_scaled = (h_blk.astype(jnp.float32) * jnp.transpose(inv_l)
                    ).astype(jnp.bfloat16)                       # (C, TJ)
        acc_s[...] += jnp.dot(h_scaled, e,
                              preferred_element_type=jnp.float32)  # (C, N_pad)

        # ---- finalize: gamma scale + residual -------------------------------
        @pl.when(j == nj - 1)
        def _finalize():
            gamma = gamma_ref[0]
            out_ref[0] = (gamma * acc_s[...]
                          + x_ref[0].astype(jnp.float32)).astype(out_ref.dtype)

    return kernel


def self_attention(x, wf, wg, wh, gamma, *, tj=None):
    """x: (B, C, W, H) float32 (NCHW, same as the PyTorch module)."""
    B, C, W, H = x.shape
    C8 = wf.shape[0]
    assert wf.shape == (C8, C) and wg.shape == (C8, C) and wh.shape == (C, C)

    N = W * H
    N_pad = ((N + 127) // 128) * 128              # lane-dense spatial axis

    # Physical VMEM drives the request cap and the "compact" (v7x-style) mode.
    try:
        vmem_phys = int(pltpu.get_tpu_info().vmem_capacity_bytes)
    except Exception:
        vmem_phys = 128 * 1024 * 1024
    compact = vmem_phys <= 64 * 1024 * 1024       # v7x: 64 MiB per TensorCore

    try:
        kind = jax.devices()[0].device_kind.lower()
    except Exception:
        kind = ""
    is_v5e = ("v5 lite" in kind) or ("v5e" in kind)

    if tj is None:
        # TJ is the K-dim of the PV matmul: keep 256 on the 256-deep MXU
        # (v6e/v7x); on v5e's 128-deep MXU, TJ=128 is MXU-cycle-neutral and
        # halves the (TJ, N_pad) softmax temporaries for large N.
        tj = 128 if (is_v5e and N_pad >= 4096) else 256
        if N_pad % tj != 0:
            tj = 128
    tj = min(tj, N_pad)
    assert N_pad % tj == 0
    NJ = N_pad // tj

    x_flat = x.reshape(B, C, N)
    if N_pad != N:
        x_flat = jnp.pad(x_flat, ((0, 0), (0, 0), (0, N_pad - N)))
    if compact:
        # Small-VMEM parts: halve the resident x block; the kernel consumes
        # bf16 operands anyway and the residual add is still performed in f32.
        x_flat = x_flat.astype(jnp.bfloat16)

    # Stack the 1x1-conv weights into ONE matrix with 16-row-aligned, zero
    # padded sections [f; g; h] so the per-batch projection is a single matmul
    # with a single scratch store and all per-step reads are sublane-aligned.
    C8A = _align16(C8)
    CA = _align16(C)
    R = 2 * C8A + CA
    w_stacked = jnp.zeros((R, C), jnp.bfloat16)
    w_stacked = w_stacked.at[0:C8].set(wf.astype(jnp.bfloat16))
    w_stacked = w_stacked.at[C8A:C8A + C8].set(wg.astype(jnp.bfloat16))
    w_stacked = w_stacked.at[2 * C8A:2 * C8A + C].set(wh.astype(jnp.bfloat16))
    gamma_arr = jnp.asarray(gamma, jnp.float32).reshape(1)

    pchunk = tj                                   # projection column chunk
    kernel = _make_kernel(C, C8A, N, N_pad, tj, pchunk)

    # Explicit VMEM request: ~2x the static estimate, capped at ~85% of the
    # physical per-core capacity (leave headroom for Mosaic internal scratch).
    x_bytes = 2 if compact else 4
    est = (
        2 * C * N_pad * x_bytes                   # x block (double-buffered)
        + 2 * C * N_pad * 4                       # out block
        + 2 * R * C * 2                           # stacked weights
        + R * N_pad * 2                           # bf16 [f; g; h] scratch
        + C * N_pad * 4                           # f32 accumulator
        + tj * N_pad * (4 + 2)                    # logits f32 + e bf16
        + R * pchunk * 4                          # projection f32 chunk
    )
    cap = int(vmem_phys * 0.85)
    vmem_limit = min(cap, max(32 * 1024 * 1024, 2 * est))

    out = pl.pallas_call(
        kernel,
        out_shape=jax.ShapeDtypeStruct((B, C, N_pad), x.dtype),
        grid_spec=pltpu.PrefetchScalarGridSpec(
            num_scalar_prefetch=0,
            grid=(B, NJ),
            in_specs=[
                pl.BlockSpec(memory_space=pltpu.MemorySpace.SMEM),      # gamma
                pl.BlockSpec((1, C, N_pad), lambda b, j: (b, 0, 0)),    # x
                pl.BlockSpec((R, C), lambda b, j: (0, 0)),              # W
            ],
            out_specs=pl.BlockSpec((1, C, N_pad), lambda b, j: (b, 0, 0)),
            scratch_shapes=[
                pltpu.VMEM((R, N_pad), jnp.bfloat16),   # [f; g; h] projections
                pltpu.VMEM((C, N_pad), jnp.float32),    # o accumulator
            ],
        ),
        compiler_params=pltpu.CompilerParams(
            dimension_semantics=("parallel", "arbitrary"),
            vmem_limit_bytes=vmem_limit),
    )(gamma_arr, x_flat, w_stacked)

    if N_pad != N:
        out = out[:, :, :N]
    return out.reshape(B, C, W, H)


def ref_self_attention(x, wf, wg, wh, gamma):
    """Pure-JAX f32 reference matching the PyTorch forward."""
    B, C, W, H = x.shape
    N = W * H
    xf = x.reshape(B, C, N)
    f_x = jnp.einsum('kc,bcn->bkn', wf, xf)
    g_x = jnp.einsum('kc,bcn->bkn', wg, xf)
    logits = jnp.einsum('bkp,bkq->bpq', f_x, g_x)          # (B, N, N)
    attn = jax.nn.softmax(logits, axis=-1)
    h_x = jnp.einsum('kc,bcn->bkn', wh, xf)
    o = jnp.einsum('bcp,bpq->bcq', h_x, attn)              # torch.bmm(h_x, attn)
    return (gamma * o + xf).reshape(B, C, W, H)


if __name__ == "__main__":
    # Small smoke-test shapes (C divisible by 8; W*H = 400 pads to 512 lanes):
    # exercises the padded-column denominator correction, chunked projection,
    # multi-tile accumulation and the init/finalize paths.
    # NOTE: do NOT draw performance conclusions at this size -- each grid step
    # is overhead/DMA bound here; benchmark with production DeOldify shapes
    # (C in the hundreds, N in the thousands) where the kernel is MXU-bound.
    B, C, W, H = 2, 32, 20, 20
    C8 = C // 8

    key = jax.random.PRNGKey(0)
    kx, kf, kg, kh = jax.random.split(key, 4)

    x = jax.random.normal(kx, (B, C, W, H), dtype=jnp.float32)
    # 1x1 conv weights (bias=False): Conv2d weight (out, in, 1, 1) -> (out, in)
    wf = 0.1 * jax.random.normal(kf, (C8, C), dtype=jnp.float32)
    wg = 0.1 * jax.random.normal(kg, (C8, C), dtype=jnp.float32)
    wh = 0.1 * jax.random.normal(kh, (C, C), dtype=jnp.float32)
    # PyTorch initializes gamma = 0 (output == x); use a nonzero value so the
    # attention path is actually exercised.
    gamma = 0.5

    out = self_attention(x, wf, wg, wh, gamma)
    out = jax.block_until_ready(out)

    ref = ref_self_attention(x, wf, wg, wh, gamma)
    assert out.shape == (B, C, W, H)
    max_err = float(jnp.max(jnp.abs(out - ref)))
    # bf16 MXU operands (f32 softmax / accumulator / residual) => relaxed
    # tolerance versus the all-f32 reference.
    assert jnp.allclose(out, ref, atol=2e-2, rtol=2e-2), max_err

    print("KERNEL_OK")
</pallas_src>

<mosaic_0001>
module attributes {stable_mosaic.version = 11 : i64} {
  func.func @kernel(%arg0: i32, %arg1: i32, %arg2: memref<1xf32, #tpu.memory_space<smem>>, %arg3: memref<1x32x512xf32, #tpu.memory_space<vmem>>, %arg4: memref<64x32xbf16, #tpu.memory_space<vmem>>, %arg5: memref<1x32x512xf32, #tpu.memory_space<vmem>>, %arg6: memref<64x512xbf16, #tpu.memory_space<vmem>>, %arg7: memref<32x512xf32, #tpu.memory_space<vmem>>) attributes {dimension_semantics = [#tpu.dimension_semantics<parallel>, #tpu.dimension_semantics<arbitrary>], iteration_bounds = array<i64: 2, 2>, scalar_prefetch = 0 : i64, scratch_operands = 2 : i64, tpu.core_type = #tpu.core_type<tc>, window_params = [{transform_indices = @transform_0, window_bounds = array<i64: 1>}, {transform_indices = @transform_1, window_bounds = array<i64: 1, 32, 512>}, {pipeline_mode = #tpu.pipeline_mode<synchronous>, transform_indices = @transform_2, window_bounds = array<i64: 64, 32>}, {transform_indices = @transform_3, window_bounds = array<i64: 1, 32, 512>}]} {
    %c0_i32 = arith.constant 0 : i32
    %0 = arith.cmpi eq, %arg1, %c0_i32 : i32
    %1 = arith.extui %0 : i1 to i32
    %c0_i32_0 = arith.constant 0 : i32
    %2 = arith.cmpi ne, %1, %c0_i32_0 : i32
    scf.if %2 {
      %c0_13 = arith.constant 0 : index
      %c0_14 = arith.constant 0 : index
      %43 = vector.load %arg4[%c0_13, %c0_14] : memref<64x32xbf16, #tpu.memory_space<vmem>>, vector<64x32xbf16>
      %c0_i32_15 = arith.constant 0 : i32
      %c2_i32 = arith.constant 2 : i32
      %44 = arith.addi %c0_i32_15, %c2_i32 : i32
      %c1_i32_16 = arith.constant 1 : i32
      scf.for %arg8 = %c0_i32_15 to %44 step %c1_i32_16  : i32 {
        %c256_i32_21 = arith.constant 256 : i32
        %47 = arith.muli %arg8, %c256_i32_21 : i32
        %48 = tpu.assume_multiple %47, 256 : i32
        %c0_22 = arith.constant 0 : index
        %c0_23 = arith.constant 0 : index
        %49 = arith.index_cast %48 : i32 to index
        %50 = vector.load %arg3[%c0_22, %c0_23, %49] : memref<1x32x512xf32, #tpu.memory_space<vmem>>, vector<1x32x256xf32>
        %51 = vector.shape_cast %50 : vector<1x32x256xf32> to vector<32x256xf32>
        %52 = arith.truncf %51 : vector<32x256xf32> to vector<32x256xbf16>
        %cst_24 = arith.constant dense<0.000000e+00> : vector<64x256xf32>
        %53 = tpu.matmul %43, %52, %cst_24 {dimension_numbers = #tpu.dot_dimension_numbers<[1], [0], [0], [1], [0, 0, 1, 1], [], []>} : vector<64x32xbf16>, vector<32x256xbf16>, vector<64x256xf32> -> vector<64x256xf32>
        %54 = arith.truncf %53 : vector<64x256xf32> to vector<64x256xbf16>
        %c0_25 = arith.constant 0 : index
        %55 = arith.index_cast %48 : i32 to index
        %56 = vector.load %arg6[%c0_25, %55] : memref<64x512xbf16, #tpu.memory_space<vmem>>, vector<64x256xbf16>
        tpu.vector_store %arg6[%c0_25, %55], %54 {strides = array<i32>} : memref<64x512xbf16, #tpu.memory_space<vmem>>, vector<64x256xbf16>,
      }
      %c2_i32_17 = arith.constant 2 : i32
      %cst_18 = arith.constant 0.000000e+00 : f32
      %45 = vector.broadcast %cst_18 : f32 to vector<32x512xf32>
      %c0_19 = arith.constant 0 : index
      %c0_20 = arith.constant 0 : index
      %46 = vector.load %arg7[%c0_19, %c0_20] : memref<32x512xf32, #tpu.memory_space<vmem>>, vector<32x512xf32>
      tpu.vector_store %arg7[%c0_19, %c0_20], %45 {strides = array<i32>} : memref<32x512xf32, #tpu.memory_space<vmem>>, vector<32x512xf32>,
    } else {
    }
    %c256_i32 = arith.constant 256 : i32
    %3 = arith.muli %arg1, %c256_i32 : i32
    %4 = tpu.assume_multiple %3, 256 : i32
    %c0 = arith.constant 0 : index
    %5 = arith.index_cast %4 : i32 to index
    %6 = vector.load %arg6[%c0, %5] : memref<64x512xbf16, #tpu.memory_space<vmem>>, vector<16x256xbf16>
    %c16 = arith.constant 16 : index
    %c0_1 = arith.constant 0 : index
    %7 = vector.load %arg6[%c16, %c0_1] : memref<64x512xbf16, #tpu.memory_space<vmem>>, vector<16x512xbf16>
    %c32 = arith.constant 32 : index
    %8 = arith.index_cast %4 : i32 to index
    %9 = vector.load %arg6[%c32, %8] : memref<64x512xbf16, #tpu.memory_space<vmem>>, vector<32x256xbf16>
    %cst = arith.constant dense<0.000000e+00> : vector<256x512xf32>
    %10 = tpu.matmul %6, %7, %cst {dimension_numbers = #tpu.dot_dimension_numbers<[0], [0], [1], [1], [0, 1, 1, 1], [], []>} : vector<16x256xbf16>, vector<16x512xbf16>, vector<256x512xf32> -> vector<256x512xf32>
    %cst_2 = arith.constant dense<0xFF800000> : vector<256xf32>
    %11 = vector.multi_reduction <maximumf>, %10, %cst_2 [1] : vector<256x512xf32> to vector<256xf32>
    %12 = vector.shape_cast %11 : vector<256xf32> to vector<256x1xf32>
    %13 = vector.broadcast %12 : vector<256x1xf32> to vector<256x512xf32>
    %14 = arith.subf %10, %13 : vector<256x512xf32>
    %15 = math.exp %14 : vector<256x512xf32>
    %16 = arith.truncf %15 : vector<256x512xf32> to vector<256x512xbf16>
    %17 = arith.extf %16 : vector<256x512xbf16> to vector<256x512xf32>
    %cst_3 = arith.constant dense<0.000000e+00> : vector<256xf32>
    %18 = vector.multi_reduction <add>, %17, %cst_3 [1] : vector<256x512xf32> to vector<256xf32>
    %19 = vector.shape_cast %18 : vector<256xf32> to vector<256x1xf32>
    %cst_4 = arith.constant 0.000000e+00 : f32
    %20 = vector.broadcast %cst_4 : f32 to vector<256x1xf32>
    %21 = arith.subf %20, %12 : vector<256x1xf32>
    %22 = math.exp %21 : vector<256x1xf32>
    %23 = arith.truncf %22 : vector<256x1xf32> to vector<256x1xbf16>
    %24 = arith.extf %23 : vector<256x1xbf16> to vector<256x1xf32>
    %cst_5 = arith.constant 1.120000e+02 : f32
    %25 = vector.broadcast %cst_5 : f32 to vector<256x1xf32>
    %26 = arith.mulf %25, %24 : vector<256x1xf32>
    %27 = arith.subf %19, %26 : vector<256x1xf32>
    %cst_6 = arith.constant 1.000000e-30 : f32
    %28 = vector.broadcast %cst_6 : f32 to vector<256x1xf32>
    %29 = arith.maximumf %27, %28 : vector<256x1xf32>
    %30 = tpu.reciprocal %29 : vector<256x1xf32> -> vector<256x1xf32>
    %31 = arith.extf %9 : vector<32x256xbf16> to vector<32x256xf32>
    %32 = tpu.transpose %30, [1, 0] : vector<256x1xf32> -> vector<1x256xf32>
    %33 = vector.broadcast %32 : vector<1x256xf32> to vector<32x256xf32>
    %34 = arith.mulf %31, %33 : vector<32x256xf32>
    %35 = arith.truncf %34 : vector<32x256xf32> to vector<32x256xbf16>
    %c0_7 = arith.constant 0 : index
    %c0_8 = arith.constant 0 : index
    %36 = vector.load %arg7[%c0_7, %c0_8] : memref<32x512xf32, #tpu.memory_space<vmem>>, vector<32x512xf32>
    %cst_9 = arith.constant dense<0.000000e+00> : vector<32x512xf32>
    %37 = tpu.matmul %35, %16, %cst_9 {dimension_numbers = #tpu.dot_dimension_numbers<[1], [0], [0], [1], [0, 0, 1, 1], [], []>} : vector<32x256xbf16>, vector<256x512xbf16>, vector<32x512xf32> -> vector<32x512xf32>
    %38 = arith.addf %36, %37 : vector<32x512xf32>
    %c0_10 = arith.constant 0 : index
    %c0_11 = arith.constant 0 : index
    %39 = vector.load %arg7[%c0_10, %c0_11] : memref<32x512xf32, #tpu.memory_space<vmem>>, vector<32x512xf32>
    tpu.vector_store %arg7[%c0_10, %c0_11], %38 {strides = array<i32>} : memref<32x512xf32, #tpu.memory_space<vmem>>, vector<32x512xf32>,
    %c1_i32 = arith.constant 1 : i32
    %40 = arith.cmpi eq, %arg1, %c1_i32 : i32
    %41 = arith.extui %40 : i1 to i32
    %c0_i32_12 = arith.constant 0 : i32
    %42 = arith.cmpi ne, %41, %c0_i32_12 : i32
    scf.if %42 {
      %c0_13 = arith.constant 0 : index
      %43 = memref.load %arg2[%c0_13] : memref<1xf32, #tpu.memory_space<smem>>
      %c0_14 = arith.constant 0 : index
      %c0_15 = arith.constant 0 : index
      %44 = vector.load %arg7[%c0_14, %c0_15] : memref<32x512xf32, #tpu.memory_space<vmem>>, vector<32x512xf32>
      %45 = vector.broadcast %43 : f32 to vector<32x512xf32>
      %46 = arith.mulf %45, %44 : vector<32x512xf32>
      %c0_16 = arith.constant 0 : index
      %c0_17 = arith.constant 0 : index
      %c0_18 = arith.constant 0 : index
      %47 = vector.load %arg3[%c0_16, %c0_17, %c0_18] : memref<1x32x512xf32, #tpu.memory_space<vmem>>, vector<1x32x512xf32>
      %48 = vector.shape_cast %47 : vector<1x32x512xf32> to vector<32x512xf32>
      %49 = arith.addf %46, %48 : vector<32x512xf32>
      %c0_19 = arith.constant 0 : index
      %c0_20 = arith.constant 0 : index
      %c0_21 = arith.constant 0 : index
      %50 = vector.load %arg5[%c0_19, %c0_20, %c0_21] : memref<1x32x512xf32, #tpu.memory_space<vmem>>, vector<1x32x512xf32>
      %51 = vector.shape_cast %50 : vector<1x32x512xf32> to vector<32x512xf32>
      %52 = vector.shape_cast %49 : vector<32x512xf32> to vector<1x32x512xf32>
      tpu.vector_store %arg5[%c0_19, %c0_20, %c0_21], %52 {strides = array<i32>} : memref<1x32x512xf32, #tpu.memory_space<vmem>>, vector<1x32x512xf32>,
    } else {
    }
    return
  }
  func.func @transform_0(%arg0: i32, %arg1: i32) -> i32 {
    %c0_i32 = arith.constant 0 : i32
    %c0_i32_0 = arith.constant 0 : i32
    return %c0_i32 : i32
  }
  func.func @transform_1(%arg0: i32, %arg1: i32) -> (i32, i32, i32) {
    %c0_i32 = arith.constant 0 : i32
    %c0_i32_0 = arith.constant 0 : i32
    %c0_i32_1 = arith.constant 0 : i32
    return %arg0, %c0_i32, %c0_i32_0 : i32, i32, i32
  }
  func.func @transform_2(%arg0: i32, %arg1: i32) -> (i32, i32) {
    %c0_i32 = arith.constant 0 : i32
    %c0_i32_0 = arith.constant 0 : i32
    %c0_i32_1 = arith.constant 0 : i32
    return %c0_i32, %c0_i32_0 : i32, i32
  }
  func.func @transform_3(%arg0: i32, %arg1: i32) -> (i32, i32, i32) {
    %c0_i32 = arith.constant 0 : i32
    %c0_i32_0 = arith.constant 0 : i32
    %c0_i32_1 = arith.constant 0 : i32
    return %arg0, %c0_i32, %c0_i32_0 : i32, i32, i32
  }
}

</mosaic_0001>

<bundles_post_ra>
// kernel: tpu_custom_call.1
= control target key start
LH: loop header
LB: loop body
LE: loop exit
PB: predicated region body
PF: predicated region fallthrough
CT: control target
= control target key end

     0   :  { %s4963_s0 = inlined_call_operand.<no memory space> [shape: f32[1], index: 0, kind: input, shape index: {}]   ;;  %s4964_s1 = inlined_call_operand.hbm [shape: f32[2,32,512], index: 1, kind: input, shape index: {}]   ;;  %s4965_s2 = inlined_call_operand.vmem [shape: bf16[64,32], index: 2, kind: input, shape index: {}]   ;;  %s4966_s3 = inlined_call_operand.hbm [shape: f32[2,32,512], index: 3, kind: output, shape index: {}]  }
   0x1   :  { %8 = sst [smem:[#allocation4]] %s4963_s0 }
   0x2   :  { %9 = vsyncpa [#allocation6], 0 }
   0x3   :  { %11 = vsyncpa [#allocation6 + $0x1], 0 }
   0x4   :  { %12 = vsyncpa [#allocation7], 0 }
   0x5   :  { %14 = vsyncpa [#allocation7 + $0x1], 0  ;;  %s3281_s14 = smov 0   ;;  %s3283_s15 = smov 0  }
   0x6   :  { %s3285_s16 = smov 0   ;;  %s3287_s17 = smov 0  }
   0x7   :  { %s3289_s18 = smov 0   ;;  %s3291_s19 = smov 0  }
   0x8   :  { %s3293_s20 = smov 0   ;;  %s3295_s21 = smov 0  }
   0x9 LB: > { %s2539_s0 = sadd.s32 4294967295, %s3243_s21   ;;  %s2540_s22 = sadd.s32 4294967294, %s3243_s21   ;;  %s3243_s21 = sphi %s3295_s21, %s20_s21   ;;  %s3239_s20 = sphi %s3293_s20, %s5403_s20   ;;  %s3235_s19 = sphi %s3291_s19, %s5402_s19   ;;  %s3231_s18 = sphi %s3289_s18, %s5401_s18   ;;  %s3227_s17 = sphi %s3287_s17, %s5400_s17   ;;  %s3223_s16 = sphi %s3285_s16, %s5399_s16   ;;  %s3219_s15 = sphi %s3283_s15, %s5398_s15   ;;  %s3215_s14 = sphi %s3281_s14, %s5397_s14  }
   0xa   : > { %s29_s23 = sadd.s32 1, %s3235_s19  ;;  %s32_s24 = sadd.s32 1, %s3239_s20 }
   0xb   : > { %p30_p0 = scmp.ge.s32.totalorder %s29_s23, 2  ;;  %s60_s25 = sadd.s32 1, %s3223_s16 }
   0xc   : > { %p67_p1 = scmp.ne.s32.totalorder %s3223_s16, %s3219_s15  ;;  %p68_p2 = scmp.eq.s32.totalorder %s3243_s21, 0 }
   0xd   : > { %s5405_s23 = smov (%p30_p0, %s29_s23), 0  ;;  %s5407_s24 = smov (!%p30_p0, %s32_s24), %s3239_s20 }
   0xe   : > { %p3332_p3 = por %p68_p2, %p67_p1  ;;  %p73_p4 = scmp.ne.s32.totalorder %s3219_s15, %s3215_s14 }
   0xf   : > { %p34_p5 = scmp.ge.s32.totalorder %s5407_s24, 2  ;;  %p74_p6 = scmp.eq.s32.totalorder %s2539_s0, 0 }
  0x10   : > { %p118_p7 = scmp.eq.s32.totalorder %s2539_s0, 3  ;;  %p124_p8 = scmp.eq.s32.totalorder %s2540_s22, 3 }
  0x11   : > { %s5409_s24 = smov (%p34_p5, %s5407_s24), 0  ;;  %p3340_p9 = por %p74_p6, %p73_p4 }
  0x12   : > { %p3344_p10 = por %p118_p7, %p67_p1  ;;  %s57_s29 = ssub.s32 %s3239_s20, %s5409_s24 }
  0x13   : > { %p3350_p11 = por %p124_p8, %p73_p4  ;;  %p58_p12 = scmp.eq.s32.totalorder %s57_s29, 0 }
  0x14   : > { %p2641_p13 = scmp.lt.s32.totalorder %s3243_s21, 4  ;;  %s150_s4 = sand.u32 1, %s3223_s16  }
  0x15   : > { %s3357_s5 = scalar_select %p58_p12, %s3223_s16, %s60_s25  }
  0x16   : > { %s2543_s6 = sshll.u32 %s150_s4, 7  ;;  %s2615_s7 = sshll.u32 %s3239_s20, 11 }
  0x17   : > { %s160_s10 = scalar_lea.hbm %s4964_s1, %s2615_s7  ;;  %s154_s11 = scalar_lea.vmem [#allocation5], %s2543_s6 }
  0x18   : > { %s161_s12 = sshll.u32 %s154_s11, 4  ;;  %p3365_p0 = pnand %p2641_p13, %p3332_p3  ;;  %s162_s12 = int_to_ptr.vmem [resolvable:$true] %s161_s12 }
  0x19   : > { %p2546_p1 = scmp.ge.s32.totalorder %s3243_s21, 1  ;;  %s151_s0 = scalar_lea.sflag [#allocation6], %s150_s4 }
  0x1a   : > { %p3117_p2 = pneg %p3365_p0  ;;  %s3128_s22 = scalar_lea.vmem %s162_s12, 2048 }
  0x1b   : > { %p3129_p4 = scmp.ne.s32.totalorder %s162_s12, %s3128_s22  ;;  %s3249_s25 = smov [#allocation5]  }
  0x1c   : > { %s3133_s29 = sshll.u32 %s3249_s25, 4  ;;  %s3134_s29 = int_to_ptr.vmem [resolvable:$false] %s3133_s29 }
  0x1d   : > { %p3131_p5 = pnand %p3129_p4, %p3117_p2  ;;  %s3135_s6 = scalar_lea.vmem %s3134_s29, 4096 }
  0x1e   : > { %p3136_p7 = scmp.lt.s32.totalorder %s162_s12, %s3134_s29  ;;  %p3137_p8 = scmp.lt.s32.totalorder %s3135_s6, %s3128_s22 }
  0x1f   : > { %p3132_p6 = pneg %p3131_p5 }
  0x20   : > { %p3138_p12 = por %p3137_p8, %p3136_p7 }
  0x22   : > { %p3139_p3 = pnand %p3138_p12, %p3132_p6 }
  0x24   : > { %3142 = shalt.err (!%p3139_p3)
}
  0x25   : > { %s3250_s26 = smov 512   ;;  %s3251_s4 = smov 32  }
  0x26   : > { %2636 = dma.hbm_to_vmem [thread:$0]  (!%p3365_p0), %s160_s10, 2048, %s162_s12, %s151_s0, %s3250_s26, %s3250_s26, %s3251_s4  }
  0x27   : > { %p169_p13 = scmp.lt.s32.totalorder %s3243_s21, 5 }
  0x29   : > { %p170_p2 = pnand %p2546_p1, %p169_p13 }
  0x2b   : > { %173 = sbr.rel (%p170_p2) target bundleno = 1420 (0x58c), region = 32 }
  0x30   : > { %s3378_s7 = sand.u32 1, %s3219_s15  }
  0x31   : > { %s2547_s8 = sshll.u32 %s3378_s7, 7  ;;  %s176_s9 = scalar_lea.sflag [#allocation6], %s3378_s7 }
  0x32   : > { %s3382_s11 = scalar_lea.vmem [#allocation5], %s2547_s8 }
  0x33   : > { %3206 = dma.done.wait (%p3340_p9), %s176_s9, 2048  }
  0x34   : > { %3208 = vsyncadd (%p3340_p9), %s176_s9, 4294965248  ;;  %s3388_s10 = scalar_lea.vmem [#allocation8], %s2547_s8  ;;  %p2549_p0 = scmp.ne.s32.totalorder %s3227_s17, 0 }
  0x35   : > { %s3431_s25 = smov (!%p2549_p0), 0  }
  0x36   : > { %206 = sbr.rel (%p2549_p0) target bundleno = 288 (0x120), region = 40 }
  0x3b   : > { %v3394_v0 = vld [vmem:[%s4965_s2] sm:$0xf]  ;;  %v3399_v1 = vld [vmem:[%s4965_s2 + $0x4] sm:$0xf]  ;;  %v3404_v2 = vld [vmem:[%s4965_s2 + $0x8] sm:$0xf] }
  0x3c   : > { %v3409_v3 = vld [vmem:[%s4965_s2 + $0xc] sm:$0xf]  ;;  %v3414_v4 = vld [vmem:[%s4965_s2 + $0x10] sm:$0xf]  ;;  %v3419_v5 = vld [vmem:[%s4965_s2 + $0x14] sm:$0xf] }
  0x3d   : > { %v3424_v6 = vld [vmem:[%s4965_s2 + $0x18] sm:$0xf]  ;;  %v3429_v7 = vld [vmem:[%s4965_s2 + $0x1c] sm:$0xf] }
  0x3e LB: >> { %v3252_v8 = vmov 0   ;;  %s2550_s29 = sshll.u32 %s3247_s25, 8  ;;  %v2552_v21 = vcombine.low %v3394_v0, %v3399_v1  ;;  %v2554_v22 = vcombine.low %v3414_v4, %v3419_v5  ;;  %vm258_vm0 = vcmask 261120   ;;  %s220_s25 = sadd.s32 1, %s3247_s25   ;;  %s3247_s25 = sphi %s3431_s25, %s220_s25  }
  0x3f   : >> { %303 = vmatprep.mubr.bf16.mxu0 %v3252_v8  ;;  %323 = vmatprep.mubr.bf16.mxu1 %v3252_v8  ;;  %s3437_s27 = sshra.s32 %s2550_s29, 7  ;;  %v2553_v23 = vcombine.low %v3404_v2, %v3409_v3  ;;  %v2555_v24 = vcombine.low %v3424_v6, %v3429_v7  ;;  %p217_p9 = scmp.ge.s32.totalorder %s220_s25, 2  }
  0x40   : >> { %s2551_s6 = sshll.u32 %s3437_s27, 3  ;;  %s2568_s4 = sshll.u32 %s3437_s27, 2  ;;  %v3253_v49 = vmov (%p217_p9), 0.0  }
  0x41   : >> { %s225_s26 = scalar_lea.vmem %s3382_s11, %s2551_s6 [#allocation5]  ;;  %s393_s8 = scalar_lea.vmem [#allocation2], %s2568_s4  ;;  %402 = vst [vmem:[#allocation3 + $0x30] sm:$0xff] (%p217_p9), %v3253_v49  ;;  %403 = vst [vmem:[#allocation3] sm:$0xff] (%p217_p9), %v3253_v49 }
  0x42   : >> { %v231_v9 = vld [vmem:[%s225_s26 + $0x48] sm:$0xff]  ;;  %v230_v11 = vld [vmem:[%s225_s26 + $0x40] sm:$0xff]  ;;  %404 = vst [vmem:[#allocation3 + $0x58] sm:$0xff] (%p217_p9), %v3253_v49  ;;  %405 = vst [vmem:[#allocation3 + $0x18] sm:$0xff] (%p217_p9), %v3253_v49 }
  0x43   : >> { %v233_v10 = vld [vmem:[%s225_s26 + $0x68] sm:$0xff]  ;;  %v232_v13 = vld [vmem:[%s225_s26 + $0x60] sm:$0xff]  ;;  %406 = vst [vmem:[#allocation3 + $0x50] sm:$0xff] (%p217_p9), %v3253_v49  ;;  %407 = vst [vmem:[#allocation3 + $0x68] sm:$0xff] (%p217_p9), %v3253_v49 }
  0x44   : >> { %v237_v12 = vpack.c.bf16 %v233_v10, %v231_v9  ;;  %v227_v14 = vld [vmem:[%s225_s26 + $0x8] sm:$0xff]  ;;  %v236_v16 = vpack.c.bf16 %v232_v13, %v230_v11  ;;  %v226_v18 = vld [vmem:[%s225_s26] sm:$0xff]  ;;  %408 = vst [vmem:[#allocation3 + $0x8] sm:$0xff] (%p217_p9), %v3253_v49  ;;  %409 = vst [vmem:[#allocation3 + $0x48] sm:$0xff] (%p217_p9), %v3253_v49 }
  0x45   : >> { %v229_v15 = vld [vmem:[%s225_s26 + $0x28] sm:$0xff]  ;;  %v228_v19 = vld [vmem:[%s225_s26 + $0x20] sm:$0xff]  ;;  %410 = vst [vmem:[#allocation3 + $0x40] sm:$0xff] (%p217_p9), %v3253_v49  ;;  %411 = vst [vmem:[#allocation3 + $0x20] sm:$0xff] (%p217_p9), %v3253_v49 }
  0x46   : >> { %v235_v17 = vpack.c.bf16 %v229_v15, %v227_v14  ;;  %283 = vmatprep.subr.bf16.mxu0 %v237_v12  ;;  %2625 = vmatprep.subr.bf16.mxu1 %v237_v12  ;;  %v234_v20 = vpack.c.bf16 %v228_v19, %v226_v18  ;;  %412 = vst [vmem:[#allocation3 + $0x10] sm:$0xff] (%p217_p9), %v3253_v49  ;;  %413 = vst [vmem:[#allocation3 + $0x38] sm:$0xff] (%p217_p9), %v3253_v49 }
  0x47   : >> { %284 = vmatpush1.bf16.msra.mxu0 %v236_v16  ;;  %2627 = vmatpush1.bf16.msra.mxu1 %v236_v16  ;;  %414 = vst [vmem:[#allocation3 + $0x60] sm:$0xff] (%p217_p9), %v3253_v49  ;;  %415 = vst [vmem:[#allocation3 + $0x70] sm:$0xff] (%p217_p9), %v3253_v49 }
  0x48   : >> { %285 = vmatprep.subr.bf16.mxu0 %v235_v17  ;;  %2626 = vmatprep.subr.bf16.mxu1 %v235_v17  ;;  %416 = vst [vmem:[#allocation3 + $0x78] sm:$0xff] (%p217_p9), %v3253_v49  ;;  %417 = vst [vmem:[#allocation3 + $0x28] sm:$0xff] (%p217_p9), %v3253_v49 }
  0x4b   : >> { %286 = vmatpush1.bf16.msra.mxu0 %v234_v20  ;;  %2628 = vmatpush1.bf16.msra.mxu1 %v234_v20 }
  0x4e   : >> { %2556 = vmatmul.mubr.msk.bf16.vlgmr.msra.gmra.mxu0 %vm258_vm0, %v2552_v21  ;;  %2558 = vmatmul.mubr.msk.bf16.vlgmr.msra.gmra.mxu1 %vm258_vm0, %v2554_v22 }
  0x4f   : >> { %313 = vmatprep.mubr.bf16.mxu0 %v3252_v8  ;;  %333 = vmatprep.mubr.bf16.mxu1 %v3252_v8 }
  0x56   : >> { %2557 = vmatmul.mubr.msk.bf16.gmra.mxu0 %vm258_vm0, %v2553_v23  ;;  %2559 = vmatmul.mubr.msk.bf16.gmra.mxu1 %vm258_vm0, %v2555_v24 }
 0x10e   : >> { %v305_v25 = vpop.f32.mrf.mxu0  ;;  %v325_v26 = vpop.f32.mrf.mxu1 }
 0x110   : >> { %v307_v27 = vpop.f32.mrf.mxu0  ;;  %v327_v28 = vpop.f32.mrf.mxu1 }
 0x111   : >> { %v2616_v29 = vpack.c.bf16 %v307_v27, %v305_v25  ;;  %v2620_v30 = vpack.c.bf16 %v327_v28, %v325_v26 }
 0x112   : >> { %v309_v31 = vpop.f32.mrf.mxu0  ;;  %v329_v32 = vpop.f32.mrf.mxu1 }
 0x113   : >> { %394 = vst [vmem:[%s393_s8] sm:$0xff] %v2616_v29  ;;  %398 = vst [vmem:[%s393_s8 + $0x40] sm:$0xff] %v2620_v30 }
 0x114   : >> { %v311_v33 = vpop.f32.mrf.mxu0  ;;  %v331_v34 = vpop.f32.mrf.mxu1 }
 0x115   : >> { %v2617_v35 = vpack.c.bf16 %v311_v33, %v309_v31  ;;  %v2621_v36 = vpack.c.bf16 %v331_v34, %v329_v32 }
 0x116   : >> { %v315_v37 = vpop.f32.mrf.mxu0  ;;  %v335_v38 = vpop.f32.mrf.mxu1 }
 0x117   : >> { %395 = vst [vmem:[%s393_s8 + $0x10] sm:$0xff] %v2617_v35  ;;  %399 = vst [vmem:[%s393_s8 + $0x50] sm:$0xff] %v2621_v36 }
 0x118   : >> { %v317_v39 = vpop.f32.mrf.mxu0  ;;  %v337_v40 = vpop.f32.mrf.mxu1 }
 0x119   : >> { %v2618_v41 = vpack.c.bf16 %v317_v39, %v315_v37  ;;  %v2622_v42 = vpack.c.bf16 %v337_v40, %v335_v38 }
 0x11a   : >> { %v319_v43 = vpop.f32.mrf.mxu0  ;;  %v339_v44 = vpop.f32.mrf.mxu1 }
 0x11b   : >> { %396 = vst [vmem:[%s393_s8 + $0x20] sm:$0xff] %v2618_v41  ;;  %400 = vst [vmem:[%s393_s8 + $0x60] sm:$0xff] %v2622_v42  ;;  %219 = sbr.rel (!%p217_p9) target bundleno = 62 (0x3e), region = 95 }
 0x11c   : >> { %v321_v45 = vpop.f32.mrf.mxu0  ;;  %v341_v46 = vpop.f32.mrf.mxu1 }
 0x11d   : >> { %v2619_v47 = vpack.c.bf16 %v321_v45, %v319_v43  ;;  %v2623_v48 = vpack.c.bf16 %v341_v46, %v339_v44 }
 0x11f   : >> { %397 = vst [vmem:[%s393_s8 + $0x30] sm:$0xff] %v2619_v47  ;;  %401 = vst [vmem:[%s393_s8 + $0x70] sm:$0xff] %v2623_v48 }
 0x120 PF: > { %s2569_s9 = sshll.u32 %s3227_s17, 8  ;;  %v3254_v52 = vmov 0   ;;  %vm495_vm1 = vcmask 130048   ;;  %p2609_p1 = scmp.ne.s32.totalorder %s3227_s17, 1 }
 0x121   : > { %s419_s12 = sshra.s32 %s2569_s9, 7  ;;  %576 = vmatprep.mubr.bf16.mxu0 %v3254_v52  ;;  %769 = vmatprep.mubr.bf16.mxu1 %v3254_v52  ;;  %s2348_s22 = sld [smem:[#allocation4]] (!%p2609_p1) }
 0x122   : > { %s2570_s13 = sshll.u32 %s419_s12, 2 }
 0x123   : > { %s3456_s0 = scalar_lea.vmem [#allocation2], %s2570_s13 }
 0x126   : > { %v2725_v50 = vld [vmem:[#allocation2 + $0x24] ss:$16 sps:$4 sm:$0xff]   ;;  %v2727_v51 = vld [vmem:[#allocation2 + $0x2c] ss:$16 sps:$4 sm:$0xff]   ;;  %v2729_v53 = vld [vmem:[#allocation2 + $0x20] ss:$16 sps:$4 sm:$0xff]  }
 0x127   : > { %558 = vmatprep.subr.bf16.mxu0 %v2725_v50  ;;  %v2730_v54 = vld [vmem:[#allocation2 + $0x28] ss:$16 sps:$4 sm:$0xff]   ;;  %751 = vmatprep.subr.bf16.mxu1 %v2727_v51  ;;  %v2722_v55 = vld [vmem:[%s3456_s0] ss:$16 sps:$4 sm:$0xff]   ;;  %v2724_v56 = vld [vmem:[%s3456_s0 + $0x4] ss:$16 sps:$4 sm:$0xff]  }
 0x128   : > { %559 = vmatpush1.bf16.msra.mxu0 %v2729_v53  ;;  %752 = vmatpush1.bf16.msra.mxu1 %v2730_v54 }
 0x129   : > { %443 = vxpose.xlu0.c.b16.start.end [1/1] (short) %v2722_v55, 128 }
 0x146   : > { %459 = vxpose.xlu0.c.b16.start.end [1/1] (short) %v2724_v56, 128 }
 0x18b   : > { %v451_v57 = vpop.trf.xlu0 }
 0x18c   : > { %2577 = vmatmul.mubr.msk.bf16.vlgmr.msra.gmra.mxu0 %vm495_vm1, %v451_v57  ;;  %2593 = vmatmul.mubr.msk.bf16.vlgmr.msra.gmra.mxu1 %vm495_vm1, %v451_v57 }
 0x18d   : > { %586 = vmatprep.mubr.bf16.mxu0 %v3254_v52  ;;  %779 = vmatprep.mubr.bf16.mxu1 %v3254_v52 }
 0x18f   : > { %v452_v58 = vpop.trf.xlu0 }
 0x193   : > { %v453_v59 = vpop.trf.xlu0 }
 0x194   : > { %2578 = vmatmul.mubr.msk.bf16.gmra.mxu0 %vm495_vm1, %v452_v58  ;;  %2594 = vmatmul.mubr.msk.bf16.gmra.mxu1 %vm495_vm1, %v452_v58 }
 0x195   : > { %596 = vmatprep.mubr.bf16.mxu0 %v3254_v52  ;;  %789 = vmatprep.mubr.bf16.mxu1 %v3254_v52 }
 0x197   : > { %v454_v60 = vpop.trf.xlu0 }
 0x19b   : > { %v455_v61 = vpop.trf.xlu0 }
 0x19c   : > { %2579 = vmatmul.mubr.msk.bf16.gmra.mxu0 %vm495_vm1, %v453_v59  ;;  %2595 = vmatmul.mubr.msk.bf16.gmra.mxu1 %vm495_vm1, %v453_v59 }
 0x19d   : > { %606 = vmatprep.mubr.bf16.mxu0 %v3254_v52  ;;  %799 = vmatprep.mubr.bf16.mxu1 %v3254_v52 }
 0x19f   : > { %v456_v62 = vpop.trf.xlu0 }
 0x1a3   : > { %v457_v63 = vpop.trf.xlu0 }
 0x1a4   : > { %2580 = vmatmul.mubr.msk.bf16.gmra.mxu0 %vm495_vm1, %v454_v60  ;;  %2596 = vmatmul.mubr.msk.bf16.gmra.mxu1 %vm495_vm1, %v454_v60 }
 0x1a5   : > { %616 = vmatprep.mubr.bf16.mxu0 %v3254_v52  ;;  %809 = vmatprep.mubr.bf16.mxu1 %v3254_v52 }
 0x1a7   : > { %v458_v0 = vpop.trf.xlu0 }
 0x1ab   : > { %v467_v1 = vpop.trf.xlu0 }
 0x1ac   : > { %2581 = vmatmul.mubr.msk.bf16.gmra.mxu0 %vm495_vm1, %v455_v61  ;;  %2597 = vmatmul.mubr.msk.bf16.gmra.mxu1 %vm495_vm1, %v455_v61 }
 0x1ad   : > { %626 = vmatprep.mubr.bf16.mxu0 %v3254_v52  ;;  %819 = vmatprep.mubr.bf16.mxu1 %v3254_v52 }
 0x1af   : > { %v468_v2 = vpop.trf.xlu0 }
 0x1b3   : > { %v469_v3 = vpop.trf.xlu0 }
 0x1b4   : > { %2582 = vmatmul.mubr.msk.bf16.gmra.mxu0 %vm495_vm1, %v456_v62  ;;  %2598 = vmatmul.mubr.msk.bf16.gmra.mxu1 %vm495_vm1, %v456_v62 }
 0x1b5   : > { %636 = vmatprep.mubr.bf16.mxu0 %v3254_v52  ;;  %829 = vmatprep.mubr.bf16.mxu1 %v3254_v52 }
 0x1b7   : > { %v470_v4 = vpop.trf.xlu0 }
 0x1bb   : > { %v471_v5 = vpop.trf.xlu0 }
 0x1bc   : > { %2583 = vmatmul.mubr.msk.bf16.gmra.mxu0 %vm495_vm1, %v457_v63  ;;  %2599 = vmatmul.mubr.msk.bf16.gmra.mxu1 %vm495_vm1, %v457_v63 }
 0x1bd   : > { %646 = vmatprep.mubr.bf16.mxu0 %v3254_v52  ;;  %839 = vmatprep.mubr.bf16.mxu1 %v3254_v52 }
 0x1bf   : > { %v472_v6 = vpop.trf.xlu0 }
 0x1c3   : > { %v473_v7 = vpop.trf.xlu0 }
 0x1c4   : > { %2584 = vmatmul.mubr.msk.bf16.gmra.mxu0 %vm495_vm1, %v458_v0  ;;  %2600 = vmatmul.mubr.msk.bf16.gmra.mxu1 %vm495_vm1, %v458_v0 }
 0x1c5   : > { %656 = vmatprep.mubr.bf16.mxu0 %v3254_v52  ;;  %849 = vmatprep.mubr.bf16.mxu1 %v3254_v52 }
 0x1c7   : > { %v474_v8 = vpop.trf.xlu0 }
 0x1cc   : > { %2585 = vmatmul.mubr.msk.bf16.gmra.mxu0 %vm495_vm1, %v467_v1  ;;  %2601 = vmatmul.mubr.msk.bf16.gmra.mxu1 %vm495_vm1, %v467_v1 }
 0x1cd   : > { %666 = vmatprep.mubr.bf16.mxu0 %v3254_v52  ;;  %859 = vmatprep.mubr.bf16.mxu1 %v3254_v52 }
 0x1d4   : > { %2586 = vmatmul.mubr.msk.bf16.gmra.mxu0 %vm495_vm1, %v468_v2  ;;  %2602 = vmatmul.mubr.msk.bf16.gmra.mxu1 %vm495_vm1, %v468_v2 }
 0x1d5   : > { %676 = vmatprep.mubr.bf16.mxu0 %v3254_v52  ;;  %869 = vmatprep.mubr.bf16.mxu1 %v3254_v52 }
 0x1dc   : > { %2587 = vmatmul.mubr.msk.bf16.gmra.mxu0 %vm495_vm1, %v469_v3  ;;  %2603 = vmatmul.mubr.msk.bf16.gmra.mxu1 %vm495_vm1, %v469_v3 }
 0x1dd   : > { %686 = vmatprep.mubr.bf16.mxu0 %v3254_v52  ;;  %879 = vmatprep.mubr.bf16.mxu1 %v3254_v52 }
 0x1e4   : > { %2588 = vmatmul.mubr.msk.bf16.gmra.mxu0 %vm495_vm1, %v470_v4  ;;  %2604 = vmatmul.mubr.msk.bf16.gmra.mxu1 %vm495_vm1, %v470_v4 }
 0x1e5   : > { %696 = vmatprep.mubr.bf16.mxu0 %v3254_v52  ;;  %889 = vmatprep.mubr.bf16.mxu1 %v3254_v52 }
 0x1ec   : > { %2589 = vmatmul.mubr.msk.bf16.gmra.mxu0 %vm495_vm1, %v471_v5  ;;  %2605 = vmatmul.mubr.msk.bf16.gmra.mxu1 %vm495_vm1, %v471_v5 }
 0x1ed   : > { %706 = vmatprep.mubr.bf16.mxu0 %v3254_v52  ;;  %899 = vmatprep.mubr.bf16.mxu1 %v3254_v52 }
 0x1f4   : > { %2590 = vmatmul.mubr.msk.bf16.gmra.mxu0 %vm495_vm1, %v472_v6  ;;  %2606 = vmatmul.mubr.msk.bf16.gmra.mxu1 %vm495_vm1, %v472_v6 }
 0x1f5   : > { %716 = vmatprep.mubr.bf16.mxu0 %v3254_v52  ;;  %909 = vmatprep.mubr.bf16.mxu1 %v3254_v52 }
 0x1fc   : > { %2591 = vmatmul.mubr.msk.bf16.gmra.mxu0 %vm495_vm1, %v473_v7  ;;  %2607 = vmatmul.mubr.msk.bf16.gmra.mxu1 %vm495_vm1, %v473_v7 }
 0x1fd   : > { %726 = vmatprep.mubr.bf16.mxu0 %v3254_v52  ;;  %919 = vmatprep.mubr.bf16.mxu1 %v3254_v52 }
 0x204   : > { %2592 = vmatmul.mubr.msk.bf16.gmra.mxu0 %vm495_vm1, %v474_v8  ;;  %2608 = vmatmul.mubr.msk.bf16.gmra.mxu1 %vm495_vm1, %v474_v8 }
 0x24c   : > { %v3522_v9 = vpop.f32.mrf.mxu0  ;;  %v3524_v10 = vpop.f32.mrf.mxu1 }
 0x24e   : > { %v3526_v11 = vpop.f32.mrf.mxu0  ;;  %v3528_v12 = vpop.f32.mrf.mxu1 }
 0x24f   : > { %v930_v13 = vmax.f32 %v3522_v9, %v3526_v11 }
 0x250   : > { %v3532_v14 = vpop.f32.mrf.mxu0  ;;  %v3534_v15 = vpop.f32.mrf.mxu1 }
 0x251   : > { %v931_v16 = vmax.f32 %v930_v13, %v3524_v10 }
 0x252   : > { %v3537_v17 = vpop.f32.mrf.mxu0  ;;  %v3539_v18 = vpop.f32.mrf.mxu1 }
 0x253   : > { %v935_v19 = vmax.f32 %v3532_v14, %v3537_v17  ;;  %v932_v20 = vmax.f32 %v931_v16, %v3528_v12 }
 0x254   : > { %v3544_v21 = vpop.f32.mrf.mxu0  ;;  %v3546_v22 = vpop.f32.mrf.mxu1 }
 0x255   : > { %933 = vmax.xlane.f32.xlu1 %v932_v20  ;;  %v936_v23 = vmax.f32 %v935_v19, %v3534_v15 }
 0x256   : > { %v3549_v24 = vpop.f32.mrf.mxu0  ;;  %v3551_v25 = vpop.f32.mrf.mxu1 }
 0x257   : > { %v940_v26 = vmax.f32 %v3544_v21, %v3549_v24  ;;  %v937_v27 = vmax.f32 %v936_v23, %v3539_v18 }
 0x258   : > { %v3556_v28 = vpop.f32.mrf.mxu0  ;;  %v3558_v29 = vpop.f32.mrf.mxu1 }
 0x259   : > { %938 = vmax.xlane.f32.xlu1 %v937_v27  ;;  %v941_v30 = vmax.f32 %v940_v26, %v3546_v22 }
 0x25a   : > { %v3561_v31 = vpop.f32.mrf.mxu0  ;;  %v3563_v32 = vpop.f32.mrf.mxu1 }
 0x25b   : > { %v945_v33 = vmax.f32 %v3556_v28, %v3561_v31  ;;  %v942_v34 = vmax.f32 %v941_v30, %v3551_v25 }
 0x25c   : > { %v3568_v35 = vpop.f32.mrf.mxu0  ;;  %v3570_v36 = vpop.f32.mrf.mxu1 }
 0x25d   : > { %943 = vmax.xlane.f32.xlu1 %v942_v34  ;;  %v946_v37 = vmax.f32 %v945_v33, %v3558_v29 }
 0x25e   : > { %v3573_v38 = vpop.f32.mrf.mxu0  ;;  %v3575_v39 = vpop.f32.mrf.mxu1 }
 0x25f   : > { %v950_v40 = vmax.f32 %v3568_v35, %v3573_v38  ;;  %v947_v41 = vmax.f32 %v946_v37, %v3563_v32 }
 0x260   : > { %v3580_v42 = vpop.f32.mrf.mxu0  ;;  %v3582_v43 = vpop.f32.mrf.mxu1 }
 0x261   : > { %948 = vmax.xlane.f32.xlu1 %v947_v41  ;;  %v951_v44 = vmax.f32 %v950_v40, %v3570_v36 }
 0x262   : > { %v3585_v45 = vpop.f32.mrf.mxu0  ;;  %v3587_v46 = vpop.f32.mrf.mxu1 }
 0x263   : > { %v955_v47 = vmax.f32 %v3580_v42, %v3585_v45  ;;  %v952_v48 = vmax.f32 %v951_v44, %v3575_v39 }
 0x264   : > { %v3592_v49 = vpop.f32.mrf.mxu0  ;;  %v3594_v50 = vpop.f32.mrf.mxu1 }
 0x265   : > { %5102 = vst [vmem:[#allocation11_spill] sm:$0xff] %v3592_v49  ;;  %5103 = vst [vmem:[#allocation12_spill] sm:$0xff] %v3594_v50  ;;  %953 = vmax.xlane.f32.xlu1 %v952_v48  ;;  %v956_v51 = vmax.f32 %v955_v47, %v3582_v43 }
 0x266   : > { %v3597_v52 = vpop.f32.mrf.mxu0  ;;  %v3599_v53 = vpop.f32.mrf.mxu1 }
 0x267   : > { %5104 = vst [vmem:[#allocation13_spill] sm:$0xff] %v3597_v52  ;;  %5105 = vst [vmem:[#allocation14_spill] sm:$0xff] %v3599_v53  ;;  %v960_v54 = vmax.f32 %v3592_v49, %v3597_v52  ;;  %v957_v55 = vmax.f32 %v956_v51, %v3587_v46 }
 0x268   : > { %v3604_v56 = vpop.f32.mrf.mxu0  ;;  %v3606_v57 = vpop.f32.mrf.mxu1 }
 0x269   : > { %5106 = vst [vmem:[#allocation15_spill] sm:$0xff] %v3604_v56  ;;  %5107 = vst [vmem:[#allocation16_spill] sm:$0xff] %v3606_v57  ;;  %958 = vmax.xlane.f32.xlu1 %v957_v55  ;;  %v961_v58 = vmax.f32 %v960_v54, %v3594_v50 }
 0x26a   : > { %v3609_v59 = vpop.f32.mrf.mxu0  ;;  %v3611_v60 = vpop.f32.mrf.mxu1 }
 0x26b   : > { %5108 = vst [vmem:[#allocation17_spill] sm:$0xff] %v3609_v59  ;;  %5109 = vst [vmem:[#allocation18_spill] sm:$0xff] %v3611_v60  ;;  %v965_v61 = vmax.f32 %v3604_v56, %v3609_v59  ;;  %v962_v62 = vmax.f32 %v961_v58, %v3599_v53 }
 0x26c   : > { %v3616_v63 = vpop.f32.mrf.mxu0  ;;  %v3618_v0 = vpop.f32.mrf.mxu1 }
 0x26d   : > { %5110 = vst [vmem:[#allocation19_spill] sm:$0xff] %v3616_v63  ;;  %5111 = vst [vmem:[#allocation20_spill] sm:$0xff] %v3618_v0  ;;  %963 = vmax.xlane.f32.xlu1 %v962_v62  ;;  %v966_v1 = vmax.f32 %v965_v61, %v3606_v57 }
 0x26e   : > { %v3621_v2 = vpop.f32.mrf.mxu0  ;;  %v3623_v3 = vpop.f32.mrf.mxu1 }
 0x26f   : > { %5112 = vst [vmem:[#allocation21_spill] sm:$0xff] %v3621_v2  ;;  %5113 = vst [vmem:[#allocation22_spill] sm:$0xff] %v3623_v3  ;;  %v970_v4 = vmax.f32 %v3616_v63, %v3621_v2  ;;  %v967_v5 = vmax.f32 %v966_v1, %v3611_v60 }
 0x270   : > { %v3628_v6 = vpop.f32.mrf.mxu0  ;;  %v3630_v7 = vpop.f32.mrf.mxu1 }
 0x271   : > { %5114 = vst [vmem:[#allocation23_spill] sm:$0xff] %v3628_v6  ;;  %5115 = vst [vmem:[#allocation24_spill] sm:$0xff] %v3630_v7  ;;  %968 = vmax.xlane.f32.xlu1 %v967_v5  ;;  %v971_v8 = vmax.f32 %v970_v4, %v3618_v0 }
 0x272   : > { %v3633_v13 = vpop.f32.mrf.mxu0  ;;  %v3635_v16 = vpop.f32.mrf.mxu1 }
 0x273   : > { %5116 = vst [vmem:[#allocation25_spill] sm:$0xff] %v3633_v13  ;;  %5117 = vst [vmem:[#allocation26_spill] sm:$0xff] %v3635_v16  ;;  %v975_v19 = vmax.f32 %v3628_v6, %v3633_v13  ;;  %v972_v20 = vmax.f32 %v971_v8, %v3623_v3 }
 0x274   : > { %v3640_v23 = vpop.f32.mrf.mxu0  ;;  %v3642_v26 = vpop.f32.mrf.mxu1 }
 0x275   : > { %5118 = vst [vmem:[#allocation27_spill] sm:$0xff] %v3640_v23  ;;  %5119 = vst [vmem:[#allocation28_spill] sm:$0xff] %v3642_v26  ;;  %973 = vmax.xlane.f32.xlu1 %v972_v20  ;;  %v976_v27 = vmax.f32 %v975_v19, %v3630_v7 }
 0x276   : > { %v3645_v30 = vpop.f32.mrf.mxu0  ;;  %v3647_v33 = vpop.f32.mrf.mxu1 }
 0x277   : > { %5120 = vst [vmem:[#allocation29_spill] sm:$0xff] %v3645_v30  ;;  %v977_v34 = vmax.f32 %v976_v27, %v3635_v16 }
 0x278   : > { %v3650_v37 = vpop.f32.mrf.mxu0  ;;  %v3652_v40 = vpop.f32.mrf.mxu1 }
 0x279   : > { %5121 = vst [vmem:[#allocation30_spill] sm:$0xff] %v3650_v37  ;;  %978 = vmax.xlane.f32.xlu1 %v977_v34 }
 0x27a   : > { %v3654_v41 = vpop.f32.mrf.mxu0  ;;  %v3656_v44 = vpop.f32.mrf.mxu1 }
 0x27b   : > { %5122 = vst [vmem:[#allocation31_spill] sm:$0xff] %v3654_v41 }
 0x27c   : > { %v3658_v47 = vpop.f32.mrf.mxu0  ;;  %v3660_v48 = vpop.f32.mrf.mxu1 }
 0x27d   : > { %5123 = vst [vmem:[#allocation32_spill] sm:$0xff] %v3658_v47  ;;  %5124 = vst [vmem:[#allocation33_spill] sm:$0xff] %v3660_v48 }
 0x27e   : > { %v3662_v51 = vpop.f32.mrf.mxu0  ;;  %v3664_v54 = vpop.f32.mrf.mxu1 }
 0x27f   : > { %5125 = vst [vmem:[#allocation34_spill] sm:$0xff] %v3662_v51 }
 0x280   : > { %v3666_v55 = vpop.f32.mrf.mxu0  ;;  %v3668_v58 = vpop.f32.mrf.mxu1 }
 0x281   : > { %5126 = vst [vmem:[#allocation35_spill] sm:$0xff] %v3666_v55 }
 0x282   : > { %v3670_v61 = vpop.f32.mrf.mxu0  ;;  %v3672_v62 = vpop.f32.mrf.mxu1 }
 0x283   : > { %5127 = vst [vmem:[#allocation36_spill] sm:$0xff] %v3670_v61 }
 0x284   : > { %v3674_v1 = vpop.f32.mrf.mxu0  ;;  %v3676_v4 = vpop.f32.mrf.mxu1 }
 0x285   : > { %5128 = vst [vmem:[#allocation37_spill] sm:$0xff] %v3674_v1  ;;  %5129 = vst [vmem:[#allocation38_spill] sm:$0xff] %v3676_v4 }
 0x286   : > { %v3678_v5 = vpop.f32.mrf.mxu0  ;;  %v3680_v8 = vpop.f32.mrf.mxu1 }
 0x287   : > { %5130 = vst [vmem:[#allocation39_spill] sm:$0xff] %v3678_v5  ;;  %5131 = vst [vmem:[#allocation40_spill] sm:$0xff] %v3680_v8 }
 0x288   : > { %v3682_v19 = vpop.f32.mrf.mxu0  ;;  %v3684_v20 = vpop.f32.mrf.mxu1 }
 0x289   : > { %5132 = vst [vmem:[#allocation41_spill] sm:$0xff] %v3682_v19  ;;  %5133 = vst [vmem:[#allocation42_spill] sm:$0xff] %v3684_v20 }
 0x28a   : > { %v3686_v27 = vpop.f32.mrf.mxu0  ;;  %v3688_v34 = vpop.f32.mrf.mxu1 }
 0x28b   : > { %5134 = vst [vmem:[#allocation43_spill] sm:$0xff] %v3686_v27  ;;  %5135 = vst [vmem:[#allocation44_spill] sm:$0xff] %v3688_v34 }
 0x28c   : > { %v3690_v16 = vpop.f32.mrf.mxu0  ;;  %v3692_v7 = vpop.f32.mrf.mxu1 }
 0x28d   : > { %5136 = vst [vmem:[#allocation45_spill] sm:$0xff] %v3690_v16  ;;  %5137 = vst [vmem:[#allocation46_spill] sm:$0xff] %v3692_v7 }
 0x28e   : > { %v3694_v13 = vpop.f32.mrf.mxu0  ;;  %v3696_v6 = vpop.f32.mrf.mxu1 }
 0x28f   : > { %5138 = vst [vmem:[#allocation47_spill] sm:$0xff] %v3694_v13  ;;  %5139 = vst [vmem:[#allocation48_spill] sm:$0xff] %v3696_v6  ;;  %v1010_v3 = vmax.f32 %v3690_v16, %v3694_v13 }
 0x290   : > { %v3700_v0 = vpop.f32.mrf.mxu0  ;;  %v3702_v2 = vpop.f32.mrf.mxu1 }
 0x291   : > { %5140 = vst [vmem:[#allocation49_spill] sm:$0xff] %v3700_v0  ;;  %5141 = vst [vmem:[#allocation50_spill] sm:$0xff] %v3702_v2  ;;  %v1011_v63 = vmax.f32 %v1010_v3, %v3692_v7 }
 0x292   : > { %v3705_v60 = vpop.f32.mrf.mxu0  ;;  %v3707_v57 = vpop.f32.mrf.mxu1 }
 0x293   : > { %5142 = vst [vmem:[#allocation51_spill] sm:$0xff] %v3705_v60  ;;  %v1015_v59 = vmax.f32 %v3700_v0, %v3705_v60  ;;  %v1012_v56 = vmax.f32 %v1011_v63, %v3696_v6 }
 0x294   : > { %v3712_v53 = vpop.f32.mrf.mxu0  ;;  %v3714_v50 = vpop.f32.mrf.mxu1 }
 0x295   : > { %5143 = vst [vmem:[#allocation52_spill] sm:$0xff] %v3712_v53  ;;  %5144 = vst [vmem:[#allocation53_spill] sm:$0xff] %v3714_v50  ;;  %1013 = vmax.xlane.f32.xlu1 %v1012_v56  ;;  %v1016_v13 = vmax.f32 %v1015_v59, %v3702_v2 }
 0x296   : > { %v3717_v16 = vpop.f32.mrf.mxu0  ;;  %v3719_v52 = vpop.f32.mrf.mxu1 }
 0x297   : > { %5145 = vst [vmem:[#allocation54_spill] sm:$0xff] %v3717_v16  ;;  %5146 = vst [vmem:[#allocation55_spill] sm:$0xff] %v3719_v52  ;;  %v1020_v3 = vmax.f32 %v3712_v53, %v3717_v16  ;;  %v1017_v7 = vmax.f32 %v1016_v13, %v3707_v57 }
 0x298   : > { %v3724_v49 = vpop.f32.mrf.mxu0  ;;  %v3726_v60 = vpop.f32.mrf.mxu1 }
 0x299   : > { %5147 = vst [vmem:[#allocation56_spill] sm:$0xff] %v3724_v49  ;;  %5148 = vst [vmem:[#allocation57_spill] sm:$0xff] %v3726_v60  ;;  %1018 = vmax.xlane.f32.xlu1 %v1017_v7  ;;  %v1021_v63 = vmax.f32 %v1020_v3, %v3714_v50  ;;  %v985_v3 = vmax.f32 %v3650_v37, %v3654_v41  ;;  %v995_v41 = vmax.f32 %v3666_v55, %v3670_v61 }
 0x29a   : > { %v3729_v0 = vpop.f32.mrf.mxu0  ;;  %v3731_v56 = vpop.f32.mrf.mxu1 }
 0x29b   : > { %5149 = vst [vmem:[#allocation58_spill] sm:$0xff] %v3729_v0  ;;  %v1025_v59 = vmax.f32 %v3724_v49, %v3729_v0  ;;  %v1022_v2 = vmax.f32 %v1021_v63, %v3719_v52 }
 0x29c   : > { %v3736_v6 = vpop.f32.mrf.mxu0  ;;  %v3738_v16 = vpop.f32.mrf.mxu1 }
 0x29d   : > { %5150 = vst [vmem:[#allocation59_spill] sm:$0xff] %v3738_v16  ;;  %1023 = vmax.xlane.f32.xlu1 %v1022_v2  ;;  %v1026_v13 = vmax.f32 %v1025_v59, %v3726_v60  ;;  %v980_v59 = vmax.f32 %v3640_v23, %v3645_v30  ;;  %v990_v23 = vmax.f32 %v3658_v47, %v3662_v51 }
 0x29e   : > { %v3741_v53 = vpop.f32.mrf.mxu0  ;;  %v3743_v7 = vpop.f32.mrf.mxu1 }
 0x29f   : > { %5151 = vst [vmem:[#allocation60_spill] sm:$0xff] %v3741_v53  ;;  %v1030_v50 = vmax.f32 %v3736_v6, %v3741_v53  ;;  %v1027_v0 = vmax.f32 %v1026_v13, %v3731_v56  ;;  %v986_v53 = vmax.f32 %v985_v3, %v3652_v40  ;;  %v981_v55 = vmax.f32 %v980_v59, %v3642_v26 }
 0x2a0   : > { %v3750_v63 = vpop.f32.mrf.mxu0  ;;  %v3752_v49 = vpop.f32.mrf.mxu1 }
 0x2a1   : > { %5152 = vst [vmem:[#allocation61_spill] sm:$0xff] %v3750_v63  ;;  %1028 = vmax.xlane.f32.xlu1 %v1027_v0  ;;  %v1031_v2 = vmax.f32 %v1030_v50, %v3738_v16  ;;  %v987_v3 = vmax.f32 %v986_v53, %v3656_v44  ;;  %v982_v59 = vmax.f32 %v981_v55, %v3647_v33 }
 0x2a2   : > { %v3757_v60 = vpop.f32.mrf.mxu0  ;;  %v3759_v52 = vpop.f32.mrf.mxu1 }
 0x2a3   : > { %5153 = vst [vmem:[#allocation62_spill] sm:$0xff] %v3757_v60  ;;  %v1035_v13 = vmax.f32 %v3750_v63, %v3757_v60  ;;  %v1032_v37 = vmax.f32 %v1031_v2, %v3743_v7 }
 0x2a4   : > { %v3767_v0 = vpop.f32.mrf.mxu0  ;;  %v3769_v50 = vpop.f32.mrf.mxu1 }
 0x2a5   : > { %5154 = vst [vmem:[#allocation63_spill] sm:$0xff] %v3767_v0  ;;  %1033 = vmax.xlane.f32.xlu1 %v1032_v37  ;;  %v1036_v30 = vmax.f32 %v1035_v13, %v3752_v49  ;;  %v996_v37 = vmax.f32 %v995_v41, %v3668_v58 }
 0x2a6   : > { %v3774_v16 = vpop.f32.mrf.mxu0  ;;  %v3776_v61 = vpop.f32.mrf.mxu1 }
 0x2a7   : > { %5155 = vst [vmem:[#allocation64_spill] sm:$0xff] %v3774_v16  ;;  %v1040_v2 = vmax.f32 %v3767_v0, %v3774_v16  ;;  %v1037_v60 = vmax.f32 %v1036_v30, %v3759_v52  ;;  %v997_v53 = vmax.f32 %v996_v37, %v3672_v62  ;;  %v991_v30 = vmax.f32 %v990_v23, %v3660_v48 }
 0x2a8   : > { %v3784_v63 = vpop.f32.mrf.mxu0  ;;  %v3786_v13 = vpop.f32.mrf.mxu1 }
 0x2a9   : > { %5156 = vst [vmem:[#allocation65_spill] sm:$0xff] %v3784_v63  ;;  %5157 = vst [vmem:[#allocation66_spill] sm:$0xff] %v3786_v13  ;;  %988 = vmax.xlane.f32.xlu1 %v987_v3  ;;  %1038 = vmax.xlane.f32.xlu0 %v1037_v60  ;;  %v1041_v41 = vmax.f32 %v1040_v2, %v3769_v50 }
 0x2aa   : > { %v3788_v51 = vpop.f32.mrf.mxu0  ;;  %v3790_v47 = vpop.f32.mrf.mxu1 }
 0x2ab   : > { %5158 = vst [vmem:[#allocation67_spill] sm:$0xff] %v3788_v51  ;;  %5159 = vst [vmem:[#allocation68_spill] sm:$0xff] %v3790_v47  ;;  %v1045_v16 = vmax.f32 %v3784_v63, %v3788_v51  ;;  %v992_v51 = vmax.f32 %v991_v30, %v3664_v54  ;;  %v1042_v37 = vmax.f32 %v1041_v41, %v3776_v61 }
 0x2ac   : > { %v3798_v0 = vpop.f32.mrf.mxu0  ;;  %v3800_v26 = vpop.f32.mrf.mxu1 }
 0x2ad   : > { %5160 = vst [vmem:[#allocation69_spill] sm:$0xff] %v3798_v0  ;;  %5161 = vst [vmem:[#allocation70_spill] sm:$0xff] %v3800_v26  ;;  %998 = vmax.xlane.f32.xlu1 %v997_v53  ;;  %983 = vmax.xlane.f32.xlu0 %v982_v59  ;;  %v1046_v23 = vmax.f32 %v1045_v16, %v3786_v13 }
 0x2ae   : > { %v3802_v60 = vpop.f32.mrf.mxu0  ;;  %v3804_v3 = vpop.f32.mrf.mxu1 }
 0x2af   : > { %5162 = vst [vmem:[#allocation71_spill] sm:$0xff] %v3802_v60  ;;  %v1050_v55 = vmax.f32 %v3798_v0, %v3802_v60  ;;  %v1047_v60 = vmax.f32 %v1046_v23, %v3790_v47 }
 0x2b0   : > { %v3811_v2 = vpop.f32.mrf.mxu0  ;;  %v3813_v63 = vpop.f32.mrf.mxu1 }
 0x2b1   : > { %5163 = vst [vmem:[#allocation72_spill] sm:$0xff] %v3811_v2  ;;  %5164 = vst [vmem:[#allocation73_spill] sm:$0xff] %v3813_v63  ;;  %993 = vmax.xlane.f32.xlu0 %v992_v51  ;;  %1043 = vmax.xlane.f32.xlu1 %v1042_v37  ;;  %v1051_v30 = vmax.f32 %v1050_v55, %v3800_v26 }
 0x2b2   : > { %v3815_v59 = vpop.f32.mrf.mxu0  ;;  %v3817_v53 = vpop.f32.mrf.mxu1 }
 0x2b3   : > { %5165 = vst [vmem:[#allocation74_spill] sm:$0xff] %v3815_v59  ;;  %v1055_v48 = vmax.f32 %v3811_v2, %v3815_v59  ;;  %v1052_v13 = vmax.f32 %v1051_v30, %v3804_v3 }
 0x2b4   : > { %v3823_v41 = vpop.f32.mrf.mxu0  ;;  %v3825_v16 = vpop.f32.mrf.mxu1 }
 0x2b5   : > { %5166 = vst [vmem:[#allocation75_spill] sm:$0xff] %v3823_v41  ;;  %5167 = vst [vmem:[#allocation76_spill] sm:$0xff] %v3825_v16  ;;  %1048 = vmax.xlane.f32.xlu1 %v1047_v60  ;;  %v1056_v59 = vmax.f32 %v1055_v48, %v3813_v63 }
 0x2b6   : > { %v3827_v0 = vpop.f32.mrf.mxu0  ;;  %v3829_v51 = vpop.f32.mrf.mxu1 }
 0x2b7   : > { %5168 = vst [vmem:[#allocation77_spill] sm:$0xff] %v3827_v0  ;;  %5169 = vst [vmem:[#allocation78_spill] sm:$0xff] %v3829_v51  ;;  %v1060_v37 = vmax.f32 %v3823_v41, %v3827_v0  ;;  %v1057_v0 = vmax.f32 %v1056_v59, %v3817_v53 }
 0x2b8   : > { %v3835_v2 = vpop.f32.mrf.mxu0  ;;  %v3837_v23 = vpop.f32.mrf.mxu1 }
 0x2b9   : > { %5170 = vst [vmem:[#allocation79_spill] sm:$0xff] %v3835_v2  ;;  %5171 = vst [vmem:[#allocation80_spill] sm:$0xff] %v3837_v23  ;;  %1053 = vmax.xlane.f32.xlu1 %v1052_v13  ;;  %v1061_v55 = vmax.f32 %v1060_v37, %v3825_v16 }
 0x2ba   : > { %v3840_v26 = vpop.f32.mrf.mxu0  ;;  %v3842_v60 = vpop.f32.mrf.mxu1 }
 0x2bb   : > { %5172 = vst [vmem:[#allocation81_spill] sm:$0xff] %v3840_v26  ;;  %5173 = vst [vmem:[#allocation82_spill] sm:$0xff] %v3842_v60  ;;  %v1065_v47 = vmax.f32 %v3835_v2, %v3840_v26  ;;  %v1062_v30 = vmax.f32 %v1061_v55, %v3829_v51 }
 0x2bc   : > { %v3848_v41 = vpop.f32.mrf.mxu0  ;;  %v3850_v48 = vpop.f32.mrf.mxu1 }
 0x2bd   : > { %5174 = vst [vmem:[#allocation83_spill] sm:$0xff] %v3848_v41  ;;  %5175 = vst [vmem:[#allocation84_spill] sm:$0xff] %v3850_v48  ;;  %1058 = vmax.xlane.f32.xlu1 %v1057_v0  ;;  %1063 = vmax.xlane.f32.xlu0 %v1062_v30  ;;  %v1066_v13 = vmax.f32 %v1065_v47, %v3837_v23 }
 0x2be   : > { %v3853_v37 = vpop.f32.mrf.mxu0  ;;  %v3855_v16 = vpop.f32.mrf.mxu1 }
 0x2bf   : > { %5176 = vst [vmem:[#allocation85_spill] sm:$0xff] %v3853_v37  ;;  %5177 = vst [vmem:[#allocation86_spill] sm:$0xff] %v3855_v16  ;;  %v1070_v63 = vmax.f32 %v3848_v41, %v3853_v37  ;;  %v1067_v26 = vmax.f32 %v1066_v13, %v3842_v60 }
 0x2c0   : > { %v3860_v59 = vpop.f32.mrf.mxu0  ;;  %v3862_v55 = vpop.f32.mrf.mxu1 }
 0x2c1   : > { %5178 = vst [vmem:[#allocation87_spill] sm:$0xff] %v3860_v59  ;;  %5179 = vst [vmem:[#allocation88_spill] sm:$0xff] %v3862_v55  ;;  %1068 = vmax.xlane.f32.xlu1 %v1067_v26  ;;  %v1071_v2 = vmax.f32 %v1070_v63, %v3850_v48  ;;  %v1000_v63 = vmax.f32 %v3674_v1, %v3678_v5 }
 0x2c2   : > { %v3865_v0 = vpop.f32.mrf.mxu0  ;;  %v3867_v30 = vpop.f32.mrf.mxu1 }
 0x2c3   : > { %5180 = vst [vmem:[#allocation89_spill] sm:$0xff] %v3865_v0  ;;  %5181 = vst [vmem:[#allocation90_spill] sm:$0xff] %v3867_v30  ;;  %v1075_v47 = vmax.f32 %v3860_v59, %v3865_v0  ;;  %v1072_v23 = vmax.f32 %v1071_v2, %v3855_v16 }
 0x2c4   : > { %v3872_v51 = vpop.f32.mrf.mxu0  ;;  %v3874_v37 = vpop.f32.mrf.mxu1 }
 0x2c5   : > { %5182 = vst [vmem:[#allocation91_spill] sm:$0xff] %v3872_v51  ;;  %5183 = vst [vmem:[#allocation92_spill] sm:$0xff] %v3874_v37  ;;  %1073 = vmax.xlane.f32.xlu0 %v1072_v23  ;;  %v1076_v13 = vmax.f32 %v1075_v47, %v3862_v55  ;;  %v1005_v55 = vmax.f32 %v3682_v19, %v3686_v27 }
 0x2c6   : > { %v3877_v41 = vpop.f32.mrf.mxu0  ;;  %v3879_v26 = vpop.f32.mrf.mxu1 }
 0x2c7   : > { %5184 = vst [vmem:[#allocation93_spill] sm:$0xff] %v3877_v41  ;;  %5185 = vst [vmem:[#allocation94_spill] sm:$0xff] %v3879_v26  ;;  %v1080_v48 = vmax.f32 %v3872_v51, %v3877_v41  ;;  %v1077_v0 = vmax.f32 %v1076_v13, %v3867_v30  ;;  %v1001_v41 = vmax.f32 %v1000_v63, %v3676_v4 }
 0x2c8   : > { %v3886_v2 = vpop.f32.mrf.mxu0  ;;  %v3889_v23 = vpop.f32.mrf.mxu1  ;;  %v1006_v51 = vmax.f32 %v1005_v55, %v3684_v20  ;;  %v5207_v20 = vld [vmem:[#allocation25_spill] sm:$0xff] }
 0x2c9   : > { %5186 = vst [vmem:[#allocation95_spill] sm:$0xff] %v3886_v2  ;;  %1078 = vmax.xlane.f32.xlu1 %v1077_v0  ;;  %v1081_v59 = vmax.f32 %v1080_v48, %v3874_v37  ;;  %5187 = vst [vmem:[#allocation96_spill] sm:$0xff] %v3889_v23  ;;  %v1002_v48 = vmax.f32 %v1001_v41, %v3680_v8 }
 0x2ca   : > { %v3891_v47 = vpop.f32.mrf.mxu0  ;;  %v3900_v0 = vpop.f32.mrf.mxu1  ;;  %v1007_v27 = vmax.f32 %v1006_v51, %v3688_v34 }
 0x2cb   : > { %5188 = vst [vmem:[#allocation97_spill] sm:$0xff] %v3891_v47  ;;  %v1085_v5 = vmax.f32 %v3886_v2, %v3891_v47  ;;  %v1082_v1 = vmax.f32 %v1081_v59, %v3879_v26  ;;  %5189 = vst [vmem:[#allocation98_spill] sm:$0xff] %v3900_v0  ;;  %v5208_v26 = vld [vmem:[#allocation24_spill] sm:$0xff] }
 0x2cd   : > { %1083 = vmax.xlane.f32.xlu0 %v1082_v1  ;;  %v1086_v13 = vmax.f32 %v1085_v5, %v3889_v23 }
 0x2cf   : > { %v1087_v37 = vmax.f32 %v1086_v13, %v3900_v0 }
 0x2d1   : > { %1003 = vmax.xlane.f32.xlu0 %v1002_v48  ;;  %1088 = vmax.xlane.f32.xlu1 %v1087_v37 }
 0x2d5   : > { %1008 = vmax.xlane.f32.xlu1 %v1007_v27 }
 0x2de   : > { %v934_v19 = vpop.xlane.xlu1 %933 }
 0x2df   : > { %v1090_v59 = vsub.f32 %v3522_v9, %v934_v19  ;;  %v1091_v1 = vsub.f32 %v3526_v11, %v934_v19  ;;  %v1092_v5 = vsub.f32 %v3524_v10, %v934_v19  ;;  %v1093_v63 = vsub.f32 %v3528_v12, %v934_v19 }
 0x2e0   : > { %v1826_v23 = vsub.f32 0.0, %v934_v19 }
 0x2e1   : > { %v1218_v41 = vmul.f32 1.442695, %v1090_v59  ;;  %v1220_v8 = vmul.f32 1.442695, %v1091_v1  ;;  %v1222_v13 = vmul.f32 1.442695, %v1092_v5 }
 0x2e2   : > { %v939_v0 = vpop.xlane.xlu1 %938  ;;  %v1224_v55 = vmul.f32 1.442695, %v1093_v63  ;;  %v1858_v9 = vmul.f32 1.442695, %v1826_v23 }
 0x2e3   : > { %v1094_v37 = vsub.f32 %v3532_v14, %v939_v0  ;;  %v1095_v51 = vsub.f32 %v3537_v17, %v939_v0  ;;  %v1096_v27 = vsub.f32 %v3534_v15, %v939_v0  ;;  %2731 = vpow2.f32 %v1218_v41 }
 0x2e4   : > { %v1097_v11 = vsub.f32 %v3539_v18, %v939_v0  ;;  %2733 = vpow2.f32 %v1220_v8  ;;  %v1827_v48 = vsub.f32 0.0, %v939_v0 }
 0x2e5   : > { %v1226_v10 = vmul.f32 1.442695, %v1094_v37  ;;  %2735 = vpow2.f32 %v1222_v13  ;;  %v1228_v12 = vmul.f32 1.442695, %v1095_v51  ;;  %v1230_v59 = vmul.f32 1.442695, %v1096_v27 }
 0x2e6   : > { %v944_v19 = vpop.xlane.xlu1 %943  ;;  %2737 = vpow2.f32 %v1224_v55  ;;  %v1232_v17 = vmul.f32 1.442695, %v1097_v11  ;;  %v1860_v23 = vmul.f32 1.442695, %v1827_v48 }
 0x2e7   : > { %v1098_v1 = vsub.f32 %v3544_v21, %v944_v19  ;;  %v1099_v14 = vsub.f32 %v3549_v24, %v944_v19  ;;  %2739 = vpow2.f32 %v1858_v9  ;;  %v1100_v15 = vsub.f32 %v3546_v22, %v944_v19 }
 0x2e8   : > { %2741 = vpow2.f32 %v1226_v10  ;;  %v1101_v18 = vsub.f32 %v3551_v25, %v944_v19  ;;  %v1828_v0 = vsub.f32 0.0, %v944_v19 }
 0x2e9   : > { %2743 = vpow2.f32 %v1228_v12  ;;  %v1234_v8 = vmul.f32 1.442695, %v1098_v1  ;;  %v1236_v63 = vmul.f32 1.442695, %v1099_v14  ;;  %v1238_v21 = vmul.f32 1.442695, %v1100_v15 }
 0x2ea   : > { %v949_v5 = vpop.xlane.xlu1 %948  ;;  %2745 = vpow2.f32 %v1230_v59  ;;  %v1240_v13 = vmul.f32 1.442695, %v1101_v18  ;;  %v1862_v55 = vmul.f32 1.442695, %v1828_v0 }
 0x2eb   : > { %v1102_v41 = vsub.f32 %v3556_v28, %v949_v5  ;;  %2747 = vpow2.f32 %v1232_v17  ;;  %v1103_v24 = vsub.f32 %v3561_v31, %v949_v5  ;;  %v1104_v22 = vsub.f32 %v3558_v29, %v949_v5 }
 0x2ec   : > { %2749 = vpow2.f32 %v1860_v23  ;;  %v1105_v25 = vsub.f32 %v3563_v32, %v949_v5  ;;  %v1829_v27 = vsub.f32 0.0, %v949_v5 }
 0x2ed   : > { %2751 = vpow2.f32 %v1234_v8  ;;  %v1242_v51 = vmul.f32 1.442695, %v1102_v41  ;;  %v1244_v9 = vmul.f32 1.442695, %v1103_v24  ;;  %v1246_v10 = vmul.f32 1.442695, %v1104_v22 }
 0x2ee   : > { %v954_v37 = vpop.xlane.xlu1 %953  ;;  %2753 = vpow2.f32 %v1236_v63  ;;  %v1248_v29 = vmul.f32 1.442695, %v1105_v25  ;;  %v1864_v59 = vmul.f32 1.442695, %v1829_v27  ;;  %v5190_v25 = vld [vmem:[#allocation11_spill] sm:$0xff] }
 0x2ef   : > { %2755 = vpow2.f32 %v1238_v21  ;;  %v1106_v28 = vsub.f32 %v3568_v35, %v954_v37  ;;  %v1107_v31 = vsub.f32 %v3573_v38, %v954_v37  ;;  %v1108_v12 = vsub.f32 %v3570_v36, %v954_v37 }
 0x2f0   : > { %v2732_v11 = vpop.eup %2731  ;;  %2757 = vpow2.f32 %v1240_v13  ;;  %v1109_v1 = vsub.f32 %v3575_v39, %v954_v37  ;;  %v1830_v23 = vsub.f32 0.0, %v954_v37 }
 0x2f1   : > { %v2734_v48 = vpop.eup %2733  ;;  %2759 = vpow2.f32 %v1862_v55  ;;  %v1250_v17 = vmul.f32 1.442695, %v1106_v28  ;;  %v1252_v38 = vmul.f32 1.442695, %v1107_v31  ;;  %v1254_v36 = vmul.f32 1.442695, %v1108_v12 }
 0x2f2   : > { %v959_v19 = vpop.xlane.xlu1 %958  ;;  %v2736_v32 = vpop.eup %2735  ;;  %2761 = vpow2.f32 %v1242_v51  ;;  %v1256_v39 = vmul.f32 1.442695, %v1109_v1  ;;  %v1866_v22 = vmul.f32 1.442695, %v1830_v23  ;;  %v5191_v51 = vld [vmem:[#allocation13_spill] sm:$0xff] }
 0x2f3   : > { %v2738_v14 = vpop.eup %2737  ;;  %2763 = vpow2.f32 %v1244_v9  ;;  %v1110_v35 = vsub.f32 %v3580_v42, %v959_v19  ;;  %v1111_v18 = vsub.f32 %v3585_v45, %v959_v19  ;;  %v1112_v63 = vsub.f32 %v3582_v43, %v959_v19  ;;  %v5192_v43 = vld [vmem:[#allocation12_spill] sm:$0xff] }
 0x2f4   : > { %v3927_v15 = vpop.eup %2739  ;;  %2765 = vpow2.f32 %v1246_v10  ;;  %v1113_v41 = vsub.f32 %v3587_v46, %v959_v19  ;;  %v1831_v24 = vsub.f32 0.0, %v959_v19 }
 0x2f5   : > { %v2742_v8 = vpop.eup %2741  ;;  %2767 = vpow2.f32 %v1248_v29  ;;  %v1258_v21 = vmul.f32 1.442695, %v1110_v35  ;;  %v1260_v45 = vmul.f32 1.442695, %v1111_v18  ;;  %v1262_v10 = vmul.f32 1.442695, %v1112_v63 }
 0x2f6   : > { %v3930_v0 = vpop.xlane.xlu1 %963  ;;  %v2744_v5 = vpop.eup %2743  ;;  %2769 = vpow2.f32 %v1864_v59  ;;  %v1264_v31 = vmul.f32 1.442695, %v1113_v41  ;;  %v3946_v29 = vpack.c.bf16 %v2742_v8, %v2732_v11  ;;  %v1868_v19 = vmul.f32 1.442695, %v1831_v24  ;;  %v5194_v59 = vld [vmem:[#allocation14_spill] sm:$0xff]  ;;  %v5197_v18 = vld [vmem:[#allocation17_spill] sm:$0xff] }
 0x2f7   : > { %v2746_v42 = vpop.eup %2745  ;;  %2771 = vpow2.f32 %v1250_v17  ;;  %v1114_v37 = vsub.f32 %v5190_v25, %v3930_v0  ;;  %v1115_v27 = vsub.f32 %v5191_v51, %v3930_v0  ;;  %v1116_v46 = vsub.f32 %v5192_v43, %v3930_v0  ;;  %v5198_v11 = vld [vmem:[#allocation16_spill] sm:$0xff]  ;;  %v5199_v24 = vld [vmem:[#allocation18_spill] sm:$0xff] }
 0x2f8   : > { %v2748_v13 = vpop.eup %2747  ;;  %2773 = vpow2.f32 %v1252_v38  ;;  %5193 = vst [vmem:[#allocation11_spill] sm:$0xff] %v3946_v29  ;;  %v1117_v1 = vsub.f32 %v5194_v59, %v3930_v0  ;;  %v3952_v17 = vpack.c.bf16 %v2744_v5, %v2734_v48  ;;  %v5196_v38 = vld [vmem:[#allocation15_spill] sm:$0xff]  ;;  %v3970_v25 = vpack.c.bf16 %v2746_v42, %v2736_v32  ;;  %v5203_v42 = vld [vmem:[#allocation21_spill] sm:$0xff] }
 0x2f9   : > { %v3934_v55 = vpop.eup %2749  ;;  %2775 = vpow2.f32 %v1254_v36  ;;  %v1266_v63 = vmul.f32 1.442695, %v1114_v37  ;;  %v1268_v41 = vmul.f32 1.442695, %v1115_v27  ;;  %v1538_v51 = vunpack.c.l.bf16 %v3946_v29 }
 0x2fa   : > { %v3942_v9 = vpop.xlane.xlu1 %968  ;;  %v3944_v28 = vpop.eup %2751  ;;  %2777 = vpow2.f32 %v1256_v39  ;;  %5195 = vst [vmem:[#allocation13_spill] sm:$0xff] %v3952_v17  ;;  %5200 = vst [vmem:[#allocation12_spill] sm:$0xff] %v3970_v25  ;;  %v1272_v59 = vmul.f32 1.442695, %v1117_v1 }
 0x2fb   : > { %v3948_v12 = vpop.eup %2753  ;;  %2779 = vpow2.f32 %v1258_v21  ;;  %v1118_v23 = vsub.f32 %v5196_v38, %v3942_v9  ;;  %v1119_v36 = vsub.f32 %v5197_v18, %v3942_v9  ;;  %v1120_v8 = vsub.f32 %v5198_v11, %v3942_v9  ;;  %v5202_v11 = vld [vmem:[#allocation19_spill] sm:$0xff] }
 0x2fc   : > { %v3954_v35 = vpop.eup %2755  ;;  %2781 = vpow2.f32 %v1866_v22  ;;  %v1270_v21 = vmul.f32 1.442695, %v1116_v46  ;;  %v1121_v22 = vsub.f32 %v5199_v24, %v3942_v9  ;;  %v3973_v38 = vpack.c.bf16 %v2748_v13, %v2738_v14 }
 0x2fd   : > { %v3962_v39 = vpop.eup %2757  ;;  %2783 = vpow2.f32 %v1260_v45  ;;  %v1539_v45 = vunpack.c.l.bf16 %v3952_v17  ;;  %v1274_v27 = vmul.f32 1.442695, %v1118_v23  ;;  %v1276_v46 = vmul.f32 1.442695, %v1119_v36 }
 0x2fe   : > { %v3964_v48 = vpop.xlane.xlu1 %973  ;;  %v3966_v5 = vpop.eup %2759  ;;  %2785 = vpow2.f32 %v1262_v10  ;;  %5201 = vst [vmem:[#allocation14_spill] sm:$0xff] %v3973_v38  ;;  %v1278_v18 = vmul.f32 1.442695, %v1120_v8  ;;  %v1280_v34 = vmul.f32 1.442695, %v1121_v22  ;;  %v5205_v8 = vld [vmem:[#allocation22_spill] sm:$0xff] }
 0x2ff   : > { %v2762_v43 = vpop.eup %2761  ;;  %2787 = vpow2.f32 %v1264_v31  ;;  %v1122_v32 = vsub.f32 %v5202_v11, %v3964_v48  ;;  %v1123_v24 = vsub.f32 %v5203_v42, %v3964_v48  ;;  %v5204_v31 = vld [vmem:[#allocation20_spill] sm:$0xff]  ;;  %v1666_v23 = vadd.f32 %v1539_v45, %v1538_v51  ;;  %v5206_v11 = vld [vmem:[#allocation23_spill] sm:$0xff] }
 0x300   : > { %v2764_v37 = vpop.eup %2763  ;;  %2789 = vpow2.f32 %v1868_v19  ;;  %v1124_v1 = vsub.f32 %v5204_v31, %v3964_v48  ;;  %v1540_v19 = vunpack.c.l.bf16 %v3970_v25 }
 0x301   : > { %v2766_v10 = vpop.eup %2765  ;;  %2791 = vpow2.f32 %v1266_v63  ;;  %v1125_v63 = vsub.f32 %v5205_v8, %v3964_v48  ;;  %v1284_v47 = vmul.f32 1.442695, %v1123_v24 }
 0x302   : > { %v3982_v14 = vpop.xlane.xlu1 %978  ;;  %v2768_v13 = vpop.eup %2767  ;;  %2793 = vpow2.f32 %v1268_v41  ;;  %v1541_v41 = vunpack.c.l.bf16 %v3973_v38  ;;  %v1667_v22 = vadd.f32 %v1666_v23, %v1540_v19  ;;  %v1286_v2 = vmul.f32 1.442695, %v1124_v1 }
 0x303   : > { %v3985_v36 = vpop.eup %2769  ;;  %2795 = vpow2.f32 %v1270_v21  ;;  %v1126_v42 = vsub.f32 %v5206_v11, %v3982_v14  ;;  %v1127_v31 = vsub.f32 %v5207_v20, %v3982_v14  ;;  %v1128_v51 = vsub.f32 %v5208_v26, %v3982_v14  ;;  %v5209_v11 = vld [vmem:[#allocation26_spill] sm:$0xff] }
 0x304   : > { %v2772_v4 = vpop.eup %2771  ;;  %2797 = vpow2.f32 %v1272_v59  ;;  %v1282_v21 = vmul.f32 1.442695, %v1122_v32  ;;  %v1668_v30 = vadd.f32 %v1667_v22, %v1541_v41  ;;  %v1129_v16 = vsub.f32 %v5209_v11, %v3982_v14 }
 0x305   : > { %v2774_v45 = vpop.eup %2773  ;;  %2799 = vpow2.f32 %v1274_v27  ;;  %v1542_v20 = vunpack.c.h.bf16 %v3946_v29  ;;  %v1290_v60 = vmul.f32 1.442695, %v1126_v42  ;;  %v1292_v19 = vmul.f32 1.442695, %v1127_v31 }
 0x306   : > { %v2776_v8 = vpop.eup %2775  ;;  %2801 = vpow2.f32 %v1276_v46  ;;  %v1543_v23 = vunpack.c.h.bf16 %v3952_v17  ;;  %1669 = vadd.xlane.f32.xlu1 %v1668_v30  ;;  %v1294_v27 = vmul.f32 1.442695, %v1128_v51  ;;  %v4001_v32 = vpack.c.bf16 %v2762_v43, %v3944_v28 }
 0x307   : > { %v2778_v59 = vpop.eup %2777  ;;  %2803 = vpow2.f32 %v1278_v18  ;;  %v4004_v46 = vpack.c.bf16 %v2764_v37, %v3948_v12  ;;  %v4007_v24 = vpack.c.bf16 %v2766_v10, %v3954_v35  ;;  %v1544_v18 = vunpack.c.h.bf16 %v3970_v25 }
 0x308   : > { %v2780_v26 = vpop.eup %2779  ;;  %5210 = vst [vmem:[#allocation15_spill] sm:$0xff] %v4001_v32  ;;  %2805 = vpow2.f32 %v1280_v34  ;;  %v1671_v42 = vadd.f32 %v1543_v23, %v1542_v20  ;;  %v4013_v31 = vpack.c.bf16 %v2768_v13, %v3962_v39  ;;  %v1296_v41 = vmul.f32 1.442695, %v1129_v16 }
 0x309   : > { %5211 = vst [vmem:[#allocation17_spill] sm:$0xff] %v4004_v46  ;;  %5212 = vst [vmem:[#allocation16_spill] sm:$0xff] %v4007_v24  ;;  %v4009_v1 = vpop.eup %2781  ;;  %v1545_v28 = vunpack.c.h.bf16 %v3973_v38  ;;  %v1546_v43 = vunpack.c.l.bf16 %v4001_v32  ;;  %v1547_v12 = vunpack.c.l.bf16 %v4004_v46  ;;  %2807 = vpow2.f32 %v1282_v21  ;;  %v5255_v38 = vld [vmem:[#allocation35_spill] sm:$0xff] }
 0x30a   : > { %5213 = vst [vmem:[#allocation18_spill] sm:$0xff] %v4013_v31  ;;  %v2784_v30 = vpop.eup %2783  ;;  %v1672_v35 = vadd.f32 %v1671_v42, %v1544_v18  ;;  %v1550_v10 = vunpack.c.h.bf16 %v4001_v32  ;;  %v4019_v34 = vpack.c.bf16 %v2780_v26, %v2772_v4  ;;  %2809 = vpow2.f32 %v1284_v47 }
 0x30b   : > { %v2786_v37 = vpop.eup %2785  ;;  %v1548_v39 = vunpack.c.l.bf16 %v4007_v24  ;;  %v1676_v13 = vadd.f32 %v1547_v12, %v1546_v43  ;;  %v1551_v16 = vunpack.c.h.bf16 %v4004_v46  ;;  %2811 = vpow2.f32 %v1286_v2 }
 0x30c   : > { %5214 = vst [vmem:[#allocation19_spill] sm:$0xff] %v4019_v34  ;;  %v2788_v22 = vpop.eup %2787  ;;  %v1673_v11 = vadd.f32 %v1672_v35, %v1545_v28  ;;  %v1549_v20 = vunpack.c.l.bf16 %v4013_v31  ;;  %v4024_v23 = vpack.c.bf16 %v2784_v30, %v2774_v45  ;;  %v1552_v42 = vunpack.c.h.bf16 %v4007_v24 }
 0x30d   : > { %v2790_v51 = vpop.eup %2789  ;;  %v1677_v18 = vadd.f32 %v1676_v13, %v1548_v39  ;;  %v1681_v4 = vadd.f32 %v1551_v16, %v1550_v10  ;;  %v4027_v26 = vpack.c.bf16 %v2786_v37, %v2776_v8  ;;  %v1288_v25 = vmul.f32 1.442695, %v1125_v63 }
 0x30e   : > { %5215 = vst [vmem:[#allocation21_spill] sm:$0xff] %v4024_v23  ;;  %v2792_v21 = vpop.eup %2791  ;;  %2813 = vpow2.f32 %v1290_v60  ;;  %1674 = vadd.xlane.f32.xlu1 %v1673_v11  ;;  %v1554_v43 = vunpack.c.l.bf16 %v4019_v34  ;;  %v1555_v2 = vunpack.c.l.bf16 %v4024_v23  ;;  %v4031_v30 = vpack.c.bf16 %v2788_v22, %v2778_v59 }
 0x30f   : > { %5216 = vst [vmem:[#allocation20_spill] sm:$0xff] %v4027_v26  ;;  %v2794_v47 = vpop.eup %2793  ;;  %2815 = vpow2.f32 %v1292_v19  ;;  %v1678_v12 = vadd.f32 %v1677_v18, %v1549_v20  ;;  %v1682_v45 = vadd.f32 %v1681_v4, %v1552_v42  ;;  %v1556_v10 = vunpack.c.l.bf16 %v4027_v26 }
 0x310   : > { %v2796_v28 = vpop.eup %2795  ;;  %5217 = vst [vmem:[#allocation22_spill] sm:$0xff] %v4031_v30  ;;  %2817 = vpow2.f32 %v1294_v27  ;;  %v1686_v8 = vadd.f32 %v1555_v2, %v1554_v43  ;;  %v1558_v37 = vunpack.c.h.bf16 %v4019_v34  ;;  %v1559_v60 = vunpack.c.h.bf16 %v4024_v23 }
 0x311   : > { %v2798_v35 = vpop.eup %2797  ;;  %2819 = vpow2.f32 %v1296_v41  ;;  %v1553_v19 = vunpack.c.h.bf16 %v4013_v31  ;;  %v1557_v27 = vunpack.c.l.bf16 %v4031_v30  ;;  %v4044_v11 = vpack.c.bf16 %v3934_v55, %v3927_v15 }
 0x312   : > { %v2800_v63 = vpop.eup %2799  ;;  %2821 = vpow2.f32 %v1288_v25  ;;  %1679 = vadd.xlane.f32.xlu1 %v1678_v12  ;;  %v1687_v13 = vadd.f32 %v1686_v8, %v1556_v10  ;;  %v4048_v41 = vpack.c.bf16 %v3985_v36, %v3966_v5  ;;  %v1691_v20 = vadd.f32 %v1559_v60, %v1558_v37 }
 0x313   : > { %v2802_v39 = vpop.eup %2801  ;;  %v4037_v16 = vpack.c.bf16 %v2800_v63, %v2792_v21  ;;  %5220 = vst [vmem:[#allocation24_spill] sm:$0xff] %v4044_v11  ;;  %v1683_v25 = vadd.f32 %v1682_v45, %v1553_v19  ;;  %v1560_v43 = vunpack.c.h.bf16 %v4027_v26  ;;  %v1832_v15 = vsub.f32 0.0, %v3930_v0  ;;  %v5253_v11 = vld [vmem:[#allocation62_spill] sm:$0xff] }
 0x314   : > { %v2804_v59 = vpop.eup %2803  ;;  %v4040_v22 = vpack.c.bf16 %v2802_v39, %v2794_v47  ;;  %5221 = vst [vmem:[#allocation26_spill] sm:$0xff] %v4048_v41  ;;  %v1688_v47 = vadd.f32 %v1687_v13, %v1557_v27  ;;  %v1834_v63 = vsub.f32 0.0, %v3964_v48  ;;  %v4064_v60 = vpack.c.bf16 %v2790_v51, %v4009_v1  ;;  %v5236_v41 = vld [vmem:[#allocation52_spill] sm:$0xff] }
 0x315   : > { %5218 = vst [vmem:[#allocation23_spill] sm:$0xff] %v4037_v16  ;;  %v4050_v18 = vpack.c.bf16 %v2804_v59, %v2796_v28  ;;  %v1562_v21 = vunpack.c.l.bf16 %v4037_v16  ;;  %v2806_v42 = vpop.eup %2805  ;;  %v1566_v5 = vunpack.c.h.bf16 %v4037_v16  ;;  %v1833_v28 = vsub.f32 0.0, %v3942_v9 }
 0x316   : > { %5219 = vst [vmem:[#allocation25_spill] sm:$0xff] %v4040_v22  ;;  %v1563_v4 = vunpack.c.l.bf16 %v4040_v22  ;;  %1684 = vadd.xlane.f32.xlu1 %v1683_v25  ;;  %v2808_v2 = vpop.eup %2807  ;;  %v1567_v36 = vunpack.c.h.bf16 %v4040_v22  ;;  %v1692_v45 = vadd.f32 %v1691_v20, %v1560_v43  ;;  %v4059_v10 = vpack.c.bf16 %v2806_v42, %v2798_v35  ;;  %5224 = vst [vmem:[#allocation101_spill] sm:$0xff] %v4064_v60  ;;  %v5234_v60 = vld [vmem:[#allocation51_spill] sm:$0xff] }
 0x317   : > { %5222 = vst [vmem:[#allocation99_spill] sm:$0xff] %v4050_v18  ;;  %v2810_v12 = vpop.eup %2809  ;;  %v1564_v8 = vunpack.c.l.bf16 %v4050_v18  ;;  %v1561_v0 = vunpack.c.h.bf16 %v4031_v30  ;;  %v1870_v13 = vmul.f32 1.442695, %v1832_v15  ;;  %v1835_v59 = vsub.f32 0.0, %v3982_v14 }
 0x318   : > { %v1696_v55 = vadd.f32 %v1563_v4, %v1562_v21  ;;  %5223 = vst [vmem:[#allocation100_spill] sm:$0xff] %v4059_v10  ;;  %v2812_v37 = vpop.eup %2811  ;;  %v1701_v9 = vadd.f32 %v1567_v36, %v1566_v5  ;;  %v1872_v35 = vmul.f32 1.442695, %v1833_v28  ;;  %v1565_v20 = vunpack.c.l.bf16 %v4059_v10  ;;  %v5228_v28 = vld [vmem:[#allocation45_spill] sm:$0xff] }
 0x319   : > { %v1693_v25 = vadd.f32 %v1692_v45, %v1561_v0  ;;  %v1874_v1 = vmul.f32 1.442695, %v1834_v63  ;;  %v1568_v51 = vunpack.c.h.bf16 %v4050_v18  ;;  %2823 = vpow2.f32 %v1870_v13  ;;  %v5229_v45 = vld [vmem:[#allocation47_spill] sm:$0xff] }
 0x31a   : > { %1689 = vadd.xlane.f32.xlu1 %v1688_v47  ;;  %v1697_v39 = vadd.f32 %v1696_v55, %v1564_v8  ;;  %v1876_v5 = vmul.f32 1.442695, %v1835_v59  ;;  %2825 = vpow2.f32 %v1872_v35 }
 0x31b   : > { %v2814_v19 = vpop.eup %2813  ;;  %v1702_v36 = vadd.f32 %v1701_v9, %v1568_v51  ;;  %2827 = vpow2.f32 %v1874_v1 }
 0x31c   : > { %v2816_v27 = vpop.eup %2815  ;;  %v4069_v42 = vpack.c.bf16 %v2814_v19, %v2808_v2  ;;  %v1698_v47 = vadd.f32 %v1697_v39, %v1565_v20  ;;  %2829 = vpow2.f32 %v1876_v5 }
 0x31d   : > { %v2818_v48 = vpop.eup %2817  ;;  %v4072_v43 = vpack.c.bf16 %v2816_v27, %v2810_v12  ;;  %v1569_v12 = vunpack.c.h.bf16 %v4059_v10  ;;  %v5232_v27 = vld [vmem:[#allocation48_spill] sm:$0xff] }
 0x31e   : > { %v1014_v21 = vpop.xlane.xlu1 %1013  ;;  %5225 = vst [vmem:[#allocation102_spill] sm:$0xff] %v4069_v42  ;;  %v2820_v4 = vpop.eup %2819  ;;  %1694 = vadd.xlane.f32.xlu1 %v1693_v25  ;;  %v4074_v15 = vpack.c.bf16 %v2818_v48, %v2812_v37  ;;  %v1570_v14 = vunpack.c.l.bf16 %v4069_v42  ;;  %v5231_v37 = vld [vmem:[#allocation46_spill] sm:$0xff] }
 0x31f   : > { %5226 = vst [vmem:[#allocation103_spill] sm:$0xff] %v4072_v43  ;;  %v2822_v55 = vpop.eup %2821  ;;  %v1154_v2 = vsub.f32 %v5228_v28, %v1014_v21  ;;  %v1155_v8 = vsub.f32 %v5229_v45, %v1014_v21  ;;  %v1571_v0 = vunpack.c.l.bf16 %v4072_v43  ;;  %v1156_v19 = vsub.f32 %v5231_v37, %v1014_v21 }
 0x320   : > { %5227 = vst [vmem:[#allocation104_spill] sm:$0xff] %v4074_v15  ;;  %v4079_v63 = vpack.c.bf16 %v2820_v4, %v2822_v55  ;;  %v1157_v13 = vsub.f32 %v5232_v27, %v1014_v21  ;;  %v1842_v59 = vsub.f32 0.0, %v1014_v21  ;;  %v1572_v9 = vunpack.c.l.bf16 %v4074_v15  ;;  %v5233_v55 = vld [vmem:[#allocation49_spill] sm:$0xff] }
 0x321   : > { %v1706_v25 = vadd.f32 %v1571_v0, %v1570_v14  ;;  %v1703_v35 = vadd.f32 %v1702_v36, %v1569_v12  ;;  %v1346_v20 = vmul.f32 1.442695, %v1154_v2  ;;  %v1348_v48 = vmul.f32 1.442695, %v1155_v8  ;;  %v5235_v36 = vld [vmem:[#allocation50_spill] sm:$0xff] }
 0x322   : > { %5230 = vst [vmem:[#allocation45_spill] sm:$0xff] %v4079_v63  ;;  %v1019_v39 = vpop.xlane.xlu1 %1018  ;;  %1699 = vadd.xlane.f32.xlu1 %v1698_v47  ;;  %v1573_v51 = vunpack.c.l.bf16 %v4079_v63  ;;  %v1350_v45 = vmul.f32 1.442695, %v1156_v19  ;;  %v1574_v47 = vunpack.c.h.bf16 %v4069_v42  ;;  %v1575_v21 = vunpack.c.h.bf16 %v4072_v43 }
 0x323   : > { %v1707_v4 = vadd.f32 %v1706_v25, %v1572_v9  ;;  %v1158_v1 = vsub.f32 %v5233_v55, %v1019_v39  ;;  %v1159_v37 = vsub.f32 %v5234_v60, %v1019_v39  ;;  %v1352_v27 = vmul.f32 1.442695, %v1157_v13 }
 0x324   : > { %v1890_v14 = vmul.f32 1.442695, %v1842_v59  ;;  %v1160_v2 = vsub.f32 %v5235_v36, %v1019_v39  ;;  %2831 = vpow2.f32 %v1346_v20  ;;  %v1161_v8 = vsub.f32 %v3707_v57, %v1019_v39  ;;  %v5237_v20 = vld [vmem:[#allocation54_spill] sm:$0xff]  ;;  %v5243_v36 = vld [vmem:[#allocation56_spill] sm:$0xff] }
 0x325   : > { %v1708_v5 = vadd.f32 %v1707_v4, %v1573_v51  ;;  %v1576_v0 = vunpack.c.h.bf16 %v4074_v15  ;;  %v1711_v12 = vadd.f32 %v1575_v21, %v1574_v47  ;;  %2833 = vpow2.f32 %v1348_v48  ;;  %v5238_v4 = vld [vmem:[#allocation53_spill] sm:$0xff] }
 0x326   : > { %v1024_v28 = vpop.xlane.xlu1 %1023  ;;  %1704 = vadd.xlane.f32.xlu1 %v1703_v35  ;;  %v1354_v19 = vmul.f32 1.442695, %v1158_v1  ;;  %v1843_v9 = vsub.f32 0.0, %v1019_v39  ;;  %2835 = vpow2.f32 %v1350_v45  ;;  %v1356_v25 = vmul.f32 1.442695, %v1159_v37  ;;  %v4098_v48 = vpop.eup %2823  ;;  %v5240_v45 = vld [vmem:[#allocation55_spill] sm:$0xff] }
 0x327   : > { %v1712_v55 = vadd.f32 %v1711_v12, %v1576_v0  ;;  %v1162_v35 = vsub.f32 %v5236_v41, %v1024_v28  ;;  %2837 = vpow2.f32 %v1352_v27  ;;  %v1358_v13 = vmul.f32 1.442695, %v1160_v2  ;;  %5239 = vst [vmem:[#allocation47_spill] sm:$0xff] %v4098_v48  ;;  %v4101_v21 = vpop.eup %2825  ;;  %v5244_v12 = vld [vmem:[#allocation58_spill] sm:$0xff] }
 0x328   : > { %v1577_v59 = vunpack.c.h.bf16 %v4079_v63  ;;  %v1163_v51 = vsub.f32 %v5237_v20, %v1024_v28  ;;  %2839 = vpow2.f32 %v1890_v14  ;;  %v1360_v57 = vmul.f32 1.442695, %v1161_v8  ;;  %5241 = vst [vmem:[#allocation46_spill] sm:$0xff] %v4101_v21  ;;  %v5336_v63 = vld [vmem:[#allocation42_spill] sm:$0xff] }
 0x329   : > { %v1164_v47 = vsub.f32 %v5238_v4, %v1024_v28  ;;  %2841 = vpow2.f32 %v1354_v19  ;;  %v1892_v39 = vmul.f32 1.442695, %v1843_v9  ;;  %v1165_v37 = vsub.f32 %v5240_v45, %v1024_v28  ;;  %v5248_v45 = vld [vmem:[#allocation59_spill] sm:$0xff] }
 0x32a   : > { %v1029_v60 = vpop.xlane.xlu1 %1028  ;;  %1709 = vadd.xlane.f32.xlu1 %v1708_v5  ;;  %v1713_v1 = vadd.f32 %v1712_v55, %v1577_v59  ;;  %2843 = vpow2.f32 %v1356_v25  ;;  %v1362_v41 = vmul.f32 1.442695, %v1162_v35  ;;  %v1844_v27 = vsub.f32 0.0, %v1024_v28  ;;  %v4103_v5 = vpop.eup %2827  ;;  %v5246_v59 = vld [vmem:[#allocation57_spill] sm:$0xff] }
 0x32b   : > { %5242 = vst [vmem:[#allocation48_spill] sm:$0xff] %v4103_v5  ;;  %2845 = vpow2.f32 %v1358_v13  ;;  %v1364_v14 = vmul.f32 1.442695, %v1163_v51  ;;  %v1166_v2 = vsub.f32 %v5243_v36, %v1029_v60  ;;  %v1366_v0 = vmul.f32 1.442695, %v1164_v47  ;;  %v4107_v9 = vpop.eup %2829  ;;  %v5325_v5 = vld [vmem:[#allocation37_spill] sm:$0xff] }
 0x32c   : > { %2847 = vpow2.f32 %v1360_v57  ;;  %v1167_v19 = vsub.f32 %v5244_v12, %v1029_v60  ;;  %5245 = vst [vmem:[#allocation49_spill] sm:$0xff] %v4107_v9  ;;  %v1368_v55 = vmul.f32 1.442695, %v1165_v37  ;;  %v1168_v25 = vsub.f32 %v5246_v59, %v1029_v60 }
 0x32d   : > { %2849 = vpow2.f32 %v1892_v39  ;;  %v1894_v28 = vmul.f32 1.442695, %v1844_v27  ;;  %v1169_v35 = vsub.f32 %v3731_v56, %v1029_v60  ;;  %v1370_v13 = vmul.f32 1.442695, %v1166_v2 }
 0x32e   : > { %1714 = vadd.xlane.f32.xlu1 %v1713_v1  ;;  %v1034_v8 = vpop.xlane.xlu1 %1033  ;;  %2851 = vpow2.f32 %v1362_v41  ;;  %v1845_v20 = vsub.f32 0.0, %v1029_v60  ;;  %v1372_v51 = vmul.f32 1.442695, %v1167_v19  ;;  %v1374_v47 = vmul.f32 1.442695, %v1168_v25  ;;  %v5247_v1 = vld [vmem:[#allocation60_spill] sm:$0xff] }
 0x32f   : > { %2853 = vpow2.f32 %v1364_v14  ;;  %v1170_v57 = vsub.f32 %v3736_v6, %v1034_v8  ;;  %v1171_v39 = vsub.f32 %v5247_v1, %v1034_v8  ;;  %v1172_v37 = vsub.f32 %v5248_v45, %v1034_v8  ;;  %v5250_v25 = vld [vmem:[#allocation30_spill] sm:$0xff]  ;;  %v5251_v1 = vld [vmem:[#allocation31_spill] sm:$0xff] }
 0x330   : > { %2855 = vpow2.f32 %v1366_v0  ;;  %v1376_v56 = vmul.f32 1.442695, %v1169_v35  ;;  %v1173_v27 = vsub.f32 %v3743_v7, %v1034_v8  ;;  %v1896_v14 = vmul.f32 1.442695, %v1845_v20 }
 0x331   : > { %v4112_v4 = vpop.eup %2831  ;;  %2857 = vpow2.f32 %v1368_v55  ;;  %v1378_v2 = vmul.f32 1.442695, %v1170_v57  ;;  %v1846_v0 = vsub.f32 0.0, %v1034_v8  ;;  %v1380_v55 = vmul.f32 1.442695, %v1171_v39  ;;  %v5252_v57 = vld [vmem:[#allocation61_spill] sm:$0xff] }
 0x332   : > { %v989_v36 = vpop.xlane.xlu1 %988  ;;  %v4116_v41 = vpop.eup %2833  ;;  %2859 = vpow2.f32 %v1894_v28  ;;  %v1382_v59 = vmul.f32 1.442695, %v1172_v37  ;;  %v1384_v7 = vmul.f32 1.442695, %v1173_v27 }
 0x333   : > { %v4119_v60 = vpop.eup %2835  ;;  %2861 = vpow2.f32 %v1370_v13  ;;  %v1039_v12 = vpop.xlane.xlu0 %1038  ;;  %v1134_v28 = vsub.f32 %v5250_v25, %v989_v36  ;;  %v1135_v13 = vsub.f32 %v5251_v1, %v989_v36  ;;  %v1136_v20 = vsub.f32 %v3652_v40, %v989_v36 }
 0x334   : > { %v4121_v6 = vpop.eup %2837  ;;  %2863 = vpow2.f32 %v1372_v51  ;;  %v1137_v8 = vsub.f32 %v3656_v44, %v989_v36  ;;  %v1837_v51 = vsub.f32 0.0, %v989_v36  ;;  %v1898_v25 = vmul.f32 1.442695, %v1846_v0 }
 0x335   : > { %v4123_v19 = vpop.eup %2839  ;;  %2865 = vpow2.f32 %v1374_v47  ;;  %v1174_v47 = vsub.f32 %v5252_v57, %v1039_v12  ;;  %v1176_v27 = vsub.f32 %v3752_v49, %v1039_v12  ;;  %v1306_v40 = vmul.f32 1.442695, %v1134_v28 }
 0x336   : > { %5249 = vst [vmem:[#allocation51_spill] sm:$0xff] %v4123_v19  ;;  %v4126_v35 = vpop.eup %2841  ;;  %2867 = vpow2.f32 %v1376_v56  ;;  %v999_v39 = vpop.xlane.xlu1 %998  ;;  %v1175_v56 = vsub.f32 %v5253_v11, %v1039_v12  ;;  %v1847_v29 = vsub.f32 0.0, %v1039_v12  ;;  %v1308_v36 = vmul.f32 1.442695, %v1135_v13 }
 0x337   : > { %v4130_v45 = vpop.eup %2843  ;;  %2869 = vpow2.f32 %v1896_v14  ;;  %v1177_v14 = vsub.f32 %v3759_v52, %v1039_v12  ;;  %v1310_v57 = vmul.f32 1.442695, %v1136_v20  ;;  %v1142_v17 = vsub.f32 %v5255_v38, %v999_v39  ;;  %v5256_v52 = vld [vmem:[#allocation36_spill] sm:$0xff]  ;;  %v984_v32 = vpop.xlane.xlu0 %983 }
 0x338   : > { %v4134_v37 = vpop.eup %2845  ;;  %2871 = vpow2.f32 %v1378_v2  ;;  %v1312_v11 = vmul.f32 1.442695, %v1137_v8  ;;  %v1880_v0 = vmul.f32 1.442695, %v1837_v51  ;;  %v1386_v49 = vmul.f32 1.442695, %v1174_v47 }
 0x339   : > { %v4138_v1 = vpop.eup %2847  ;;  %2873 = vpow2.f32 %v1380_v55  ;;  %v1388_v55 = vmul.f32 1.442695, %v1175_v56  ;;  %v1390_v28 = vmul.f32 1.442695, %v1176_v27  ;;  %v1143_v12 = vsub.f32 %v5256_v52, %v999_v39  ;;  %v5258_v56 = vld [vmem:[#allocation27_spill] sm:$0xff]  ;;  %v5259_v52 = vld [vmem:[#allocation29_spill] sm:$0xff] }
 0x33a   : > { %v4141_v44 = vpop.eup %2849  ;;  %2875 = vpow2.f32 %v1382_v59  ;;  %v1392_v59 = vmul.f32 1.442695, %v1177_v14  ;;  %v1900_v13 = vmul.f32 1.442695, %v1847_v29  ;;  %v1144_v38 = vsub.f32 %v3668_v58, %v999_v39  ;;  %v1044_v47 = vpop.xlane.xlu1 %1043 }
 0x33b   : > { %5254 = vst [vmem:[#allocation50_spill] sm:$0xff] %v4141_v44  ;;  %v4144_v2 = vpop.eup %2851  ;;  %2877 = vpow2.f32 %v1384_v7  ;;  %v1145_v7 = vsub.f32 %v3672_v62, %v999_v39  ;;  %v1322_v8 = vmul.f32 1.442695, %v1142_v17  ;;  %v1839_v51 = vsub.f32 0.0, %v999_v39  ;;  %v5261_v39 = vld [vmem:[#allocation63_spill] sm:$0xff]  ;;  %v4172_v18 = vpop.xlane.xlu0 %993 }
 0x33c   : > { %v4146_v24 = vpop.eup %2853  ;;  %2879 = vpow2.f32 %v1898_v25  ;;  %v1130_v27 = vsub.f32 %v5258_v56, %v984_v32  ;;  %v1131_v46 = vsub.f32 %v5259_v52, %v984_v32  ;;  %v1324_v58 = vmul.f32 1.442695, %v1143_v12 }
 0x33d   : > { %v4149_v31 = vpop.eup %2855  ;;  %2881 = vpow2.f32 %v1306_v40  ;;  %v5260_v40 = vld [vmem:[#allocation28_spill] sm:$0xff]  ;;  %v1836_v26 = vsub.f32 0.0, %v984_v32  ;;  %v1326_v17 = vmul.f32 1.442695, %v1144_v38  ;;  %v1178_v34 = vsub.f32 %v5261_v39, %v1044_v47 }
 0x33e   : > { %v4152_v20 = vpop.eup %2857  ;;  %2883 = vpow2.f32 %v1308_v36  ;;  %v1132_v14 = vsub.f32 %v5260_v40, %v984_v32  ;;  %v1133_v36 = vsub.f32 %v3647_v33, %v984_v32  ;;  %v1328_v52 = vmul.f32 1.442695, %v1145_v7 }
 0x33f   : > { %v4155_v25 = vpop.eup %2859  ;;  %2885 = vpow2.f32 %v1310_v57  ;;  %v5262_v57 = vld [vmem:[#allocation64_spill] sm:$0xff]  ;;  %v1884_v40 = vmul.f32 1.442695, %v1839_v51  ;;  %v1180_v23 = vsub.f32 %v3769_v50, %v1044_v47  ;;  %v1298_v33 = vmul.f32 1.442695, %v1130_v27 }
 0x340   : > { %5257 = vst [vmem:[#allocation52_spill] sm:$0xff] %v4155_v25  ;;  %v4160_v29 = vpop.eup %2861  ;;  %2887 = vpow2.f32 %v1312_v11  ;;  %v1179_v30 = vsub.f32 %v5262_v57, %v1044_v47  ;;  %v1300_v32 = vmul.f32 1.442695, %v1131_v46  ;;  %v1302_v12 = vmul.f32 1.442695, %v1132_v14 }
 0x341   : > { %v4163_v62 = vpop.eup %2863  ;;  %2889 = vpow2.f32 %v1880_v0  ;;  %v1304_v38 = vmul.f32 1.442695, %v1133_v36  ;;  %v4176_v39 = vmul.f32 1.442695, %v1836_v26  ;;  %v4181_v51 = vmul.f32 1.442695, %v1178_v34  ;;  %v4205_v36 = vpop.xlane.xlu1 %1048 }
 0x342   : > { %v4167_v56 = vpop.eup %2865  ;;  %2891 = vpow2.f32 %v1386_v49  ;;  %v1181_v49 = vsub.f32 %v3776_v61, %v1044_v47  ;;  %v4183_v50 = vmul.f32 1.442695, %v1179_v30  ;;  %v4187_v46 = vpack.c.bf16 %v4126_v35, %v4112_v4  ;;  %v5265_v26 = vld [vmem:[#allocation32_spill] sm:$0xff]  ;;  %v5267_v30 = vld [vmem:[#allocation34_spill] sm:$0xff]  ;;  %v5268_v4 = vld [vmem:[#allocation33_spill] sm:$0xff] }
 0x343   : > { %v4170_v11 = vpop.eup %2867  ;;  %2893 = vpow2.f32 %v1388_v55  ;;  %v1848_v55 = vsub.f32 0.0, %v1044_v47  ;;  %v1138_v14 = vsub.f32 %v5265_v26, %v4172_v18  ;;  %v4197_v61 = vpack.c.bf16 %v4130_v45, %v4116_v41 }
 0x344   : > { %v4174_v0 = vpop.eup %2869  ;;  %2895 = vpow2.f32 %v1390_v28  ;;  %5264 = vst [vmem:[#allocation53_spill] sm:$0xff] %v4187_v46  ;;  %v4191_v28 = vmul.f32 1.442695, %v1180_v23  ;;  %v1139_v47 = vsub.f32 %v5267_v30, %v4172_v18  ;;  %v1140_v35 = vsub.f32 %v5268_v4, %v4172_v18 }
 0x345   : > { %5263 = vst [vmem:[#allocation54_spill] sm:$0xff] %v4174_v0  ;;  %v4179_v7 = vpop.eup %2871  ;;  %2897 = vpow2.f32 %v1392_v59  ;;  %5266 = vst [vmem:[#allocation55_spill] sm:$0xff] %v4197_v61  ;;  %v4209_v23 = vpack.c.bf16 %v4134_v37, %v4119_v60  ;;  %v4215_v41 = vpack.c.bf16 %v4138_v1, %v4121_v6  ;;  %v1602_v45 = vunpack.c.l.bf16 %v4187_v46 }
 0x346   : > { %v4189_v27 = vpop.eup %2873  ;;  %2899 = vpow2.f32 %v1900_v13  ;;  %v1603_v13 = vunpack.c.l.bf16 %v4197_v61  ;;  %v1400_v26 = vmul.f32 1.442695, %v1181_v49  ;;  %v4221_v30 = vmul.f32 1.442695, %v1848_v55 }
 0x347   : > { %v4199_v34 = vpop.eup %2875  ;;  %5269 = vst [vmem:[#allocation56_spill] sm:$0xff] %v4209_v23  ;;  %2901 = vpow2.f32 %v1322_v8  ;;  %5270 = vst [vmem:[#allocation58_spill] sm:$0xff] %v4215_v41  ;;  %v1141_v60 = vsub.f32 %v3664_v54, %v4172_v18  ;;  %v4227_v8 = vmul.f32 1.442695, %v1138_v14  ;;  %v1604_v6 = vunpack.c.l.bf16 %v4209_v23  ;;  %v5272_v54 = vld [vmem:[#allocation65_spill] sm:$0xff] }
 0x348   : > { %v4211_v59 = vpop.eup %2877  ;;  %2903 = vpow2.f32 %v1324_v58  ;;  %v1746_v1 = vadd.f32 %v1603_v13, %v1602_v45  ;;  %v4232_v16 = vmul.f32 1.442695, %v1139_v47  ;;  %v4234_v58 = vmul.f32 1.442695, %v1140_v35 }
 0x349   : > { %v4219_v57 = vpop.eup %2879  ;;  %2905 = vpow2.f32 %v1326_v17  ;;  %v1838_v49 = vsub.f32 0.0, %v4172_v18  ;;  %v1182_v17 = vsub.f32 %v5272_v54, %v4205_v36  ;;  %v1605_v14 = vunpack.c.l.bf16 %v4215_v41  ;;  %v5275_v54 = vld [vmem:[#allocation66_spill] sm:$0xff] }
 0x34a   : > { %5271 = vst [vmem:[#allocation57_spill] sm:$0xff] %v4219_v57  ;;  %v4225_v37 = vpop.eup %2881  ;;  %2907 = vpow2.f32 %v1328_v52  ;;  %v1747_v10 = vadd.f32 %v1746_v1, %v1604_v6  ;;  %v4244_v45 = vmul.f32 1.442695, %v1141_v60  ;;  %v1054_v52 = vpop.xlane.xlu1 %1053  ;;  %v1606_v47 = vunpack.c.h.bf16 %v4187_v46 }
 0x34b   : > { %v4230_v4 = vpop.eup %2883  ;;  %2909 = vpow2.f32 %v1884_v40  ;;  %v1607_v35 = vunpack.c.h.bf16 %v4197_v61  ;;  %v5274_v40 = vld [vmem:[#allocation67_spill] sm:$0xff]  ;;  %v1184_v57 = vsub.f32 %v5275_v54, %v4205_v36  ;;  %v1608_v46 = vunpack.c.h.bf16 %v4209_v23 }
 0x34c   : > { %v4237_v55 = vpop.eup %2885  ;;  %2911 = vpow2.f32 %v1298_v33  ;;  %v1183_v13 = vsub.f32 %v5274_v40, %v4205_v36  ;;  %v1748_v6 = vadd.f32 %v1747_v10, %v1605_v14  ;;  %v5276_v33 = vld [vmem:[#allocation68_spill] sm:$0xff]  ;;  %v5277_v40 = vld [vmem:[#allocation69_spill] sm:$0xff]  ;;  %v5278_v10 = vld [vmem:[#allocation71_spill] sm:$0xff]  ;;  %v1609_v14 = vunpack.c.h.bf16 %v4215_v41 }
 0x34d   : > { %v4242_v22 = vpop.eup %2887  ;;  %2913 = vpow2.f32 %v1300_v32  ;;  %v1185_v60 = vsub.f32 %v5276_v33, %v4205_v36  ;;  %v1751_v0 = vadd.f32 %v1607_v35, %v1606_v47  ;;  %v1882_v32 = vmul.f32 1.442695, %v1838_v49 }
 0x34e   : > { %v4248_v18 = vpop.eup %2889  ;;  %2915 = vpow2.f32 %v1302_v12  ;;  %1749 = vadd.xlane.f32.xlu0 %v1748_v6  ;;  %v1186_v25 = vsub.f32 %v5277_v40, %v1054_v52  ;;  %v1187_v12 = vsub.f32 %v5278_v10, %v1054_v52  ;;  %v1402_v47 = vmul.f32 1.442695, %v1182_v17  ;;  %v1059_v15 = vpop.xlane.xlu1 %1058 }
 0x34f   : > { %5273 = vst [vmem:[#allocation60_spill] sm:$0xff] %v4248_v18  ;;  %v4254_v1 = vpop.eup %2891  ;;  %2917 = vpow2.f32 %v1304_v38  ;;  %v1849_v18 = vsub.f32 0.0, %v4205_v36  ;;  %v1752_v33 = vadd.f32 %v1751_v0, %v1608_v46  ;;  %v1404_v35 = vmul.f32 1.442695, %v1183_v13  ;;  %v5279_v38 = vld [vmem:[#allocation70_spill] sm:$0xff] }
 0x350   : > { %v4259_v61 = vpop.eup %2893  ;;  %2919 = vpow2.f32 %v4176_v39  ;;  %v1188_v49 = vsub.f32 %v5279_v38, %v1054_v52  ;;  %v1406_v36 = vmul.f32 1.442695, %v1184_v57  ;;  %v1408_v6 = vmul.f32 1.442695, %v1185_v60 }
 0x351   : > { %v4263_v54 = vpop.eup %2895  ;;  %2921 = vpow2.f32 %v4181_v51  ;;  %v1753_v40 = vadd.f32 %v1752_v33, %v1609_v14  ;;  %v1904_v10 = vmul.f32 1.442695, %v1849_v18  ;;  %v1189_v0 = vsub.f32 %v3804_v3, %v1054_v52  ;;  %v5282_v18 = vld [vmem:[#allocation72_spill] sm:$0xff] }
 0x352   : > { %v4270_v23 = vpop.eup %2897  ;;  %2923 = vpow2.f32 %v4183_v50  ;;  %v1850_v51 = vsub.f32 0.0, %v1054_v52  ;;  %v1410_v17 = vmul.f32 1.442695, %v1186_v25  ;;  %v4279_v13 = vmul.f32 1.442695, %v1187_v12  ;;  %v5283_v52 = vld [vmem:[#allocation74_spill] sm:$0xff] }
 0x353   : > { %v4273_v39 = vpop.eup %2899  ;;  %2925 = vpow2.f32 %v4191_v28  ;;  %1754 = vadd.xlane.f32.xlu0 %v1753_v40  ;;  %v4283_v50 = vpack.c.bf16 %v4160_v29, %v4144_v2  ;;  %v4288_v28 = vmul.f32 1.442695, %v1188_v49  ;;  %v1190_v3 = vsub.f32 %v5282_v18, %v1059_v15  ;;  %v5284_v25 = vld [vmem:[#allocation73_spill] sm:$0xff] }
 0x354   : > { %5280 = vst [vmem:[#allocation59_spill] sm:$0xff] %v4273_v39  ;;  %v4277_v46 = vpop.eup %2901  ;;  %2927 = vpow2.f32 %v1400_v26  ;;  %v1191_v60 = vsub.f32 %v5283_v52, %v1059_v15  ;;  %v1192_v26 = vsub.f32 %v5284_v25, %v1059_v15  ;;  %v4298_v2 = vpack.c.bf16 %v4163_v62, %v4146_v24  ;;  %v4314_v62 = vpop.xlane.xlu0 %1063  ;;  %v5290_v25 = vld [vmem:[#allocation77_spill] sm:$0xff] }
 0x355   : > { %5281 = vst [vmem:[#allocation30_spill] sm:$0xff] %v4283_v50  ;;  %v4285_v57 = vpop.eup %2903  ;;  %2929 = vpow2.f32 %v4221_v30  ;;  %v4302_v29 = vpack.c.bf16 %v4167_v56, %v4149_v31  ;;  %v1416_v12 = vmul.f32 1.442695, %v1189_v0  ;;  %v4307_v33 = vmul.f32 1.442695, %v1850_v51 }
 0x356   : > { %v4292_v14 = vpop.eup %2905  ;;  %2931 = vpow2.f32 %v4227_v8  ;;  %5285 = vst [vmem:[#allocation31_spill] sm:$0xff] %v4298_v2  ;;  %v1610_v38 = vunpack.c.l.bf16 %v4283_v50  ;;  %v1193_v24 = vsub.f32 %v3817_v53, %v1059_v15  ;;  %v4318_v31 = vpack.c.bf16 %v4170_v11, %v4152_v20  ;;  %v5289_v20 = vld [vmem:[#allocation75_spill] sm:$0xff] }
 0x357   : > { %5286 = vst [vmem:[#allocation61_spill] sm:$0xff] %v4302_v29  ;;  %v4304_v30 = vpop.eup %2907  ;;  %2933 = vpow2.f32 %v4232_v16  ;;  %v1611_v56 = vunpack.c.l.bf16 %v4298_v2  ;;  %v1418_v49 = vmul.f32 1.442695, %v1190_v3  ;;  %v1420_v40 = vmul.f32 1.442695, %v1191_v60 }
 0x358   : > { %v4310_v8 = vpop.eup %2909  ;;  %2935 = vpow2.f32 %v4234_v58  ;;  %5288 = vst [vmem:[#allocation35_spill] sm:$0xff] %v4318_v31  ;;  %v1851_v0 = vsub.f32 0.0, %v1059_v15  ;;  %v1422_v58 = vmul.f32 1.442695, %v1192_v26  ;;  %v1612_v53 = vunpack.c.l.bf16 %v4302_v29 }
 0x359   : > { %5287 = vst [vmem:[#allocation62_spill] sm:$0xff] %v4310_v8  ;;  %v4321_v16 = vpop.eup %2911  ;;  %2937 = vpow2.f32 %v4244_v45  ;;  %v1756_v18 = vadd.f32 %v1611_v56, %v1610_v38  ;;  %v1194_v11 = vsub.f32 %v5289_v20, %v4314_v62  ;;  %v1195_v41 = vsub.f32 %v5290_v25, %v4314_v62  ;;  %v5292_v56 = vld [vmem:[#allocation76_spill] sm:$0xff]  ;;  %v4346_v8 = vpop.xlane.xlu1 %1068 }
 0x35a   : > { %v4324_v51 = vpop.eup %2913  ;;  %2939 = vpow2.f32 %v1882_v32  ;;  %v1614_v45 = vunpack.c.h.bf16 %v4283_v50  ;;  %v1613_v15 = vunpack.c.l.bf16 %v4318_v31  ;;  %v1615_v60 = vunpack.c.h.bf16 %v4298_v2 }
 0x35b   : > { %v4327_v52 = vpop.eup %2915  ;;  %2941 = vpow2.f32 %v1402_v47  ;;  %v1757_v32 = vadd.f32 %v1756_v18, %v1612_v53  ;;  %v1424_v47 = vmul.f32 1.442695, %v1193_v24  ;;  %v4340_v38 = vmul.f32 1.442695, %v1851_v0 }
 0x35c   : > { %v4334_v3 = vpop.eup %2917  ;;  %2943 = vpow2.f32 %v1404_v35  ;;  %v1196_v20 = vsub.f32 %v5292_v56, %v4314_v62  ;;  %v1616_v35 = vunpack.c.h.bf16 %v4302_v29  ;;  %v1761_v53 = vadd.f32 %v1615_v60, %v1614_v45  ;;  %v5295_v60 = vld [vmem:[#allocation81_spill] sm:$0xff]  ;;  %v5304_v29 = vld [vmem:[#allocation83_spill] sm:$0xff] }
 0x35d   : > { %v4338_v26 = vpop.eup %2919  ;;  %2945 = vpow2.f32 %v1406_v36  ;;  %v1758_v50 = vadd.f32 %v1757_v32, %v1613_v15  ;;  %v5293_v36 = vld [vmem:[#allocation78_spill] sm:$0xff]  ;;  %v1426_v0 = vmul.f32 1.442695, %v1194_v11  ;;  %v1428_v56 = vmul.f32 1.442695, %v1195_v41  ;;  %v5298_v41 = vld [vmem:[#allocation80_spill] sm:$0xff] }
 0x35e   : > { %5291 = vst [vmem:[#allocation36_spill] sm:$0xff] %v4338_v26  ;;  %v4344_v25 = vpop.eup %2921  ;;  %2947 = vpow2.f32 %v1408_v6  ;;  %v1197_v24 = vsub.f32 %v5293_v36, %v4314_v62  ;;  %v1617_v6 = vunpack.c.h.bf16 %v4318_v31  ;;  %v1762_v15 = vadd.f32 %v1761_v53, %v1616_v35 }
 0x35f   : > { %v4349_v18 = vpop.eup %2923  ;;  %2949 = vpow2.f32 %v1904_v10  ;;  %1759 = vadd.xlane.f32.xlu0 %v1758_v50  ;;  %v5294_v10 = vld [vmem:[#allocation79_spill] sm:$0xff]  ;;  %v1199_v11 = vsub.f32 %v5295_v60, %v4346_v8  ;;  %v4366_v36 = vpack.c.bf16 %v4254_v1, %v4179_v7  ;;  %v1200_v50 = vsub.f32 %v5298_v41, %v4346_v8 }
 0x360   : > { %v4354_v26 = vpop.eup %2925  ;;  %2951 = vpow2.f32 %v1410_v17  ;;  %v1198_v45 = vsub.f32 %v5294_v10, %v4346_v8  ;;  %v1763_v35 = vadd.f32 %v1762_v15, %v1617_v6  ;;  %v5300_v10 = vld [vmem:[#allocation82_spill] sm:$0xff]  ;;  %v4383_v7 = vpack.c.bf16 %v4263_v54, %v4199_v34  ;;  %v4388_v15 = vpop.xlane.xlu0 %1073 }
 0x361   : > { %v4357_v32 = vpop.eup %2927  ;;  %2953 = vpow2.f32 %v4279_v13  ;;  %5296 = vst [vmem:[#allocation27_spill] sm:$0xff] %v4366_v36  ;;  %v4375_v13 = vpack.c.bf16 %v4259_v61, %v4189_v27  ;;  %v1201_v60 = vsub.f32 %v5300_v10, %v4346_v8  ;;  %v1618_v1 = vunpack.c.l.bf16 %v4366_v36 }
 0x362   : > { %v4368_v17 = vpop.eup %2929  ;;  %2955 = vpow2.f32 %v4288_v28  ;;  %5301 = vst [vmem:[#allocation63_spill] sm:$0xff] %v4383_v7  ;;  %v1430_v6 = vmul.f32 1.442695, %v1196_v20  ;;  %v4392_v27 = vpack.c.bf16 %v4270_v23, %v4211_v59  ;;  %v1432_v34 = vmul.f32 1.442695, %v1197_v24 }
 0x363   : > { %5297 = vst [vmem:[#allocation29_spill] sm:$0xff] %v4368_v17  ;;  %5299 = vst [vmem:[#allocation28_spill] sm:$0xff] %v4375_v13  ;;  %v4377_v53 = vpop.eup %2931  ;;  %2957 = vpow2.f32 %v1416_v12  ;;  %1764 = vadd.xlane.f32.xlu0 %v1763_v35  ;;  %v1619_v61 = vunpack.c.l.bf16 %v4375_v13  ;;  %v1434_v54 = vmul.f32 1.442695, %v1198_v45  ;;  %v1436_v41 = vmul.f32 1.442695, %v1199_v11 }
 0x364   : > { %v4386_v28 = vpop.eup %2933  ;;  %2959 = vpow2.f32 %v1418_v49  ;;  %5302 = vst [vmem:[#allocation64_spill] sm:$0xff] %v4392_v27  ;;  %v1620_v20 = vunpack.c.l.bf16 %v4383_v7  ;;  %v1438_v23 = vmul.f32 1.442695, %v1200_v50  ;;  %v1440_v59 = vmul.f32 1.442695, %v1201_v60  ;;  %v4415_v60 = vpop.xlane.xlu1 %1078 }
 0x365   : > { %v4395_v12 = vpop.eup %2935  ;;  %2961 = vpow2.f32 %v1420_v40  ;;  %v1766_v35 = vadd.f32 %v1619_v61, %v1618_v1  ;;  %v1202_v31 = vsub.f32 %v5304_v29, %v4388_v15  ;;  %v1621_v24 = vunpack.c.l.bf16 %v4392_v27  ;;  %v5305_v1 = vld [vmem:[#allocation85_spill] sm:$0xff] }
 0x366   : > { %v4397_v10 = vpop.eup %2937  ;;  %2963 = vpow2.f32 %v1422_v58  ;;  %v1622_v58 = vunpack.c.h.bf16 %v4366_v36  ;;  %v1203_v61 = vsub.f32 %v5305_v1, %v4388_v15  ;;  %v1623_v29 = vunpack.c.h.bf16 %v4375_v13 }
 0x367   : > { %v4401_v2 = vpop.eup %2939  ;;  %2965 = vpow2.f32 %v1424_v47  ;;  %v1767_v45 = vadd.f32 %v1766_v35, %v1620_v20  ;;  %v5306_v47 = vld [vmem:[#allocation84_spill] sm:$0xff]  ;;  %v1624_v1 = vunpack.c.h.bf16 %v4383_v7  ;;  %v4431_v17 = vpack.c.bf16 %v4230_v4, %v4324_v51 }
 0x368   : > { %5303 = vst [vmem:[#allocation32_spill] sm:$0xff] %v4401_v2  ;;  %v4405_v40 = vpop.eup %2941  ;;  %2967 = vpow2.f32 %v1426_v0  ;;  %v1204_v50 = vsub.f32 %v5306_v47, %v4388_v15  ;;  %v5307_v0 = vld [vmem:[#allocation86_spill] sm:$0xff]  ;;  %v1771_v47 = vadd.f32 %v1623_v29, %v1622_v58  ;;  %v1625_v58 = vunpack.c.h.bf16 %v4392_v27  ;;  %v5314_v29 = vld [vmem:[#allocation89_spill] sm:$0xff]  ;;  %v4457_v27 = vpop.xlane.xlu0 %1083 }
 0x369   : > { %v4409_v11 = vpop.eup %2943  ;;  %2969 = vpow2.f32 %v1428_v56  ;;  %v1205_v20 = vsub.f32 %v5307_v0, %v4388_v15  ;;  %v1768_v35 = vadd.f32 %v1767_v45, %v1621_v24  ;;  %v4424_v56 = vpack.c.bf16 %v4225_v37, %v4321_v16  ;;  %5309 = vst [vmem:[#allocation33_spill] sm:$0xff] %v4431_v17  ;;  %v5312_v37 = vld [vmem:[#allocation87_spill] sm:$0xff]  ;;  %v4474_v2 = vpop.xlane.xlu1 %1088 }
 0x36a   : > { %v4418_v49 = vpop.eup %2945  ;;  %2971 = vpow2.f32 %v1430_v6  ;;  %v4435_v6 = vpack.c.bf16 %v4237_v55, %v4327_v52  ;;  %v1442_v24 = vmul.f32 1.442695, %v1202_v31  ;;  %v1206_v16 = vsub.f32 %v5312_v37, %v4415_v60  ;;  %5318 = vst [vmem:[#allocation68_spill] sm:$0xff] %v4474_v2 }
 0x36b   : > { %5308 = vst [vmem:[#allocation34_spill] sm:$0xff] %v4424_v56  ;;  %v4426_v36 = vpop.eup %2947  ;;  %2973 = vpow2.f32 %v1432_v34  ;;  %1769 = vadd.xlane.f32.xlu0 %v1768_v35  ;;  %v1578_v45 = vunpack.c.l.bf16 %v4424_v56  ;;  %v1772_v4 = vadd.f32 %v1771_v47, %v1624_v1  ;;  %v4447_v51 = vpack.c.bf16 %v4242_v22, %v4334_v3 }
 0x36c   : > { %5310 = vst [vmem:[#allocation65_spill] sm:$0xff] %v4435_v6  ;;  %v4437_v13 = vpop.eup %2949  ;;  %v1579_v55 = vunpack.c.l.bf16 %v4431_v17  ;;  %2975 = vpow2.f32 %v1434_v54  ;;  %v1444_v31 = vmul.f32 1.442695, %v1203_v61  ;;  %v1446_v34 = vmul.f32 1.442695, %v1204_v50  ;;  %v5315_v54 = vld [vmem:[#allocation88_spill] sm:$0xff] }
 0x36d   : > { %5311 = vst [vmem:[#allocation67_spill] sm:$0xff] %v4437_v13  ;;  %v4442_v0 = vpop.eup %2951  ;;  %5313 = vst [vmem:[#allocation66_spill] sm:$0xff] %v4447_v51  ;;  %v1207_v35 = vsub.f32 %v5314_v29, %v4415_v60  ;;  %2977 = vpow2.f32 %v1436_v41  ;;  %v1773_v7 = vadd.f32 %v1772_v4, %v1625_v58  ;;  %v1580_v1 = vunpack.c.l.bf16 %v4435_v6  ;;  %v5316_v50 = vld [vmem:[#allocation90_spill] sm:$0xff] }
 0x36e   : > { %v4450_v52 = vpop.eup %2953  ;;  %v1716_v47 = vadd.f32 %v1579_v55, %v1578_v45  ;;  %2979 = vpow2.f32 %v1438_v23  ;;  %v1448_v3 = vmul.f32 1.442695, %v1205_v20  ;;  %v1208_v61 = vsub.f32 %v5315_v54, %v4415_v60  ;;  %v5317_v23 = vld [vmem:[#allocation91_spill] sm:$0xff] }
 0x36f   : > { %v4454_v37 = vpop.eup %2955  ;;  %v1209_v13 = vsub.f32 %v5316_v50, %v4415_v60  ;;  %2981 = vpow2.f32 %v1440_v59  ;;  %v1450_v41 = vmul.f32 1.442695, %v1206_v16  ;;  %1774 = vadd.xlane.f32.xlu0 %v1773_v7  ;;  %v1581_v58 = vunpack.c.l.bf16 %v4447_v51  ;;  %v5319_v16 = vld [vmem:[#allocation93_spill] sm:$0xff] }
 0x370   : > { %v4459_v22 = vpop.eup %2957  ;;  %v1717_v45 = vadd.f32 %v1716_v47, %v1580_v1  ;;  %2983 = vpow2.f32 %v1442_v24  ;;  %v1210_v20 = vsub.f32 %v5317_v23, %v4457_v27  ;;  %v1582_v55 = vunpack.c.h.bf16 %v4424_v56 }
 0x371   : > { %v4465_v29 = vpop.eup %2959  ;;  %v1583_v54 = vunpack.c.h.bf16 %v4431_v17  ;;  %2985 = vpow2.f32 %v1444_v31  ;;  %v1452_v59 = vmul.f32 1.442695, %v1207_v35  ;;  %v1211_v1 = vsub.f32 %v5319_v16, %v4457_v27  ;;  %v5321_v35 = vld [vmem:[#allocation95_spill] sm:$0xff] }
 0x372   : > { %v4468_v4 = vpop.eup %2961  ;;  %v1718_v7 = vadd.f32 %v1717_v45, %v1581_v58  ;;  %2987 = vpow2.f32 %v1446_v34  ;;  %v1454_v24 = vmul.f32 1.442695, %v1208_v61  ;;  %v1584_v23 = vunpack.c.h.bf16 %v4435_v6  ;;  %v4491_v45 = vpop.xlane.xlu0 %1003 }
 0x373   : > { %v4476_v50 = vpop.eup %2963  ;;  %v1721_v39 = vadd.f32 %v1583_v54, %v1582_v55  ;;  %v5320_v19 = vsub.f32 0.0, %v4314_v62  ;;  %2989 = vpow2.f32 %v1448_v3  ;;  %v1456_v31 = vmul.f32 1.442695, %v1209_v13  ;;  %5322 = vst [vmem:[#allocation69_spill] sm:$0xff] %v4491_v45  ;;  %v5324_v3 = vld [vmem:[#allocation97_spill] sm:$0xff] }
 0x374   : > { %v4480_v47 = vpop.eup %2965  ;;  %1719 = vadd.xlane.f32.xlu1 %v1718_v7  ;;  %v1214_v58 = vsub.f32 %v5321_v35, %v4474_v2  ;;  %2991 = vpow2.f32 %v1450_v41  ;;  %v1458_v34 = vmul.f32 1.442695, %v1210_v20  ;;  %v1585_v61 = vunpack.c.h.bf16 %v4447_v51  ;;  %v5326_v20 = vld [vmem:[#allocation39_spill] sm:$0xff] }
 0x375   : > { %v4483_v44 = vpop.eup %2967  ;;  %v4487_v9 = vmul.f32 1.442695, %v5320_v19  ;;  %v1722_v55 = vadd.f32 %v1721_v39, %v1584_v23  ;;  %v5323_v19 = vsub.f32 0.0, %v4346_v8  ;;  %2993 = vpow2.f32 %v1452_v59  ;;  %v5327_v8 = vld [vmem:[#allocation92_spill] sm:$0xff]  ;;  %v5328_v59 = vld [vmem:[#allocation94_spill] sm:$0xff] }
 0x376   : > { %v4493_v16 = vpop.eup %2969  ;;  %v1460_v13 = vmul.f32 1.442695, %v1211_v1  ;;  %v1215_v7 = vsub.f32 %v5324_v3, %v4474_v2  ;;  %2995 = vpow2.f32 %v1454_v24  ;;  %v1146_v41 = vsub.f32 %v5325_v5, %v4491_v45  ;;  %v5329_v24 = vld [vmem:[#allocation38_spill] sm:$0xff]  ;;  %v5330_v5 = vld [vmem:[#allocation40_spill] sm:$0xff] }
 0x377   : > { %v4496_v54 = vpop.eup %2971  ;;  %v4500_v62 = vmul.f32 1.442695, %v5323_v19  ;;  %v1723_v35 = vadd.f32 %v1722_v55, %v1585_v61  ;;  %v1147_v21 = vsub.f32 %v5326_v20, %v4491_v45  ;;  %2997 = vpow2.f32 %v1456_v31  ;;  %v5331_v20 = vld [vmem:[#allocation96_spill] sm:$0xff] }
 0x378   : > { %v4508_v39 = vpop.eup %2973  ;;  %v1212_v23 = vsub.f32 %v5327_v8, %v4457_v27  ;;  %v1466_v19 = vmul.f32 1.442695, %v1214_v58  ;;  %2999 = vpow2.f32 %v1458_v34  ;;  %v1148_v61 = vsub.f32 %v5329_v24, %v4491_v45  ;;  %v5332_v58 = vld [vmem:[#allocation98_spill] sm:$0xff] }
 0x379   : > { %1724 = vadd.xlane.f32.xlu1 %v1723_v35  ;;  %v1149_v55 = vsub.f32 %v5330_v5, %v4491_v45  ;;  %v4520_v3 = vpack.c.bf16 %v4405_v40, %v4344_v25  ;;  %v4522_v31 = vpop.eup %2975  ;;  %3001 = vpow2.f32 %v1460_v13  ;;  %v1216_v8 = vsub.f32 %v5331_v20, %v4474_v2  ;;  %v5333_v20 = vld [vmem:[#allocation41_spill] sm:$0xff] }
 0x37a   : > { %v1217_v34 = vsub.f32 %v5332_v58, %v4474_v2  ;;  %v1468_v35 = vmul.f32 1.442695, %v1215_v7  ;;  %v4528_v1 = vpop.eup %2977  ;;  %v1330_v24 = vmul.f32 1.442695, %v1146_v41  ;;  %v1332_v48 = vmul.f32 1.442695, %v1147_v21 }
 0x37b   : > { %v4532_v5 = vpack.c.bf16 %v4409_v11, %v4349_v18  ;;  %v4536_v25 = vpack.c.bf16 %v4418_v49, %v4354_v26  ;;  %v4538_v40 = vpop.eup %2979  ;;  %v4542_v13 = vpack.c.bf16 %v4426_v36, %v4357_v32  ;;  %v1626_v7 = vunpack.c.l.bf16 %v4520_v3  ;;  %v4553_v18 = vpop.xlane.xlu1 %1008 }
 0x37c   : > { %v4547_v41 = vpack.c.bf16 %v4277_v46, %v4377_v53  ;;  %v4551_v21 = vpack.c.bf16 %v4285_v57, %v4386_v28  ;;  %v4555_v26 = vpop.eup %2981  ;;  %3003 = vpow2.f32 %v1466_v19  ;;  %v1334_v49 = vmul.f32 1.442695, %v1148_v61 }
 0x37d   : > { %v1336_v11 = vmul.f32 1.442695, %v1149_v55  ;;  %v1627_v32 = vunpack.c.l.bf16 %v4532_v5  ;;  %v4558_v36 = vpop.eup %2983  ;;  %3005 = vpow2.f32 %v1468_v35  ;;  %v4562_v46 = vpack.c.bf16 %v4292_v14, %v4395_v12  ;;  %v5334_v12 = vld [vmem:[#allocation43_spill] sm:$0xff] }
 0x37e   : > { %v4566_v57 = vpack.c.bf16 %v4304_v30, %v4397_v10  ;;  %v1586_v53 = vunpack.c.l.bf16 %v4547_v41  ;;  %v4569_v28 = vpop.eup %2985  ;;  %v1628_v19 = vunpack.c.l.bf16 %v4536_v25  ;;  %v1587_v55 = vunpack.c.l.bf16 %v4551_v21 }
 0x37f   : > { %v1776_v61 = vadd.f32 %v1627_v32, %v1626_v7  ;;  %v1150_v58 = vsub.f32 %v5333_v20, %v4553_v18  ;;  %v4575_v35 = vpop.eup %2987  ;;  %3007 = vpow2.f32 %v1330_v24  ;;  %v1629_v14 = vunpack.c.l.bf16 %v4542_v13  ;;  %v5337_v24 = vld [vmem:[#allocation44_spill] sm:$0xff] }
 0x380   : > { %v1588_v30 = vunpack.c.l.bf16 %v4562_v46  ;;  %v1151_v10 = vsub.f32 %v5334_v12, %v4553_v18  ;;  %v4581_v45 = vpop.eup %2989  ;;  %v1589_v7 = vunpack.c.l.bf16 %v4566_v57  ;;  %v1726_v32 = vadd.f32 %v1587_v55, %v1586_v53 }
 0x381   : > { %5335 = vst [vmem:[#allocation71_spill] sm:$0xff] %v4581_v45  ;;  %v1777_v42 = vadd.f32 %v1776_v61, %v1628_v19  ;;  %v1152_v43 = vsub.f32 %v5336_v63, %v4553_v18  ;;  %v4586_v20 = vpop.eup %2991  ;;  %3009 = vpow2.f32 %v1332_v48  ;;  %v1153_v6 = vsub.f32 %v5337_v24, %v4553_v18 }
 0x382   : > { %v1338_v56 = vmul.f32 1.442695, %v1150_v58  ;;  %v1340_v51 = vmul.f32 1.442695, %v1151_v10  ;;  %v4590_v2 = vpop.eup %2993  ;;  %3011 = vpow2.f32 %v1334_v49  ;;  %v1727_v17 = vadd.f32 %v1726_v32, %v1588_v30 }
 0x383   : > { %v1778_v12 = vadd.f32 %v1777_v42, %v1629_v14  ;;  %v1342_v19 = vmul.f32 1.442695, %v1152_v43  ;;  %v4592_v61 = vpop.eup %2995  ;;  %v1462_v53 = vmul.f32 1.442695, %v1212_v23  ;;  %3013 = vpow2.f32 %v1336_v11 }
 0x384   : > { %v1344_v55 = vmul.f32 1.442695, %v1153_v6  ;;  %v1630_v63 = vunpack.c.h.bf16 %v4520_v3  ;;  %v4595_v45 = vpop.eup %2997  ;;  %v5338_v48 = vsub.f32 %v5328_v59, %v4457_v27  ;;  %v1728_v10 = vadd.f32 %v1727_v17, %v1589_v7 }
 0x385   : > { %1779 = vadd.xlane.f32.xlu0 %v1778_v12  ;;  %3015 = vpow2.f32 %v1338_v56  ;;  %v1631_v42 = vunpack.c.h.bf16 %v4532_v5  ;;  %v4603_v43 = vpop.eup %2999  ;;  %v1470_v49 = vmul.f32 1.442695, %v1216_v8  ;;  %v1472_v23 = vmul.f32 1.442695, %v1217_v34 }
 0x386   : > { %v4600_v58 = vmul.f32 1.442695, %v5338_v48  ;;  %3017 = vpow2.f32 %v1340_v51  ;;  %v1590_v6 = vunpack.c.h.bf16 %v4547_v41  ;;  %v4606_v11 = vpop.eup %3001  ;;  %1729 = vadd.xlane.f32.xlu1 %v1728_v10  ;;  %v1632_v59 = vunpack.c.h.bf16 %v4536_v25 }
 0x387   : > { %3019 = vpow2.f32 %v1342_v19  ;;  %v1781_v14 = vadd.f32 %v1631_v42, %v1630_v63  ;;  %v1591_v30 = vunpack.c.h.bf16 %v4551_v21  ;;  %v1633_v17 = vunpack.c.h.bf16 %v4542_v13 }
 0x388   : > { %3021 = vpow2.f32 %v1344_v55  ;;  %v4613_v56 = vpack.c.bf16 %v4465_v29, %v4442_v0  ;;  %v4617_v51 = vpack.c.bf16 %v4468_v4, %v4450_v52  ;;  %v1592_v34 = vunpack.c.h.bf16 %v4562_v46 }
 0x389   : > { %v1782_v8 = vadd.f32 %v1781_v14, %v1632_v59  ;;  %v1731_v7 = vadd.f32 %v1591_v30, %v1590_v6  ;;  %v4622_v32 = vpack.c.bf16 %v4476_v50, %v4454_v37  ;;  %v4624_v24 = vpop.eup %3003  ;;  %v4628_v12 = vpack.c.bf16 %v4480_v47, %v4459_v22 }
 0x38a   : > { %v1634_v0 = vunpack.c.l.bf16 %v4613_v56  ;;  %v1635_v29 = vunpack.c.l.bf16 %v4617_v51  ;;  %v1638_v52 = vunpack.c.h.bf16 %v4613_v56  ;;  %v4633_v4 = vpop.eup %3005  ;;  %v1593_v55 = vunpack.c.h.bf16 %v4566_v57 }
 0x38b   : > { %v1783_v19 = vadd.f32 %v1782_v8, %v1633_v17  ;;  %v1732_v63 = vadd.f32 %v1731_v7, %v1592_v34  ;;  %v1639_v37 = vunpack.c.h.bf16 %v4617_v51  ;;  %3023 = vpow2.f32 %v1470_v49 }
 0x38c   : > { %v1636_v50 = vunpack.c.l.bf16 %v4622_v32  ;;  %v1786_v48 = vadd.f32 %v1635_v29, %v1634_v0  ;;  %v1640_v22 = vunpack.c.h.bf16 %v4622_v32  ;;  %v3008_v47 = vpop.eup %3007  ;;  %v4641_v6 = vpack.c.bf16 %v4522_v31, %v4483_v44 }
 0x38d   : > { %1784 = vadd.xlane.f32.xlu0 %v1783_v19  ;;  %v1733_v10 = vadd.f32 %v1732_v63, %v1593_v55  ;;  %v1791_v42 = vadd.f32 %v1639_v37, %v1638_v52  ;;  %v4645_v59 = vpack.c.bf16 %v4528_v1, %v4493_v16  ;;  %3025 = vpow2.f32 %v1462_v53 }
 0x38e   : > { %v1637_v49 = vunpack.c.l.bf16 %v4628_v12  ;;  %v1787_v14 = vadd.f32 %v1786_v48, %v1636_v50  ;;  %v4650_v30 = vpack.c.bf16 %v4538_v40, %v4496_v54  ;;  %v3010_v17 = vpop.eup %3009  ;;  %v1642_v34 = vunpack.c.l.bf16 %v4641_v6 }
 0x38f   : > { %1734 = vadd.xlane.f32.xlu1 %v1733_v10  ;;  %v1792_v8 = vadd.f32 %v1791_v42, %v1640_v22  ;;  %v1643_v44 = vunpack.c.l.bf16 %v4645_v59  ;;  %v1646_v31 = vunpack.c.h.bf16 %v4641_v6  ;;  %v3012_v7 = vpop.eup %3011  ;;  %3027 = vpow2.f32 %v4307_v33 }
 0x390   : > { %v1788_v16 = vadd.f32 %v1787_v14, %v1637_v49  ;;  %v1647_v1 = vunpack.c.h.bf16 %v4645_v59  ;;  %v4659_v53 = vpack.c.bf16 %v4586_v20, %v4558_v36  ;;  %v3014_v54 = vpop.eup %3013  ;;  %3029 = vpow2.f32 %v4340_v38 }
 0x391   : > { %v1641_v40 = vunpack.c.h.bf16 %v4628_v12  ;;  %v4665_v0 = vpack.c.bf16 %v4555_v26, %v4508_v39  ;;  %v1796_v29 = vadd.f32 %v1643_v44, %v1642_v34  ;;  %v1854_v33 = vsub.f32 0.0, %v4388_v15 }
 0x392   : > { %v3016_v52 = vpop.eup %3015  ;;  %3031 = vpow2.f32 %v1472_v23  ;;  %1789 = vadd.xlane.f32.xlu0 %v1788_v16  ;;  %v1644_v19 = vunpack.c.l.bf16 %v4650_v30  ;;  %v4671_v36 = vpack.c.bf16 %v4590_v2, %v4569_v28  ;;  %v1855_v38 = vsub.f32 0.0, %v4415_v60 }
 0x393   : > { %v3018_v20 = vpop.eup %3017  ;;  %3033 = vpow2.f32 %v4600_v58  ;;  %v1793_v55 = vadd.f32 %v1792_v8, %v1641_v40  ;;  %v1801_v39 = vadd.f32 %v1647_v1, %v1646_v31  ;;  %v1650_v37 = vunpack.c.l.bf16 %v4659_v53 }
 0x394   : > { %v3020_v26 = vpop.eup %3019  ;;  %v1797_v63 = vadd.f32 %v1796_v29, %v1644_v19  ;;  %v1651_v15 = vunpack.c.l.bf16 %v4671_v36  ;;  %v4677_v23 = vpack.c.bf16 %v3016_v52, %v3008_v47  ;;  %v1645_v48 = vunpack.c.l.bf16 %v4665_v0 }
 0x395   : > { %v3022_v50 = vpop.eup %3021  ;;  %v1648_v2 = vunpack.c.h.bf16 %v4650_v30  ;;  %v1503_v28 = vpack.c.bf16 %v3018_v20, %v3010_v17  ;;  %v4681_v22 = vpack.c.bf16 %v3020_v26, %v3012_v7  ;;  %v4685_v60 = vpack.c.bf16 %v4592_v61, %v4575_v35  ;;  %v5341_v26 = vld [vmem:[#allocation68_spill] sm:$0xff] }
 0x396   : > { %1794 = vadd.xlane.f32.xlu0 %v1793_v55  ;;  %v4687_v58 = vpack.c.bf16 %v3022_v50, %v3014_v54  ;;  %v1654_v10 = vunpack.c.h.bf16 %v4659_v53  ;;  %v1655_v47 = vunpack.c.h.bf16 %v4671_v36  ;;  %3035 = vpow2.f32 %v4487_v9 }
 0x397   : > { %2206 = vmatprep.subr.bf16.mxu0 %v1503_v28  ;;  %v4694_v42 = vpack.c.bf16 %v4624_v24, %v4603_v43  ;;  %v4698_v49 = vpack.c.bf16 %v4633_v4, %v4606_v11  ;;  %v1798_v14 = vadd.f32 %v1797_v63, %v1645_v48  ;;  %v1802_v35 = vadd.f32 %v1801_v39, %v1648_v2  ;;  %v5339_v24 = vld [vmem:[#allocation71_spill] sm:$0xff] }
 0x398   : > { %v1806_v61 = vadd.f32 %v1651_v15, %v1650_v37  ;;  %2259 = vmatprep.subr.bf16.mxu1 %v4687_v58  ;;  %2207 = vmatpush1.bf16.msra.mxu0 %v4677_v23  ;;  %v1594_v17 = vunpack.c.l.bf16 %v4677_v23  ;;  %v3024_v8 = vpop.eup %3023  ;;  %3037 = vpow2.f32 %v4500_v62  ;;  %v1914_v9 = vmul.f32 1.442695, %v1854_v33  ;;  %v5342_v15 = vld [vmem:[#allocation66_spill] sm:$0xff] }
 0x399   : > { %v1916_v34 = vmul.f32 1.442695, %v1855_v38  ;;  %2260 = vmatpush1.bf16.msra.mxu1 %v4681_v22  ;;  %2208 = vmatprep.subr.bf16.mxu0 %v4551_v21  ;;  %v1595_v43 = vunpack.c.l.bf16 %v1503_v28  ;;  %v1649_v11 = vunpack.c.h.bf16 %v4665_v0  ;;  %v4709_v4 = vpack.c.bf16 %v4595_v45, %v5339_v24 }
 0x39a   : > { %1799 = vadd.xlane.f32.xlu0 %v1798_v14  ;;  %v1652_v44 = vunpack.c.l.bf16 %v4685_v60  ;;  %2261 = vmatprep.subr.bf16.mxu1 %v4566_v57  ;;  %v1811_v31 = vadd.f32 %v1655_v47, %v1654_v10  ;;  %v3026_v62 = vpop.eup %3025  ;;  %v1658_v7 = vunpack.c.l.bf16 %v4694_v42  ;;  %v1659_v16 = vunpack.c.l.bf16 %v4698_v49  ;;  %v5340_v57 = vld [vmem:[#allocation33_spill] sm:$0xff]  ;;  %v5343_v47 = vld [vmem:[#allocation34_spill] sm:$0xff] }
 0x39b   : > { %v1596_v21 = vunpack.c.l.bf16 %v4681_v22  ;;  %v1736_v1 = vadd.f32 %v1595_v43, %v1594_v17  ;;  %v1803_v54 = vadd.f32 %v1802_v35, %v1649_v11  ;;  %v1656_v29 = vunpack.c.h.bf16 %v4685_v60  ;;  %v5344_v17 = vld [vmem:[#allocation65_spill] sm:$0xff]  ;;  %v5345_v11 = vld [vmem:[#allocation103_spill] sm:$0xff] }
 0x39c   : > { %v1807_v40 = vadd.f32 %v1806_v61, %v1652_v44  ;;  %2209 = vmatpush1.bf16.msra.mxu0 %v4547_v41  ;;  %v4718_v45 = vpack.c.bf16 %v3024_v8, %v3026_v62  ;;  %v4720_v52 = vpop.eup %3027  ;;  %v1597_v33 = vunpack.c.l.bf16 %v4687_v58  ;;  %v1598_v20 = vunpack.c.h.bf16 %v4677_v23  ;;  %v5346_v62 = vld [vmem:[#allocation45_spill] sm:$0xff] }
 0x39d   : > { %2262 = vmatpush1.bf16.msra.mxu1 %v4562_v46  ;;  %2210 = vmatprep.subr.bf16.mxu0 %v5340_v57  ;;  %v1737_v19 = vadd.f32 %v1736_v1, %v1596_v21  ;;  %v1599_v38 = vunpack.c.h.bf16 %v1503_v28  ;;  %v4726_v55 = vpop.eup %3029  ;;  %v1856_v39 = vsub.f32 0.0, %v4457_v27  ;;  %v1857_v41 = vsub.f32 0.0, %v5341_v26  ;;  %v5347_v1 = vld [vmem:[#allocation102_spill] sm:$0xff] }
 0x39e   : > { %1804 = vadd.xlane.f32.xlu0 %v1803_v54  ;;  %v1653_v63 = vunpack.c.l.bf16 %v4709_v4  ;;  %v1812_v37 = vadd.f32 %v1811_v31, %v1656_v29  ;;  %2263 = vmatprep.subr.bf16.mxu1 %v5342_v15  ;;  %v1816_v50 = vadd.f32 %v1659_v16, %v1658_v7  ;;  %v1600_v2 = vunpack.c.h.bf16 %v4681_v22  ;;  %v5348_v54 = vld [vmem:[#allocation47_spill] sm:$0xff]  ;;  %v5351_v29 = vld [vmem:[#allocation49_spill] sm:$0xff]  ;;  %v5356_v26 = vld [vmem:[#allocation54_spill] sm:$0xff] }
 0x39f   : > { %v3032_v46 = vpop.eup %3031  ;;  %v1738_v48 = vadd.f32 %v1737_v19, %v1597_v33  ;;  %v1741_v10 = vadd.f32 %v1599_v38, %v1598_v20  ;;  %3039 = vpow2.f32 %v1916_v34  ;;  %v1662_v27 = vunpack.c.h.bf16 %v4694_v42  ;;  %v5352_v33 = vld [vmem:[#allocation51_spill] sm:$0xff]  ;;  %v5353_v19 = vld [vmem:[#allocation50_spill] sm:$0xff]  ;;  %v5354_v38 = vld [vmem:[#allocation104_spill] sm:$0xff] }
 0x3a0   : > { %v3034_v23 = vpop.eup %3033  ;;  %v1808_v28 = vadd.f32 %v1807_v40, %v1653_v63  ;;  %2211 = vmatpush1.bf16.msra.mxu0 %v5343_v47  ;;  %v1663_v14 = vunpack.c.h.bf16 %v4698_v49  ;;  %v1657_v35 = vunpack.c.h.bf16 %v4709_v4  ;;  %v1660_v61 = vunpack.c.l.bf16 %v4718_v45  ;;  %v5349_v40 = vld [vmem:[#allocation46_spill] sm:$0xff]  ;;  %v5357_v63 = vld [vmem:[#allocation57_spill] sm:$0xff]  ;;  %v5361_v47 = vld [vmem:[#allocation23_spill] sm:$0xff] }
 0x3a1   : > { %1739 = vadd.xlane.f32.xlu1 %v1738_v48  ;;  %2264 = vmatpush1.bf16.msra.mxu1 %v5344_v17  ;;  %v1601_v8 = vunpack.c.h.bf16 %v4687_v58  ;;  %v1742_v22 = vadd.f32 %v1741_v10, %v1600_v2  ;;  %3041 = vpow2.f32 %v1914_v9  ;;  %v1920_v43 = vmul.f32 1.442695, %v1857_v41  ;;  %v5350_v9 = vld [vmem:[#allocation48_spill] sm:$0xff]  ;;  %v5359_v2 = vld [vmem:[#allocation25_spill] sm:$0xff] }
 0x3a2   : > { %1809 = vadd.xlane.f32.xlu0 %v1808_v28  ;;  %v1537_v34 = vpack.c.bf16 %v3032_v46, %v3034_v23  ;;  %2212 = vmatprep.subr.bf16.mxu0 %v5345_v11  ;;  %v1918_v24 = vmul.f32 1.442695, %v1856_v39  ;;  %v1813_v44 = vadd.f32 %v1812_v37, %v1657_v35  ;;  %v1817_v31 = vadd.f32 %v1816_v50, %v1660_v61  ;;  %v5355_v39 = vld [vmem:[#allocation52_spill] sm:$0xff]  ;;  %v5358_v37 = vld [vmem:[#allocation59_spill] sm:$0xff]  ;;  %v5364_v61 = vld [vmem:[#allocation22_spill] sm:$0xff] }
 0x3a3   : > { %2265 = vmatprep.subr.bf16.mxu1 %v5346_v62  ;;  %v1743_v7 = vadd.f32 %v1742_v22, %v1601_v8  ;;  %v3036_v16 = vpop.eup %3035  ;;  %v1821_v21 = vadd.f32 %v1663_v14, %v1662_v27  ;;  %v4745_v58 = vpack.c.bf16 %v5349_v40, %v5348_v54  ;;  %v4749_v57 = vpack.c.bf16 %v5351_v29, %v5350_v9  ;;  %v5360_v10 = vld [vmem:[#allocation100_spill] sm:$0xff]  ;;  %v5362_v27 = vld [vmem:[#allocation99_spill] sm:$0xff]  ;;  %v5363_v14 = vld [vmem:[#allocation21_spill] sm:$0xff] }
 0x3a4   : > { %2213 = vmatpush1.bf16.msra.mxu0 %v5347_v1  ;;  %v4753_v20 = vpack.c.bf16 %v5353_v19, %v5352_v33  ;;  %v4758_v41 = vpack.c.bf16 %v5356_v26, %v5355_v39  ;;  %v4762_v15 = vpack.c.bf16 %v5358_v37, %v5357_v63  ;;  %3043 = vpow2.f32 %v1920_v43  ;;  %v5365_v17 = vld [vmem:[#allocation36_spill] sm:$0xff]  ;;  %v5368_v11 = vld [vmem:[#allocation62_spill] sm:$0xff]  ;;  %v5371_v1 = vld [vmem:[#allocation17_spill] sm:$0xff] }
 0x3a5   : > { %1744 = vadd.xlane.f32.xlu1 %v1743_v7  ;;  %2266 = vmatpush1.bf16.msra.mxu1 %v5354_v38  ;;  %v3038_v46 = vpop.eup %3037  ;;  %v1661_v50 = vunpack.c.l.bf16 %v1537_v34  ;;  %v1664_v48 = vunpack.c.h.bf16 %v4718_v45  ;;  %3045 = vpow2.f32 %v1918_v24  ;;  %v1665_v35 = vunpack.c.h.bf16 %v1537_v34  ;;  %v5366_v8 = vld [vmem:[#allocation60_spill] sm:$0xff]  ;;  %v1670_v7 = vpop.xlane.xlu1 %1669  ;;  %v5372_v54 = vld [vmem:[#allocation29_spill] sm:$0xff]  ;;  %v5373_v40 = vld [vmem:[#allocation67_spill] sm:$0xff] }
 0x3a6   : > { %1814 = vadd.xlane.f32.xlu0 %v1813_v44  ;;  %2214 = vmatprep.subr.bf16.mxu0 %v5359_v2  ;;  %v4773_v22 = vpack.c.bf16 %v5366_v8, %v5365_v17  ;;  %v5367_v43 = vld [vmem:[#allocation32_spill] sm:$0xff]  ;;  %v4784_v9 = vpack.c.bf16 %v5373_v40, %v5372_v54  ;;  %v5374_v29 = vld [vmem:[#allocation18_spill] sm:$0xff]  ;;  %v5375_v19 = vld [vmem:[#allocation15_spill] sm:$0xff]  ;;  %v4790_v38 = vpack.c.bf16 %v4726_v55, %v4720_v52  ;;  %v1954_v54 = vunpack.c.l.bf16 %v4753_v20 }
 0x3a7   : > { %2267 = vmatprep.subr.bf16.mxu1 %v5360_v10  ;;  %v1818_v23 = vadd.f32 %v1817_v31, %v1661_v50  ;;  %v1822_v28 = vadd.f32 %v1821_v21, %v1664_v48  ;;  %v4777_v44 = vpack.c.bf16 %v5368_v11, %v5367_v43  ;;  %v5369_v31 = vld [vmem:[#allocation19_spill] sm:$0xff]  ;;  %v5370_v21 = vld [vmem:[#allocation20_spill] sm:$0xff]  ;;  %v4792_v39 = vpack.c.bf16 %v3038_v46, %v3036_v16  ;;  %v5377_v63 = vld [vmem:[#allocation13_spill] sm:$0xff] }
 0x3a8   : > { %2215 = vmatpush1.bf16.msra.mxu0 %v5361_v47  ;;  %v5376_v26 = vld [vmem:[#allocation16_spill] sm:$0xff]  ;;  %v5378_v50 = vld [vmem:[#allocation14_spill] sm:$0xff]  ;;  %v5379_v10 = vld [vmem:[#allocation11_spill] sm:$0xff] }
 0x3a9   : > { %2268 = vmatpush1.bf16.msra.mxu1 %v5362_v27  ;;  %2216 = vmatprep.subr.bf16.mxu0 %v5363_v14  ;;  %v1823_v24 = vadd.f32 %v1822_v28, %v1665_v35  ;;  %v1675_v2 = vpop.xlane.xlu1 %1674  ;;  %v5380_v28 = vld [vmem:[#allocation12_spill] sm:$0xff]  ;;  %v5385_v27 = vld [vmem:[#allocation101_spill] sm:$0xff]  ;;  %v5386_v35 = vld [vmem:[#allocation27_spill] sm:$0xff] }
 0x3aa   : > { %1819 = vadd.xlane.f32.xlu0 %v1818_v23  ;;  %2269 = vmatprep.subr.bf16.mxu1 %v5364_v61  ;;  %v5381_v16 = vld [vmem:[#allocation24_spill] sm:$0xff]  ;;  %v1942_v14 = vunpack.c.l.bf16 %v5385_v27  ;;  %v5388_v61 = vld [vmem:[#allocation31_spill] sm:$0xff]  ;;  %v1943_v43 = vunpack.c.h.bf16 %v5385_v27  ;;  %v5390_v11 = vld [vmem:[#allocation30_spill] sm:$0xff] }
 0x3ab   : > { %v1938_v46 = vunpack.c.l.bf16 %v5381_v16  ;;  %v5384_v47 = vld [vmem:[#allocation64_spill] sm:$0xff]  ;;  %v5389_v17 = vld [vmem:[#allocation35_spill] sm:$0xff] }
 0x3ac   : > { %2217 = vmatpush1.bf16.msra.mxu0 %v5369_v31  ;;  %v3040_v62 = vpop.eup %3039  ;;  %v1974_v8 = vmul.f32 112.0, %v1942_v14  ;;  %v5391_v31 = vld [vmem:[#allocation61_spill] sm:$0xff]  ;;  %v1975_v40 = vmul.f32 112.0, %v1943_v43 }
 0x3ad   : > { %2270 = vmatpush1.bf16.msra.mxu1 %v5370_v21  ;;  %2218 = vmatprep.subr.bf16.mxu0 %v5371_v1  ;;  %v1680_v55 = vpop.xlane.xlu1 %1679  ;;  %v5393_v1 = vld [vmem:[#allocation58_spill] sm:$0xff] }
 0x3ae   : > { %1824 = vadd.xlane.f32.xlu0 %v1823_v24  ;;  %2271 = vmatprep.subr.bf16.mxu1 %v5374_v29  ;;  %v3042_v33 = vpop.eup %3041  ;;  %v1944_v29 = vunpack.c.l.bf16 %v4745_v58 }
 0x3af   : > { %v4796_v37 = vpack.c.bf16 %v3040_v62, %v3042_v33  ;;  %v5392_v62 = vld [vmem:[#allocation55_spill] sm:$0xff]  ;;  %v5394_v33 = vld [vmem:[#allocation53_spill] sm:$0xff] }
 0x3b0   : > { %2219 = vmatpush1.bf16.msra.mxu0 %v5375_v19  ;;  %v5395_v19 = vld [vmem:[#allocation56_spill] sm:$0xff] }
 0x3b1   : > { %2272 = vmatpush1.bf16.msra.mxu1 %v5376_v26  ;;  %2220 = vmatprep.subr.bf16.mxu0 %v5377_v63  ;;  %v3044_v48 = vpop.eup %3043 }
 0x3b2   : > { %2273 = vmatprep.subr.bf16.mxu1 %v5378_v50  ;;  %v3046_v23 = vpop.eup %3045  ;;  %v1986_v50 = vmul.f32 112.0, %v1954_v54 }
 0x3b3   : > { %v4802_v52 = vpack.c.bf16 %v3044_v48, %v3046_v23  ;;  %v1955_v23 = vunpack.c.h.bf16 %v4753_v20 }
 0x3b4   : > { %2221 = vmatpush1.bf16.msra.mxu0 %v5379_v10 }
 0x3b5   : > { %2274 = vmatpush1.bf16.msra.mxu1 %v5380_v28  ;;  %2222 = vmatprep.subr.bf16.mxu0 %v4698_v49  ;;  %v1685_v49 = vpop.xlane.xlu1 %1684  ;;  %v1976_v28 = vmul.f32 112.0, %v1944_v29 }
 0x3b6   : > { %2275 = vmatprep.subr.bf16.mxu1 %v1537_v34  ;;  %v1970_v34 = vmul.f32 112.0, %v1938_v46 }
 0x3b8   : > { %2223 = vmatpush2.bf16.msra.mxu0 %v4694_v42  ;;  %v1939_v42 = vunpack.c.h.bf16 %v5381_v16 }
 0x3b9   : > { %2276 = vmatpush2.bf16.msra.mxu1 %v4718_v45  ;;  %2224 = vmatprep.subr.bf16.mxu0 %v4671_v36  ;;  %v2002_v36 = vsub.f32 %v1670_v7, %v1970_v34 }
 0x3ba   : > { %2277 = vmatprep.subr.bf16.mxu1 %v4709_v4  ;;  %v5382_v4 = vld [vmem:[#allocation26_spill] sm:$0xff] }
 0x3bc   : > { %2225 = vmatpush2.bf16.msra.mxu0 %v4659_v53  ;;  %v1971_v53 = vmul.f32 112.0, %v1939_v42 }
 0x3bd   : > { %2278 = vmatpush2.bf16.msra.mxu1 %v4685_v60  ;;  %2226 = vmatprep.subr.bf16.mxu0 %v4645_v59  ;;  %v1940_v60 = vunpack.c.l.bf16 %v5382_v4  ;;  %v1690_v59 = vpop.xlane.xlu1 %1689 }
 0x3be   : > { %2279 = vmatprep.subr.bf16.mxu1 %v4665_v0  ;;  %v2034_v0 = vmax.f32 %v2002_v36, 1e-30  ;;  %v2003_v45 = vsub.f32 %v1675_v2, %v1971_v53  ;;  %v2006_v21 = vsub.f32 %v1690_v59, %v1974_v8  ;;  %v1987_v36 = vmul.f32 112.0, %v1955_v23 }
 0x3c0   : > { %2227 = vmatpush2.bf16.msra.mxu0 %v4641_v6  ;;  %v1972_v6 = vmul.f32 112.0, %v1940_v60  ;;  %3047 = vrcp.f32 %v2034_v0  ;;  %v2038_v26 = vmax.f32 %v2006_v21, 1e-30 }
 0x3c1   : > { %2280 = vmatpush2.bf16.msra.mxu1 %v4650_v30  ;;  %2228 = vmatprep.subr.bf16.mxu0 %v4617_v51  ;;  %v1941_v51 = vunpack.c.h.bf16 %v5382_v4  ;;  %v1946_v4 = vunpack.c.l.bf16 %v4749_v57 }
 0x3c2   : > { %2281 = vmatprep.subr.bf16.mxu1 %v4628_v12  ;;  %v5383_v12 = vld [vmem:[#allocation28_spill] sm:$0xff]  ;;  %v2004_v30 = vsub.f32 %v1680_v55, %v1972_v6  ;;  %v1945_v55 = vunpack.c.h.bf16 %v4745_v58 }
 0x3c4   : > { %2229 = vmatpush2.bf16.msra.mxu0 %v4613_v56  ;;  %v2035_v56 = vmax.f32 %v2003_v45, 1e-30  ;;  %v1977_v53 = vmul.f32 112.0, %v1945_v55 }
 0x3c5   : > { %2282 = vmatpush2.bf16.msra.mxu1 %v4622_v32  ;;  %2230 = vmatprep.subr.bf16.mxu0 %v4532_v5  ;;  %v1695_v32 = vpop.xlane.xlu1 %1694  ;;  %v1973_v5 = vmul.f32 112.0, %v1941_v51  ;;  %v1978_v51 = vmul.f32 112.0, %v1946_v4 }
 0x3c6   : > { %2283 = vmatprep.subr.bf16.mxu1 %v4542_v13  ;;  %v5387_v13 = vld [vmem:[#allocation63_spill] sm:$0xff]  ;;  %3049 = vrcp.f32 %v2035_v56  ;;  %v2007_v63 = vsub.f32 %v1695_v32, %v1975_v40 }
 0x3c8   : > { %2231 = vmatpush2.bf16.msra.mxu0 %v4520_v3  ;;  %v2036_v3 = vmax.f32 %v2004_v30, 1e-30  ;;  %v2039_v46 = vmax.f32 %v2007_v63, 1e-30 }
 0x3c9   : > { %2284 = vmatpush2.bf16.msra.mxu1 %v4536_v25  ;;  %2232 = vmatprep.subr.bf16.mxu0 %v5383_v12  ;;  %v2005_v25 = vsub.f32 %v1685_v49, %v1973_v5  ;;  %v1700_v24 = vpop.xlane.xlu1 %1699  ;;  %v1947_v12 = vunpack.c.h.bf16 %v4749_v57  ;;  %v1956_v5 = vunpack.c.l.bf16 %v4758_v41 }
 0x3ca   : > { %2285 = vmatprep.subr.bf16.mxu1 %v5384_v47  ;;  %3051 = vrcp.f32 %v2036_v3  ;;  %v2008_v49 = vsub.f32 %v1700_v24, %v1976_v28  ;;  %v1957_v3 = vunpack.c.h.bf16 %v4758_v41  ;;  %v1958_v41 = vunpack.c.l.bf16 %v4762_v15 }
 0x3cb   : > { %v2037_v7 = vmax.f32 %v2005_v25, 1e-30  ;;  %v1979_v27 = vmul.f32 112.0, %v1947_v12 }
 0x3cc   : > { %2233 = vmatpush2.bf16.msra.mxu0 %v5386_v35  ;;  %v2040_v20 = vmax.f32 %v2008_v49, 1e-30  ;;  %v1989_v24 = vmul.f32 112.0, %v1957_v3  ;;  %v1990_v40 = vmul.f32 112.0, %v1958_v41  ;;  %v1949_v49 = vunpack.c.h.bf16 %v4773_v22 }
 0x3cd   : > { %2286 = vmatpush2.bf16.msra.mxu1 %v5387_v13  ;;  %2234 = vmatprep.subr.bf16.mxu0 %v5388_v61  ;;  %3053 = vrcp.f32 %v2037_v7  ;;  %v3048_v48 = vpop.eup %3047  ;;  %v1705_v2 = vpop.xlane.xlu1 %1704  ;;  %v1988_v61 = vmul.f32 112.0, %v1956_v5 }
 0x3ce   : > { %2287 = vmatprep.subr.bf16.mxu1 %v5389_v17  ;;  %3055 = vrcp.f32 %v2038_v26  ;;  %v2009_v45 = vsub.f32 %v1705_v2, %v1977_v53 }
 0x3d0   : > { %2235 = vmatpush2.bf16.msra.mxu0 %v5390_v11  ;;  %v2041_v56 = vmax.f32 %v2009_v45, 1e-30  ;;  %v5396_v45 = vld [vmem:[#allocation69_spill] sm:$0xff] }
 0x3d1   : > { %2288 = vmatpush2.bf16.msra.mxu1 %v5391_v31  ;;  %2236 = vmatprep.subr.bf16.mxu0 %v5392_v62  ;;  %v1710_v59 = vpop.xlane.xlu1 %1709 }
 0x3d2   : > { %2289 = vmatprep.subr.bf16.mxu1 %v5393_v1  ;;  %v2010_v30 = vsub.f32 %v1710_v59, %v1978_v51 }
 0x3d3   : > { %v3050_v42 = vpop.eup %3049 }
 0x3d4   : > { %2237 = vmatpush2.bf16.msra.mxu0 %v5394_v33  ;;  %v2042_v14 = vmax.f32 %v2010_v30, 1e-30  ;;  %v1959_v33 = vunpack.c.h.bf16 %v4762_v15 }
 0x3d5   : > { %2290 = vmatpush2.bf16.msra.mxu1 %v5395_v19  ;;  %v1715_v32 = vpop.xlane.xlu1 %1714 }
 0x3d6   : > { %v2011_v35 = vsub.f32 %v1715_v32, %v1979_v27 }
 0x3d7   : > { %v1750_v10 = vpop.xlane.xlu0 %1749  ;;  %v3052_v58 = vpop.eup %3051 }
 0x3d8   : > { %2106 = vxpose.xlu1.b32.start [1/16] (narrow) %v3048_v48, 8  ;;  %v2018_v16 = vsub.f32 %v1750_v10, %v1986_v50  ;;  %v2043_v8 = vmax.f32 %v2011_v35, 1e-30  ;;  %v1948_v50 = vunpack.c.l.bf16 %v4773_v22  ;;  %v1991_v48 = vmul.f32 112.0, %v1959_v33 }
 0x3d9   : > { %v1961_v35 = vunpack.c.h.bf16 %v4784_v9 }
 0x3da   : > { %v2050_v34 = vmax.f32 %v2018_v16, 1e-30  ;;  %v3054_v47 = vpop.eup %3053  ;;  %v1980_v55 = vmul.f32 112.0, %v1948_v50 }
 0x3db   : > { %v3056_v13 = vpop.eup %3055 }
 0x3dc   : > { %2107 = vxpose.xlu1.b32.cont [2/16] (narrow) %v3050_v42, 8  ;;  %3057 = vrcp.f32 %v2050_v34  ;;  %v1755_v60 = vpop.xlane.xlu0 %1754 }
 0x3dd   : > { %v2019_v0 = vsub.f32 %v1755_v60, %v1987_v36  ;;  %3059 = vrcp.f32 %v2039_v46  ;;  %v1981_v36 = vmul.f32 112.0, %v1949_v49 }
 0x3df   : > { %v2051_v6 = vmax.f32 %v2019_v0, 1e-30  ;;  %v1841_v0 = vsub.f32 0.0, %v4553_v18 }
 0x3e0   : > { %2108 = vxpose.xlu1.b32.cont [3/16] (narrow) %v3052_v58, 8  ;;  %v1840_v58 = vsub.f32 0.0, %v5396_v45 }
 0x3e1   : > { %3061 = vrcp.f32 %v2051_v6  ;;  %v1950_v6 = vunpack.c.l.bf16 %v4777_v44  ;;  %v1888_v51 = vmul.f32 1.442695, %v1841_v0 }
 0x3e2   : > { %3063 = vrcp.f32 %v2040_v20  ;;  %v1960_v20 = vunpack.c.l.bf16 %v4784_v9  ;;  %v1963_v9 = vunpack.c.h.bf16 %v4790_v38 }
 0x3e3   : > { %3065 = vrcp.f32 %v2041_v56  ;;  %v1886_v56 = vmul.f32 1.442695, %v1840_v58  ;;  %v1982_v32 = vmul.f32 112.0, %v1950_v6 }
 0x3e4   : > { %2109 = vxpose.xlu1.b32.cont [4/16] (narrow) %v3054_v47, 8  ;;  %3067 = vrcp.f32 %v2042_v14  ;;  %v1992_v12 = vmul.f32 112.0, %v1960_v20 }
 0x3e8   : > { %2110 = vxpose.xlu1.b32.cont [5/16] (narrow) %v3056_v13, 8  ;;  %v1760_v57 = vpop.xlane.xlu0 %1759 }
 0x3e9   : > { %v3058_v25 = vpop.eup %3057  ;;  %v2020_v17 = vsub.f32 %v1760_v57, %v1988_v61  ;;  %v1951_v61 = vunpack.c.h.bf16 %v4777_v44  ;;  %v1993_v57 = vmul.f32 112.0, %v1961_v35  ;;  %v1969_v35 = vunpack.c.h.bf16 %v4802_v52 }
 0x3ea   : > { %2138 = vxpose.xlu0.b32.start [1/16] (narrow) %v3058_v25, 8  ;;  %v3060_v43 = vpop.eup %3059 }
 0x3eb   : > { %v2052_v11 = vmax.f32 %v2020_v17, 1e-30  ;;  %v1962_v17 = vunpack.c.l.bf16 %v4790_v38 }
 0x3ec   : > { %2111 = vxpose.xlu1.b32.cont [6/16] (narrow) %v3060_v43, 8  ;;  %v1765_v31 = vpop.xlane.xlu0 %1764 }
 0x3ed   : > { %3069 = vrcp.f32 %v2052_v11  ;;  %v2021_v62 = vsub.f32 %v1765_v31, %v1989_v24 }
 0x3ee   : > { %v3062_v7 = vpop.eup %3061  ;;  %3071 = vrcp.f32 %v2043_v8  ;;  %v1983_v8 = vmul.f32 112.0, %v1951_v61 }
 0x3ef   : > { %v3064_v21 = vpop.eup %3063  ;;  %v2053_v1 = vmax.f32 %v2021_v62, 1e-30  ;;  %2139 = vxpose.xlu0.b32.cont [2/16] (narrow) %v3062_v7, 8  ;;  %v1994_v62 = vmul.f32 112.0, %v1962_v17 }
 0x3f0   : > { %2112 = vxpose.xlu1.b32.cont [7/16] (narrow) %v3064_v21, 8  ;;  %v3066_v54 = vpop.eup %3065 }
 0x3f1   : > { %3073 = vrcp.f32 %v2053_v1  ;;  %v3068_v26 = vpop.eup %3067 }
 0x3f4   : > { %2113 = vxpose.xlu1.b32.cont [8/16] (narrow) %v3066_v54, 8  ;;  %v1770_v29 = vpop.xlane.xlu0 %1769  ;;  %v1995_v54 = vmul.f32 112.0, %v1963_v9 }
 0x3f5   : > { %v2022_v19 = vsub.f32 %v1770_v29, %v1990_v40  ;;  %v1964_v40 = vunpack.c.l.bf16 %v4792_v39 }
 0x3f7   : > { %v2054_v63 = vmax.f32 %v2022_v19, 1e-30  ;;  %v1996_v38 = vmul.f32 112.0, %v1964_v40 }
 0x3f8   : > { %2114 = vxpose.xlu1.b32.cont [9/16] (narrow) %v3068_v26, 8  ;;  %v1775_v2 = vpop.xlane.xlu0 %1774 }
 0x3f9   : > { %3075 = vrcp.f32 %v2054_v63  ;;  %v2023_v23 = vsub.f32 %v1775_v2, %v1991_v48  ;;  %v1965_v2 = vunpack.c.h.bf16 %v4792_v39  ;;  %v1967_v39 = vunpack.c.h.bf16 %v4796_v37 }
 0x3fa   : > { %v3070_v10 = vpop.eup %3069 }
 0x3fb   : > { %v3072_v28 = vpop.eup %3071  ;;  %2140 = vxpose.xlu0.b32.cont [3/16] (narrow) %v3070_v10, 8  ;;  %v2055_v16 = vmax.f32 %v2023_v23, 1e-30 }
 0x3fc   : > { %2115 = vxpose.xlu1.b32.cont [10/16] (narrow) %v3072_v28, 8 }
 0x3fd   : > { %v1720_v46 = vpop.xlane.xlu1 %1719  ;;  %3077 = vrcp.f32 %v2055_v16  ;;  %v1997_v16 = vmul.f32 112.0, %v1965_v2 }
 0x3fe   : > { %v3074_v15 = vpop.eup %3073  ;;  %v2012_v34 = vsub.f32 %v1720_v46, %v1980_v55  ;;  %v1966_v46 = vunpack.c.l.bf16 %v4796_v37 }
 0x3ff   : > { %2141 = vxpose.xlu0.b32.cont [4/16] (narrow) %v3074_v15, 8 }
 0x400   : > { %v2044_v42 = vmax.f32 %v2012_v34, 1e-30 }
 0x402   : > { %3079 = vrcp.f32 %v2044_v42  ;;  %v1725_v53 = vpop.xlane.xlu1 %1724 }
 0x403   : > { %v2013_v4 = vsub.f32 %v1725_v53, %v1981_v36 }
 0x405   : > { %v2045_v60 = vmax.f32 %v2013_v4, 1e-30 }
 0x406   : > { %v3076_v59 = vpop.eup %3075 }
 0x407   : > { %3081 = vrcp.f32 %v2045_v60  ;;  %2142 = vxpose.xlu0.b32.cont [5/16] (narrow) %v3076_v59, 8  ;;  %v1998_v60 = vmul.f32 112.0, %v1966_v46 }
 0x408   : > { %3083 = vpow2.f32 %v1888_v51 }
 0x409   : > { %3085 = vpow2.f32 %v1886_v56  ;;  %v1968_v56 = vunpack.c.l.bf16 %v4802_v52 }
 0x40a   : > { %v3078_v22 = vpop.eup %3077 }
 0x40b   : > { %2143 = vxpose.xlu0.b32.cont [6/16] (narrow) %v3078_v22, 8 }
 0x40e   : > { %v1780_v30 = vpop.xlane.xlu0 %1779 }
 0x40f   : > { %v3080_v47 = vpop.eup %3079  ;;  %v2024_v5 = vsub.f32 %v1780_v30, %v1992_v12  ;;  %v1730_v27 = vpop.xlane.xlu1 %1729  ;;  %v1999_v12 = vmul.f32 112.0, %v1967_v39 }
 0x410   : > { %2116 = vxpose.xlu1.b32.cont [11/16] (narrow) %v3080_v47, 8  ;;  %v2014_v14 = vsub.f32 %v1730_v27, %v1982_v32 }
 0x411   : > { %v2056_v18 = vmax.f32 %v2024_v5, 1e-30 }
 0x412   : > { %v2046_v13 = vmax.f32 %v2014_v14, 1e-30 }
 0x413   : > { %3087 = vrcp.f32 %v2056_v18  ;;  %v2000_v18 = vmul.f32 112.0, %v1968_v56 }
 0x414   : > { %v3082_v3 = vpop.eup %3081  ;;  %3089 = vrcp.f32 %v2046_v13 }
 0x415   : > { %2117 = vxpose.xlu1.b32.cont [12/16] (narrow) %v3082_v3, 8  ;;  %v3084_v44 = vpop.eup %3083 }
 0x416   : > { %v1785_v25 = vpop.xlane.xlu0 %1784  ;;  %v3086_v29 = vpop.eup %3085 }
 0x417   : > { %v2025_v43 = vsub.f32 %v1785_v25, %v1993_v57  ;;  %v1929_v63 = vpack.c.bf16 %v3084_v44, %v3086_v29  ;;  %v2001_v25 = vmul.f32 112.0, %v1969_v35  ;;  %v2197_v35 = vld [vmem:[#allocation3 + $0x48] sm:$0xff] }
 0x418   : > { %v1735_v11 = vpop.xlane.xlu1 %1734 }
 0x419   : > { %v2015_v24 = vsub.f32 %v1735_v11, %v1983_v8  ;;  %v2057_v31 = vmax.f32 %v2025_v43, 1e-30  ;;  %v1952_v28 = vunpack.c.l.bf16 %v1929_v63  ;;  %v1953_v36 = vunpack.c.h.bf16 %v1929_v63  ;;  %v432_v63 = vld [vmem:[%s3456_s0 + $0x70] sm:$0xff] }
 0x41a   : > { %v2105_v2 = vunpack.c.h.bf16 %v432_v63 }
 0x41b   : > { %v2047_v7 = vmax.f32 %v2015_v24, 1e-30  ;;  %3091 = vrcp.f32 %v2057_v31  ;;  %v1790_v21 = vpop.xlane.xlu0 %1789  ;;  %v1984_v42 = vmul.f32 112.0, %v1952_v28  ;;  %v1985_v6 = vmul.f32 112.0, %v1953_v36 }
 0x41c   : > { %v2026_v1 = vsub.f32 %v1790_v21, %v1994_v62  ;;  %v2170_v21 = vlaneseq }
 0x41d   : > { %3093 = vrcp.f32 %v2047_v7 }
 0x41e   : > { %v2058_v41 = vmax.f32 %v2026_v1, 1e-30  ;;  %v2171_v1 = vshrl.u32 %v2170_v21, 7 }
 0x41f   : > { %v1795_v33 = vpop.xlane.xlu0 %1794 }
 0x420   : > { %v3088_v19 = vpop.eup %3087  ;;  %3095 = vrcp.f32 %v2058_v41  ;;  %v2027_v26 = vsub.f32 %v1795_v33, %v1995_v54  ;;  %v2172_v44 = vsub.s32 0, %v2171_v1  ;;  %v429_v41 = vld [vmem:[%s3456_s0 + $0x40] sm:$0xff]  ;;  %v430_v54 = vld [vmem:[%s3456_s0 + $0x50] sm:$0xff] }
 0x421   : > { %2144 = vxpose.xlu0.b32.cont [7/16] (narrow) %v3088_v19, 8  ;;  %v3090_v50 = vpop.eup %3089  ;;  %v2098_v29 = vunpack.c.l.bf16 %v429_v41  ;;  %v2100_v33 = vunpack.c.l.bf16 %v430_v54  ;;  %v2202_v1 = vld [vmem:[#allocation3 + $0x60] sm:$0xff] }
 0x422   : > { %v2059_v48 = vmax.f32 %v2027_v26, 1e-30  ;;  %2118 = vxpose.xlu1.b32.cont [13/16] (narrow) %v3090_v50, 8  ;;  %v431_v26 = vld [vmem:[%s3456_s0 + $0x60] sm:$0xff]  ;;  %v2099_v50 = vunpack.c.h.bf16 %v429_v41 }
 0x423   : > { %v1800_v10 = vpop.xlane.xlu0 %1799  ;;  %v2102_v36 = vunpack.c.l.bf16 %v431_v26 }
 0x424   : > { %3097 = vrcp.f32 %v2059_v48  ;;  %v2028_v23 = vsub.f32 %v1800_v10, %v1996_v38  ;;  %v2101_v48 = vunpack.c.h.bf16 %v430_v54  ;;  %v2103_v38 = vunpack.c.h.bf16 %v431_v26 }
 0x426   : > { %v2060_v55 = vmax.f32 %v2028_v23, 1e-30 }
 0x427   : > { %v1805_v49 = vpop.xlane.xlu0 %1804 }
 0x428   : > { %v3092_v15 = vpop.eup %3091  ;;  %3099 = vrcp.f32 %v2060_v55  ;;  %v2029_v34 = vsub.f32 %v1805_v49, %v1997_v16 }
 0x429   : > { %2145 = vxpose.xlu0.b32.cont [8/16] (narrow) %v3092_v15, 8 }
 0x42a   : > { %v3094_v53 = vpop.eup %3093  ;;  %v2061_v4 = vmax.f32 %v2029_v34, 1e-30  ;;  %v1740_v59 = vpop.xlane.xlu1 %1739 }
 0x42b   : > { %2119 = vxpose.xlu1.b32.cont [14/16] (narrow) %v3094_v53, 8  ;;  %v1810_v0 = vpop.xlane.xlu0 %1809  ;;  %v2016_v20 = vsub.f32 %v1740_v59, %v1984_v42  ;;  %v2104_v53 = vunpack.c.l.bf16 %v432_v63 }
 0x42c   : > { %3101 = vrcp.f32 %v2061_v4  ;;  %v2030_v45 = vsub.f32 %v1810_v0, %v1998_v60  ;;  %v2190_v0 = vld [vmem:[#allocation3 + $0x30] sm:$0xff] }
 0x42d   : > { %v3096_v58 = vpop.eup %3095  ;;  %v2048_v22 = vmax.f32 %v2016_v20, 1e-30  ;;  %v2192_v20 = vld [vmem:[#allocation3 + $0x58] sm:$0xff] }
 0x42e   : > { %v2062_v51 = vmax.f32 %v2030_v45, 1e-30  ;;  %2146 = vxpose.xlu0.b32.cont [9/16] (narrow) %v3096_v58, 8  ;;  %v1745_v30 = vpop.xlane.xlu1 %1744 }
 0x42f   : > { %v1815_v47 = vpop.xlane.xlu0 %1814  ;;  %3103 = vrcp.f32 %v2048_v22  ;;  %v2017_v32 = vsub.f32 %v1745_v30, %v1985_v6  ;;  %v2191_v22 = vld [vmem:[#allocation3] sm:$0xff]  ;;  %v2193_v6 = vld [vmem:[#allocation3 + $0x18] sm:$0xff] }
 0x430   : > { %3105 = vrcp.f32 %v2062_v51  ;;  %v2031_v37 = vsub.f32 %v1815_v47, %v1999_v12  ;;  %v2194_v47 = vld [vmem:[#allocation3 + $0x50] sm:$0xff] }
 0x431   : > { %v3098_v5 = vpop.eup %3097  ;;  %v2049_v27 = vmax.f32 %v2017_v32, 1e-30  ;;  %v2196_v32 = vld [vmem:[#allocation3 + $0x8] sm:$0xff] }
 0x432   : > { %v2063_v14 = vmax.f32 %v2031_v37, 1e-30  ;;  %2147 = vxpose.xlu0.b32.cont [10/16] (narrow) %v3098_v5, 8 }
 0x433   : > { %v1820_v13 = vpop.xlane.xlu0 %1819  ;;  %3107 = vrcp.f32 %v2049_v27 }
 0x434   : > { %3109 = vrcp.f32 %v2063_v14  ;;  %v2032_v61 = vsub.f32 %v1820_v13, %v2000_v18  ;;  %v2195_v18 = vld [vmem:[#allocation3 + $0x68] sm:$0xff] }
 0x435   : > { %v3100_v3 = vpop.eup %3099 }
 0x436   : > { %v2064_v57 = vmax.f32 %v2032_v61, 1e-30  ;;  %2148 = vxpose.xlu0.b32.cont [11/16] (narrow) %v3100_v3, 8 }
 0x437   : > { %v1825_v17 = vpop.xlane.xlu0 %1824 }
 0x438   : > { %3111 = vrcp.f32 %v2064_v57  ;;  %v2033_v8 = vsub.f32 %v1825_v17, %v2001_v25  ;;  %v2198_v25 = vld [vmem:[#allocation3 + $0x40] sm:$0xff]  ;;  %v2200_v17 = vld [vmem:[#allocation3 + $0x10] sm:$0xff] }
 0x439   : > { %v3102_v43 = vpop.eup %3101 }
 0x43a   : > { %v2065_v11 = vmax.f32 %v2033_v8, 1e-30  ;;  %2149 = vxpose.xlu0.b32.cont [12/16] (narrow) %v3102_v43, 8 }
 0x43c   : > { %v3104_v24 = vpop.eup %3103  ;;  %3113 = vrcp.f32 %v2065_v11 }
 0x43d   : > { %v3106_v31 = vpop.eup %3105  ;;  %2120 = vxpose.xlu1.b32.cont [15/16] (narrow) %v3104_v24, 8 }
 0x43e   : > { %2150 = vxpose.xlu0.b32.cont [13/16] (narrow) %v3106_v31, 8  ;;  %v2199_v31 = vld [vmem:[#allocation3 + $0x20] sm:$0xff] }
 0x440   : > { %v3108_v52 = vpop.eup %3107 }
 0x441   : > { %v3110_v62 = vpop.eup %3109  ;;  %2121 = vxpose.xlu1.b32.end [16/16] (narrow) %v3108_v52, 8  ;;  %v2201_v52 = vld [vmem:[#allocation3 + $0x38] sm:$0xff] }
 0x442   : > { %2151 = vxpose.xlu0.b32.cont [14/16] (narrow) %v3110_v62, 8 }
 0x445   : > { %v3112_v9 = vpop.eup %3111 }
 0x446   : > { %2152 = vxpose.xlu0.b32.cont [15/16] (narrow) %v3112_v9, 8 }
 0x449   : > { %v3114_v7 = vpop.eup %3113 }
 0x44a   : > { %2153 = vxpose.xlu0.b32.end [16/16] (narrow) %v3114_v7, 8 }
 0x481   : > { %v2122_v40 = vpop.trf.xlu1 }
 0x482   : > { %v2173_v19 = vrot.slane %v2122_v40, %v2172_v44 }
 0x484   : > { %v2178_v23 = vmul.f32 %v2173_v19, %v2098_v29  ;;  %v2180_v28 = vmul.f32 %v2173_v19, %v2100_v33  ;;  %v2182_v60 = vmul.f32 %v2173_v19, %v2102_v36  ;;  %v2184_v39 = vmul.f32 %v2173_v19, %v2104_v53  ;;  %v2203_v33 = vld [vmem:[#allocation3 + $0x70] sm:$0xff]  ;;  %v2205_v19 = vld [vmem:[#allocation3 + $0x28] sm:$0xff] }
 0x486   : > { %v2186_v34 = vpack.c.bf16 %v2180_v28, %v2178_v23  ;;  %v2188_v59 = vpack.c.bf16 %v2184_v39, %v2182_v60 }
 0x48a   : > { %v2154_v10 = vpop.trf.xlu0 }
 0x48b   : > { %v2177_v55 = vrot.slane %v2154_v10, %v2172_v44  ;;  %v2204_v44 = vld [vmem:[#allocation3 + $0x78] sm:$0xff] }
 0x48d   : > { %v2179_v16 = vmul.f32 %v2177_v55, %v2099_v50  ;;  %v2181_v46 = vmul.f32 %v2177_v55, %v2101_v48  ;;  %v2183_v49 = vmul.f32 %v2177_v55, %v2103_v38  ;;  %v2185_v15 = vmul.f32 %v2177_v55, %v2105_v2 }
 0x48f   : > { %v2187_v42 = vpack.c.bf16 %v2181_v46, %v2179_v16  ;;  %v2189_v4 = vpack.c.bf16 %v2185_v15, %v2183_v49 }
 0x491   : > { %2238 = vmatprep.mubr.bf16.mxu0 %v2187_v42  ;;  %2291 = vmatprep.mubr.bf16.mxu1 %v2187_v42 }
 0x492   : > { %2239 = vmatmul.mubr.bf16.vlgmr.msra.gmra.mxu0 %v2186_v34  ;;  %2292 = vmatmul.mubr.bf16.vlgmr.msra.gmra.mxu1 %v2186_v34 }
 0x493   : > { %2248 = vmatprep.mubr.bf16.mxu0 %v2189_v4  ;;  %2301 = vmatprep.mubr.bf16.mxu1 %v2189_v4 }
 0x49a   : > { %2249 = vmatmul.mubr.bf16.gmra.mxu0 %v2188_v59  ;;  %2302 = vmatmul.mubr.bf16.gmra.mxu1 %v2188_v59 }
 0x552   : > { %v2240_v45 = vpop.f32.mrf.mxu0  ;;  %v2293_v58 = vpop.f32.mrf.mxu1 }
 0x553   : > { %v2312_v51 = vadd.f32 %v2240_v45, %v2190_v0  ;;  %v2314_v12 = vadd.f32 %v2293_v58, %v2192_v20 }
 0x554   : > { %v2242_v56 = vpop.f32.mrf.mxu0  ;;  %v2295_v30 = vpop.f32.mrf.mxu1 }
 0x555   : > { %2328 = vst [vmem:[#allocation3 + $0x30] sm:$0xff] %v2312_v51  ;;  %2330 = vst [vmem:[#allocation3 + $0x58] sm:$0xff] %v2314_v12  ;;  %v2313_v37 = vadd.f32 %v2242_v56, %v2191_v22  ;;  %v2315_v5 = vadd.f32 %v2295_v30, %v2193_v6 }
 0x556   : > { %v2244_v27 = vpop.f32.mrf.mxu0  ;;  %v2297_v14 = vpop.f32.mrf.mxu1 }
 0x557   : > { %2329 = vst [vmem:[#allocation3] sm:$0xff] %v2313_v37  ;;  %2331 = vst [vmem:[#allocation3 + $0x18] sm:$0xff] %v2315_v5  ;;  %v2316_v13 = vadd.f32 %v2244_v27, %v2194_v47  ;;  %v2318_v61 = vadd.f32 %v2297_v14, %v2196_v32 }
 0x558   : > { %v2246_v3 = vpop.f32.mrf.mxu0  ;;  %v2299_v57 = vpop.f32.mrf.mxu1 }
 0x559   : > { %2332 = vst [vmem:[#allocation3 + $0x50] sm:$0xff] %v2316_v13  ;;  %2334 = vst [vmem:[#allocation3 + $0x8] sm:$0xff] %v2318_v61  ;;  %v2317_v8 = vadd.f32 %v2246_v3, %v2195_v18  ;;  %v2319_v43 = vadd.f32 %v2299_v57, %v2197_v35 }
 0x55a   : > { %v2250_v11 = vpop.f32.mrf.mxu0  ;;  %v2303_v24 = vpop.f32.mrf.mxu1 }
 0x55b   : > { %2333 = vst [vmem:[#allocation3 + $0x68] sm:$0xff] %v2317_v8  ;;  %2335 = vst [vmem:[#allocation3 + $0x48] sm:$0xff] %v2319_v43  ;;  %v2320_v62 = vadd.f32 %v2250_v11, %v2198_v25  ;;  %v2322_v9 = vadd.f32 %v2303_v24, %v2200_v17 }
 0x55c   : > { %v2252_v7 = vpop.f32.mrf.mxu0  ;;  %v2305_v21 = vpop.f32.mrf.mxu1 }
 0x55d   : > { %2336 = vst [vmem:[#allocation3 + $0x40] sm:$0xff] %v2320_v62  ;;  %2338 = vst [vmem:[#allocation3 + $0x10] sm:$0xff] %v2322_v9  ;;  %v2321_v41 = vadd.f32 %v2252_v7, %v2199_v31  ;;  %v2323_v54 = vadd.f32 %v2305_v21, %v2201_v52 }
 0x55e   : > { %v2254_v40 = vpop.f32.mrf.mxu0  ;;  %v2307_v29 = vpop.f32.mrf.mxu1 }
 0x55f   : > { %2337 = vst [vmem:[#allocation3 + $0x20] sm:$0xff] %v2321_v41  ;;  %2339 = vst [vmem:[#allocation3 + $0x38] sm:$0xff] %v2323_v54  ;;  %v2324_v26 = vadd.f32 %v2254_v40, %v2202_v1  ;;  %v2326_v63 = vadd.f32 %v2307_v29, %v2204_v44  ;;  %2347 = sbr.rel (%p2609_p1) target bundleno = 1396 (0x574), region = 51 }
 0x560   : > { %v2256_v50 = vpop.f32.mrf.mxu0  ;;  %v2309_v48 = vpop.f32.mrf.mxu1 }
 0x561   : > { %2340 = vst [vmem:[#allocation3 + $0x60] sm:$0xff] %v2324_v26  ;;  %2342 = vst [vmem:[#allocation3 + $0x78] sm:$0xff] %v2326_v63  ;;  %v2325_v38 = vadd.f32 %v2256_v50, %v2203_v33  ;;  %v2327_v2 = vadd.f32 %v2309_v48, %v2205_v19 }
 0x563   : > { %2341 = vst [vmem:[#allocation3 + $0x70] sm:$0xff] %v2325_v38  ;;  %2343 = vst [vmem:[#allocation3 + $0x28] sm:$0xff] %v2327_v2 }
 0x564   : > { %v2349_v10 = vld [vmem:[#allocation3 + $0x30] sm:$0xff]  ;;  %v2350_v23 = vld [vmem:[#allocation3] sm:$0xff]  ;;  %v2351_v28 = vld [vmem:[#allocation3 + $0x58] sm:$0xff]  ;;  %v2365_v4 = vstv %s2348_s22 }
 0x565   : > { %v2382_v55 = vld [vmem:[%s3382_s11] sm:$0xff]  ;;  %v2383_v16 = vld [vmem:[%s3382_s11 + $0x8] sm:$0xff]  ;;  %v2384_v46 = vld [vmem:[%s3382_s11 + $0x10] sm:$0xff]  ;;  %v2366_v0 = vmul.f32 %v2365_v4, %v2349_v10  ;;  %v2367_v20 = vmul.f32 %v2365_v4, %v2350_v23  ;;  %v2368_v45 = vmul.f32 %v2365_v4, %v2351_v28 }
 0x566   : > { %v2352_v49 = vld [vmem:[#allocation3 + $0x18] sm:$0xff]  ;;  %v2353_v34 = vld [vmem:[#allocation3 + $0x50] sm:$0xff]  ;;  %v2354_v42 = vld [vmem:[#allocation3 + $0x68] sm:$0xff] }
 0x567   : > { %v2385_v15 = vld [vmem:[%s3382_s11 + $0x18] sm:$0xff]  ;;  %v2355_v36 = vld [vmem:[#allocation3 + $0x8] sm:$0xff]  ;;  %v2386_v60 = vld [vmem:[%s3382_s11 + $0x20] sm:$0xff]  ;;  %v2369_v58 = vmul.f32 %v2365_v4, %v2352_v49  ;;  %v2370_v12 = vmul.f32 %v2365_v4, %v2353_v34  ;;  %v2371_v56 = vmul.f32 %v2365_v4, %v2354_v42  ;;  %v2398_v18 = vadd.f32 %v2382_v55, %v2366_v0 }
 0x568   : > { %v2356_v53 = vld [vmem:[#allocation3 + $0x48] sm:$0xff]  ;;  %v2388_v59 = vld [vmem:[%s3382_s11 + $0x30] sm:$0xff]  ;;  %v2389_v22 = vld [vmem:[%s3382_s11 + $0x38] sm:$0xff]  ;;  %v2372_v30 = vmul.f32 %v2365_v4, %v2355_v36  ;;  %v2399_v35 = vadd.f32 %v2383_v16, %v2367_v20  ;;  %v2400_v13 = vadd.f32 %v2384_v46, %v2368_v45 }
 0x569   : > { %v2387_v39 = vld [vmem:[%s3382_s11 + $0x28] sm:$0xff]  ;;  %v2357_v6 = vld [vmem:[#allocation3 + $0x40] sm:$0xff]  ;;  %v2373_v47 = vmul.f32 %v2365_v4, %v2356_v53  ;;  %v2359_v5 = vld [vmem:[#allocation3 + $0x10] sm:$0xff]  ;;  %v2401_v61 = vadd.f32 %v2385_v15, %v2369_v58  ;;  %v2402_v17 = vadd.f32 %v2386_v60, %v2370_v12  ;;  %2414 = vst [vmem:[%s3388_s10] sm:$0xff] %v2398_v18 }
 0x56a   : > { %v2358_v51 = vld [vmem:[#allocation3 + $0x20] sm:$0xff]  ;;  %v2391_v37 = vld [vmem:[%s3382_s11 + $0x48] sm:$0xff]  ;;  %v2392_v27 = vld [vmem:[%s3382_s11 + $0x50] sm:$0xff]  ;;  %v2403_v8 = vadd.f32 %v2387_v39, %v2371_v56  ;;  %v2404_v43 = vadd.f32 %v2388_v59, %v2372_v30  ;;  %2415 = vst [vmem:[%s3388_s10 + $0x8] sm:$0xff] %v2399_v35  ;;  %v2374_v62 = vmul.f32 %v2365_v4, %v2357_v6  ;;  %v2376_v7 = vmul.f32 %v2365_v4, %v2359_v5 }
 0x56b   : > { %v2390_v32 = vld [vmem:[%s3382_s11 + $0x40] sm:$0xff]  ;;  %v2360_v14 = vld [vmem:[#allocation3 + $0x38] sm:$0xff]  ;;  %v2362_v57 = vld [vmem:[#allocation3 + $0x70] sm:$0xff]  ;;  %v2405_v11 = vadd.f32 %v2389_v22, %v2373_v47  ;;  %2416 = vst [vmem:[%s3388_s10 + $0x10] sm:$0xff] %v2400_v13  ;;  %v2375_v9 = vmul.f32 %v2365_v4, %v2358_v51 }
 0x56c   : > { %v2361_v3 = vld [vmem:[#allocation3 + $0x60] sm:$0xff]  ;;  %v2363_v25 = vld [vmem:[#allocation3 + $0x78] sm:$0xff]  ;;  %v2364_v52 = vld [vmem:[#allocation3 + $0x28] sm:$0xff]  ;;  %2417 = vst [vmem:[%s3388_s10 + $0x18] sm:$0xff] %v2401_v61  ;;  %v2377_v21 = vmul.f32 %v2365_v4, %v2360_v14  ;;  %v2379_v40 = vmul.f32 %v2365_v4, %v2362_v57  ;;  %v2406_v19 = vadd.f32 %v2390_v32, %v2374_v62  ;;  %v2408_v63 = vadd.f32 %v2392_v27, %v2376_v7 }
 0x56d   : > { %v2393_v24 = vld [vmem:[%s3382_s11 + $0x58] sm:$0xff]  ;;  %v2394_v31 = vld [vmem:[%s3382_s11 + $0x60] sm:$0xff]  ;;  %v2395_v1 = vld [vmem:[%s3382_s11 + $0x68] sm:$0xff]  ;;  %2418 = vst [vmem:[%s3388_s10 + $0x20] sm:$0xff] %v2402_v17  ;;  %v2378_v54 = vmul.f32 %v2365_v4, %v2361_v3  ;;  %v2380_v29 = vmul.f32 %v2365_v4, %v2363_v25  ;;  %v2381_v33 = vmul.f32 %v2365_v4, %v2364_v52  ;;  %v2407_v26 = vadd.f32 %v2391_v37, %v2375_v9 }
 0x56e   : > { %v2396_v44 = vld [vmem:[%s3382_s11 + $0x70] sm:$0xff]  ;;  %v2397_v41 = vld [vmem:[%s3382_s11 + $0x78] sm:$0xff]  ;;  %2419 = vst [vmem:[%s3388_s10 + $0x28] sm:$0xff] %v2403_v8  ;;  %2420 = vst [vmem:[%s3388_s10 + $0x30] sm:$0xff] %v2404_v43  ;;  %v2409_v50 = vadd.f32 %v2393_v24, %v2377_v21  ;;  %v2411_v38 = vadd.f32 %v2395_v1, %v2379_v40 }
 0x56f   : > { %2421 = vst [vmem:[%s3388_s10 + $0x38] sm:$0xff] %v2405_v11  ;;  %v2410_v48 = vadd.f32 %v2394_v31, %v2378_v54  ;;  %v2412_v2 = vadd.f32 %v2396_v44, %v2380_v29  ;;  %v2413_v10 = vadd.f32 %v2397_v41, %v2381_v33  ;;  %2422 = vst [vmem:[%s3388_s10 + $0x40] sm:$0xff] %v2406_v19 }
 0x570   : > { %2423 = vst [vmem:[%s3388_s10 + $0x48] sm:$0xff] %v2407_v26  ;;  %2424 = vst [vmem:[%s3388_s10 + $0x50] sm:$0xff] %v2408_v63 }
 0x571   : > { %2425 = vst [vmem:[%s3388_s10 + $0x58] sm:$0xff] %v2409_v50  ;;  %2426 = vst [vmem:[%s3388_s10 + $0x60] sm:$0xff] %v2410_v48 }
 0x572   : > { %2427 = vst [vmem:[%s3388_s10 + $0x68] sm:$0xff] %v2411_v38  ;;  %2428 = vst [vmem:[%s3388_s10 + $0x70] sm:$0xff] %v2412_v2 }
 0x573   : > { %2429 = vst [vmem:[%s3388_s10 + $0x78] sm:$0xff] %v2413_v10 }
 0x574 PF: > { %s2624_s17 = sshll.u32 %s3231_s18, 11  ;;  %s2444_s27 = sshll.u32 %s3388_s10, 4  ;;  %s4910_s27 = int_to_ptr.vmem [resolvable:$true] %s2444_s27 }
 0x575   : > { %s4907_s29 = scalar_lea.hbm %s4966_s3, %s2624_s17  ;;  %s2431_s6 = scalar_lea.sflag [#allocation7], %s3378_s7 }
 0x576   : > { %s3143_s26 = scalar_lea.vmem %s4910_s27, 2048  ;;  %s3255_s4 = smov [#allocation8]  }
 0x577   : > { %p3144_p4 = scmp.ne.s32.totalorder %s4910_s27, %s3143_s26  ;;  %s3147_s8 = sshll.u32 %s3255_s4, 4  ;;  %s3148_s8 = int_to_ptr.vmem [resolvable:$false] %s3147_s8 }
 0x578   : > { %s3149_s18 = scalar_lea.vmem %s3148_s8, 4096  ;;  %p3150_p7 = scmp.lt.s32.totalorder %s4910_s27, %s3148_s8 }
 0x579   : > { %p3145_p5 = pnand %p3144_p4, %p3344_p10  ;;  %p3151_p8 = scmp.lt.s32.totalorder %s3149_s18, %s3143_s26 }
 0x57b   : > { %p3146_p6 = pneg %p3145_p5  ;;  %p3152_p12 = por %p3151_p8, %p3150_p7 }
 0x57d   : > { %p3153_p3 = pnand %p3152_p12, %p3146_p6 }
 0x57f   : > { %3156 = shalt.err (!%p3153_p3)
}
 0x580   : > { %s3157_s10 = scalar_lea.hbm %s4907_s29, 2048  ;;  %s3161_s13 = scalar_lea.hbm %s4966_s3, 4096 }
 0x581   : > { %p3158_p13 = scmp.ne.s32.totalorder %s4907_s29, %s3157_s10  ;;  %p3162_p9 = scmp.lt.s32.totalorder %s4907_s29, %s4966_s3 }
 0x582   : > { %p3163_p1 = scmp.lt.s32.totalorder %s3161_s13, %s3157_s10 }
 0x583   : > { %p3159_p2 = pnand %p3158_p13, %p3344_p10 }
 0x584   : > { %p3164_p4 = por %p3163_p1, %p3162_p9 }
 0x585   : > { %p3160_p0 = pneg %p3159_p2 }
 0x587   : > { %p3165_p5 = pnand %p3164_p4, %p3160_p0 }
 0x589   : > { %3168 = shalt.err (!%p3165_p5)
}
 0x58a   : > { %s3256_s17 = smov 512   ;;  %s3257_s11 = smov 32  }
 0x58b   : > { %2631 = dma.vmem_to_hbm [thread:$0]  (%p3344_p10), %s4910_s27, 2048, %s4907_s29, %s2431_s6, %s3256_s17, %s3256_s17, %s3257_s11  }
 0x58c PF: > { %p2642_p6 = scmp.ge.s32.totalorder %s3243_s21, 2  ;;  %s2459_s25 = sand.u32 1, %s3215_s14  }
 0x58d   : > { %s2460_s26 = scalar_lea.sflag [#allocation7], %s2459_s25 }
 0x58e   : > { %p2638_p7 = pnand %p2642_p6, %p3350_p11 }
 0x590   : > { %p2639_p8 = pneg %p2638_p7 }
 0x592   : > { %3210 = dma.done.wait (%p2639_p8), %s2460_s26, 2048  }
 0x593   : > { %3212 = vsyncadd (%p2639_p8), %s2460_s26, 4294965248  ;;  %s20_s21 = sadd.s32 1, %s3243_s21   ;;  %s5397_s14 = smov %s3219_s15 }
 0x594   : > { %p17_p12 = scmp.ge.s32.totalorder %s20_s21, 6   ;;  %s5398_s15 = smov %s3223_s16 }
 0x595   : > { %s5399_s16 = smov %s3357_s5  ;;  %s5400_s17 = smov %s3235_s19 }
 0x596   : > { %s5401_s18 = smov %s3239_s20  ;;  %s5402_s19 = smov %s5405_s23 }
 0x597   : > { %s5403_s20 = smov %s5409_s24  ;;  %19 = sbr.rel (!%p17_p12) target bundleno = 9 (0x9), region = 106 }
 0x59c   :  { %2465 = vsyncpa [#allocation6], 1 }
 0x59d   :  { %2467 = vsyncpa [#allocation6 + $0x1], 1 }
 0x59e   :  { %2468 = vsyncpa [#allocation7], 1 }
 0x59f   :  { %2470 = vsyncpa [#allocation7 + $0x1], 1 }

</bundles_post_ra>
